<compile_context>
chip_gen: v7x
topology: tpu7x:2x2x1
jax: 0.10.0
libtpu: 0.0.40
codegen_flags: <defaults>
</compile_context>

<pallas_src>
import jax
import jax.numpy as jnp
from jax import lax
from jax.experimental import pallas as pl
from jax.experimental.pallas import tpu as pltpu

BN_EPS = 1e-5   # BatchNorm2d default
LANES = 128
SUBLANES = 8


def _ceil_to(x, m):
    return -(-x // m) * m


def _vmem_limit_bytes():
    """Per-generation VMEM limit: ~3/4 of physical, clamped to [32, 100] MiB."""
    try:
        cap = int(pltpu.get_tpu_info().vmem_capacity_bytes)
    except Exception:
        cap = 64 * 1024 * 1024
    return int(min(max(cap * 3 // 4, 32 * 1024 * 1024), 100 * 1024 * 1024))


def _make_conv_stats_kernel(KH, KW, TH, OW, OH, stride, dilation, Cp,
                            rt_gt_one, needs_row_mask):
    """Pass 1: in-kernel im2col-free conv (tap-decomposed matmuls) + stats."""
    MT = TH * OW

    def kernel(x_ref, w_ref, y_ref, s_ref, ss_ref):
        # x_ref: (1, HP, WP, Cin_p) bf16  (whole padded image, VMEM resident)
        # w_ref: (KH*KW, Cin_p, Cp) bf16  (per-tap weight matrices)
        # y_ref: (MT, Cp) bf16            (conv output tile)
        # s_ref/ss_ref: (8, Cp) f32       (per-tile sum / sum-of-squares partials)
        r = pl.program_id(1) if rt_gt_one else 0
        acc = jnp.zeros((MT, Cp), jnp.float32)
        for ki in range(KH):
            for kj in range(KW):
                h0 = r * (TH * stride) + ki * dilation
                w0 = kj * dilation
                if stride == 1:
                    win = x_ref[0, pl.ds(h0, TH), pl.ds(w0, OW), :]
                else:
                    # TODO(synk): strided in-kernel windows (stride > 1) are
                    # supported via strided pl.ds but untested on hardware.
                    win = x_ref[0, pl.ds(h0, TH, stride),
                                pl.ds(w0, OW, stride), :]
                lhs = win.reshape(MT, win.shape[-1])                 # (MT, Cin_p)
                acc = acc + jnp.dot(lhs, w_ref[ki * KW + kj],
                                    preferred_element_type=jnp.float32)

        # bf16 intermediate (halves HBM round-trip); stats from f32 accumulator.
        y_ref[...] = acc.astype(y_ref.dtype)

        if needs_row_mask:
            # Padded output rows (oh >= OH) may see real data — exclude them
            # from the batch statistics.
            oh = r * TH + lax.broadcasted_iota(jnp.int32, (TH, 1, 1), 0)
            acc_s = jnp.where(oh < OH, acc.reshape(TH, OW, Cp), 0.0)
            acc_s = acc_s.reshape(MT, Cp)
        else:
            acc_s = acc

        y3 = acc_s.reshape(MT // SUBLANES, SUBLANES, Cp)
        s_ref[...] = jnp.sum(y3, axis=0)
        ss_ref[...] = jnp.sum(y3 * y3, axis=0)

    return kernel


def _bn_relu_kernel(y_ref, scale_ref, bias_ref, o_ref):
    # Pass 2: y (bf16) -> f32, folded BN (y*scale + bias), ReLU. Memory-bound.
    y = y_ref[...].astype(jnp.float32)
    o_ref[...] = jnp.maximum(y * scale_ref[...] + bias_ref[...], 0.0)


def conv_bn_relu(x_nchw, weight_oihw, gamma, beta, *, stride=1, padding=0,
                 dilation=1, groups=1, block_rows=512, bn_block_rows=2048):
    """Forward pass of ConvBNReLU.  x: (N, Cin, H, W), weight: (Cout, Cin, KH, KW)."""
    assert groups == 1  # TODO(synk): grouped conv (groups>1) not implemented
    N, Cin, H, W = x_nchw.shape
    Cout, _, KH, KW = weight_oihw.shape
    OH = (H + 2 * padding - dilation * (KH - 1) - 1) // stride + 1
    OW = (W + 2 * padding - dilation * (KW - 1) - 1) // stride + 1
    assert OH > 0 and OW > 0

    Cin_p = _ceil_to(Cin, SUBLANES)     # per-tap contraction dim (matmul K)
    Cp = _ceil_to(Cout, LANES)          # lane-dense output channels
    # TODO(synk): for Cout << 128 a full-dim (Cout-wide) output block with
    # masked stores would write fewer HBM bytes; kept lane-dense for now.

    # Output-row tiling: TH output rows per grid step, MT = TH*OW matmul rows.
    TH = max(16, _ceil_to(-(-block_rows // OW), 16))
    TH = min(TH, _ceil_to(OH, 16))
    RT = -(-OH // TH)
    OH_pad = RT * TH
    MT = TH * OW
    needs_row_mask = OH_pad > OH

    # Input prep (no im2col): NCHW -> NHWC bf16, conv padding + extra bottom
    # rows so padded output-row tiles stay in bounds + channel pad to Cin_p.
    HP = max(H + 2 * padding, (OH_pad - 1) * stride + (KH - 1) * dilation + 1)
    WP = W + 2 * padding
    x_nhwc = jnp.transpose(x_nchw, (0, 2, 3, 1)).astype(jnp.bfloat16)
    xp = jnp.pad(x_nhwc, ((0, 0),
                          (padding, HP - H - padding),
                          (padding, padding),
                          (0, Cin_p - Cin)))

    # weight (Cout, Cin, KH, KW) -> (KH*KW, Cin_p, Cp) per-tap matrices, bf16.
    wmat = jnp.transpose(weight_oihw, (2, 3, 1, 0)).reshape(KH * KW, Cin, Cout)
    wmat = jnp.pad(wmat.astype(jnp.bfloat16),
                   ((0, 0), (0, Cin_p - Cin), (0, Cp - Cout)))

    gamma_p = jnp.pad(gamma.astype(jnp.float32), (0, Cp - Cout))
    beta_p = jnp.pad(beta.astype(jnp.float32), (0, Cp - Cout))

    vmem_limit = _vmem_limit_bytes()
    cparams1 = pltpu.CompilerParams(
        dimension_semantics=("parallel", "arbitrary"),
        vmem_limit_bytes=vmem_limit)
    cparams2 = pltpu.CompilerParams(
        dimension_semantics=("parallel",),
        vmem_limit_bytes=vmem_limit)

    nblk = N * RT
    kernel1 = _make_conv_stats_kernel(KH, KW, TH, OW, OH, stride, dilation,
                                      Cp, RT > 1, needs_row_mask)

    # --- pass 1: conv (tap-decomposed matmuls, bf16 in / f32 acc) + BN partials.
    y, s_parts, ss_parts = pl.pallas_call(
        kernel1,
        out_shape=(
            jax.ShapeDtypeStruct((nblk * MT, Cp), jnp.bfloat16),
            jax.ShapeDtypeStruct((nblk * SUBLANES, Cp), jnp.float32),
            jax.ShapeDtypeStruct((nblk * SUBLANES, Cp), jnp.float32),
        ),
        grid=(N, RT),
        in_specs=[
            pl.BlockSpec((1, HP, WP, Cin_p), lambda n, r: (n, 0, 0, 0)),
            pl.BlockSpec((KH * KW, Cin_p, Cp), lambda n, r: (0, 0, 0)),
        ],
        out_specs=(
            pl.BlockSpec((MT, Cp), lambda n, r: (n * RT + r, 0)),
            pl.BlockSpec((SUBLANES, Cp), lambda n, r: (n * RT + r, 0)),
            pl.BlockSpec((SUBLANES, Cp), lambda n, r: (n * RT + r, 0)),
        ),
        compiler_params=cparams1,
    )(xp, wmat)

    # --- tiny per-channel reduction + BN fold (Cp-sized vectors, plain JAX).
    # TODO(synk): one-pass E[y^2]-E[y]^2 can cancel for very large M; use
    # shifted/Welford partials if this kernel sees huge feature maps.
    count = jnp.float32(N * OH * OW)
    s_tot = jnp.sum(s_parts, axis=0)
    ss_tot = jnp.sum(ss_parts, axis=0)
    mean = s_tot / count                                   # biased (train-mode)
    var = jnp.maximum(ss_tot / count - mean * mean, 0.0)
    scale_v = gamma_p / jnp.sqrt(var + BN_EPS)
    bias_v = beta_p - mean * scale_v
    scale2 = scale_v.reshape(1, Cp)
    bias2 = bias_v.reshape(1, Cp)

    # --- pass 2: y*scale + bias, ReLU — large tiles (pure memory-bound pass).
    d = 1
    for cand in range(1, nblk + 1):
        if nblk % cand == 0 and cand * MT <= max(bn_block_rows, MT):
            d = cand
    TM2 = d * MT
    G2 = nblk // d
    total_rows = nblk * MT

    out = pl.pallas_call(
        _bn_relu_kernel,
        out_shape=jax.ShapeDtypeStruct((total_rows, Cp), jnp.float32),
        grid=(G2,),
        in_specs=[
            pl.BlockSpec((TM2, Cp), lambda i: (i, 0)),
            pl.BlockSpec((1, Cp), lambda i: (0, 0)),
            pl.BlockSpec((1, Cp), lambda i: (0, 0)),
        ],
        out_specs=pl.BlockSpec((TM2, Cp), lambda i: (i, 0)),
        compiler_params=cparams2,
    )(y, scale2, bias2)

    out = out.reshape(N, OH_pad, OW, Cp)[:, :OH, :, :Cout]
    # TODO(synk): keep NHWC (or bf16) output if the consumer allows; the NCHW
    # transpose below is an extra full read+write of the output in XLA.
    return jnp.transpose(out, (0, 3, 1, 2))


if __name__ == "__main__":
    key = jax.random.PRNGKey(0)
    k1, k2, k3, k4 = jax.random.split(key, 4)

    # Small shapes consistent with ConvBNReLU(4, 8, 3, stride=1, padding=1)
    N, Cin, H, W = 2, 4, 16, 16
    Cout, KH, KW = 8, 3, 3
    stride, padding, dilation = 1, 1, 1

    x = jax.random.normal(k1, (N, Cin, H, W), jnp.float32)
    weight = jax.random.normal(k2, (Cout, Cin, KH, KW), jnp.float32) * 0.1
    gamma = 1.0 + 0.1 * jax.random.normal(k3, (Cout,), jnp.float32)
    beta = 0.1 * jax.random.normal(k4, (Cout,), jnp.float32)

    out = conv_bn_relu(x, weight, gamma, beta,
                       stride=stride, padding=padding, dilation=dilation)
    out = jax.block_until_ready(out)

    # Pure-JAX reference mirroring the kernel numerics: bf16 conv operands with
    # f32 accumulation, f32 train-mode batch stats, bf16 intermediate before
    # the folded BN + ReLU.
    xb = x.astype(jnp.bfloat16).astype(jnp.float32)
    wb = weight.astype(jnp.bfloat16).astype(jnp.float32)
    y_ref = lax.conv_general_dilated(
        xb, wb, (stride, stride), [(padding, padding), (padding, padding)],
        rhs_dilation=(dilation, dilation),
        dimension_numbers=("NCHW", "OIHW", "NCHW"))
    mean = y_ref.mean(axis=(0, 2, 3)).reshape(1, -1, 1, 1)
    var = jnp.square(y_ref - mean).mean(axis=(0, 2, 3)).reshape(1, -1, 1, 1)
    scale = gamma.reshape(1, -1, 1, 1) / jnp.sqrt(var + BN_EPS)
    bias = beta.reshape(1, -1, 1, 1) - mean * scale
    y_q = y_ref.astype(jnp.bfloat16).astype(jnp.float32)
    ref = jnp.maximum(y_q * scale + bias, 0.0)

    assert out.shape == (N, Cout, H, W), out.shape
    abs_err = jnp.abs(out - ref)
    max_err = float(jnp.max(abs_err))
    mean_err = float(jnp.mean(abs_err))
    # max tolerance covers a possible one-ulp bf16 rounding flip of the
    # intermediate; mean tolerance checks overall agreement tightly.
    assert max_err < 5e-2, f"max abs err {max_err}"
    assert mean_err < 2e-3, f"mean abs err {mean_err}"
    print("KERNEL_OK")
</pallas_src>

<mosaic_0001>
module attributes {stable_mosaic.version = 11 : i64} {
  func.func @kernel(%arg0: i32, %arg1: i32, %arg2: memref<1x18x18x8xbf16, #tpu.memory_space<vmem>>, %arg3: memref<9x8x128xbf16, #tpu.memory_space<vmem>>, %arg4: memref<256x128xbf16, #tpu.memory_space<vmem>>, %arg5: memref<8x128xf32, #tpu.memory_space<vmem>>, %arg6: memref<8x128xf32, #tpu.memory_space<vmem>>) attributes {dimension_semantics = [#tpu.dimension_semantics<parallel>, #tpu.dimension_semantics<arbitrary>], iteration_bounds = array<i64: 2, 1>, scalar_prefetch = 0 : i64, scratch_operands = 0 : i64, tpu.core_type = #tpu.core_type<tc>, window_params = [{transform_indices = @transform_0, window_bounds = array<i64: 1, 18, 18, 8>}, {pipeline_mode = #tpu.pipeline_mode<synchronous>, transform_indices = @transform_1, window_bounds = array<i64: 9, 8, 128>}, {transform_indices = @transform_2, window_bounds = array<i64: 256, 128>}, {transform_indices = @transform_3, window_bounds = array<i64: 8, 128>}, {transform_indices = @transform_4, window_bounds = array<i64: 8, 128>}]} {
    %cst = arith.constant 0.000000e+00 : f32
    %0 = vector.broadcast %cst : f32 to vector<256x128xf32>
    %c0 = arith.constant 0 : index
    %c0_0 = arith.constant 0 : index
    %c0_1 = arith.constant 0 : index
    %c0_2 = arith.constant 0 : index
    %1 = vector.load %arg2[%c0, %c0_0, %c0_1, %c0_2] : memref<1x18x18x8xbf16, #tpu.memory_space<vmem>>, vector<1x16x16x8xbf16>
    %2 = vector.shape_cast %1 : vector<1x16x16x8xbf16> to vector<16x16x8xbf16>
    %3 = vector.shape_cast %2 : vector<16x16x8xbf16> to vector<256x8xbf16>
    %c0_3 = arith.constant 0 : index
    %c0_4 = arith.constant 0 : index
    %c0_5 = arith.constant 0 : index
    %4 = vector.load %arg3[%c0_3, %c0_4, %c0_5] : memref<9x8x128xbf16, #tpu.memory_space<vmem>>, vector<1x8x128xbf16>
    %5 = vector.shape_cast %4 : vector<1x8x128xbf16> to vector<8x128xbf16>
    %cst_6 = arith.constant dense<0.000000e+00> : vector<256x128xf32>
    %6 = tpu.matmul %3, %5, %cst_6 {dimension_numbers = #tpu.dot_dimension_numbers<[1], [0], [0], [1], [0, 0, 1, 1], [], []>} : vector<256x8xbf16>, vector<8x128xbf16>, vector<256x128xf32> -> vector<256x128xf32>
    %7 = arith.addf %0, %6 : vector<256x128xf32>
    %c0_7 = arith.constant 0 : index
    %c0_8 = arith.constant 0 : index
    %c1 = arith.constant 1 : index
    %c0_9 = arith.constant 0 : index
    %8 = vector.load %arg2[%c0_7, %c0_8, %c1, %c0_9] : memref<1x18x18x8xbf16, #tpu.memory_space<vmem>>, vector<1x16x16x8xbf16>
    %9 = vector.shape_cast %8 : vector<1x16x16x8xbf16> to vector<16x16x8xbf16>
    %10 = vector.shape_cast %9 : vector<16x16x8xbf16> to vector<256x8xbf16>
    %c1_10 = arith.constant 1 : index
    %c0_11 = arith.constant 0 : index
    %c0_12 = arith.constant 0 : index
    %11 = vector.load %arg3[%c1_10, %c0_11, %c0_12] : memref<9x8x128xbf16, #tpu.memory_space<vmem>>, vector<1x8x128xbf16>
    %12 = vector.shape_cast %11 : vector<1x8x128xbf16> to vector<8x128xbf16>
    %cst_13 = arith.constant dense<0.000000e+00> : vector<256x128xf32>
    %13 = tpu.matmul %10, %12, %cst_13 {dimension_numbers = #tpu.dot_dimension_numbers<[1], [0], [0], [1], [0, 0, 1, 1], [], []>} : vector<256x8xbf16>, vector<8x128xbf16>, vector<256x128xf32> -> vector<256x128xf32>
    %14 = arith.addf %7, %13 : vector<256x128xf32>
    %c0_14 = arith.constant 0 : index
    %c0_15 = arith.constant 0 : index
    %c2 = arith.constant 2 : index
    %c0_16 = arith.constant 0 : index
    %15 = vector.load %arg2[%c0_14, %c0_15, %c2, %c0_16] : memref<1x18x18x8xbf16, #tpu.memory_space<vmem>>, vector<1x16x16x8xbf16>
    %16 = vector.shape_cast %15 : vector<1x16x16x8xbf16> to vector<16x16x8xbf16>
    %17 = vector.shape_cast %16 : vector<16x16x8xbf16> to vector<256x8xbf16>
    %c2_17 = arith.constant 2 : index
    %c0_18 = arith.constant 0 : index
    %c0_19 = arith.constant 0 : index
    %18 = vector.load %arg3[%c2_17, %c0_18, %c0_19] : memref<9x8x128xbf16, #tpu.memory_space<vmem>>, vector<1x8x128xbf16>
    %19 = vector.shape_cast %18 : vector<1x8x128xbf16> to vector<8x128xbf16>
    %cst_20 = arith.constant dense<0.000000e+00> : vector<256x128xf32>
    %20 = tpu.matmul %17, %19, %cst_20 {dimension_numbers = #tpu.dot_dimension_numbers<[1], [0], [0], [1], [0, 0, 1, 1], [], []>} : vector<256x8xbf16>, vector<8x128xbf16>, vector<256x128xf32> -> vector<256x128xf32>
    %21 = arith.addf %14, %20 : vector<256x128xf32>
    %c0_21 = arith.constant 0 : index
    %c1_22 = arith.constant 1 : index
    %c0_23 = arith.constant 0 : index
    %c0_24 = arith.constant 0 : index
    %22 = vector.load %arg2[%c0_21, %c1_22, %c0_23, %c0_24] : memref<1x18x18x8xbf16, #tpu.memory_space<vmem>>, vector<1x16x16x8xbf16>
    %23 = vector.shape_cast %22 : vector<1x16x16x8xbf16> to vector<16x16x8xbf16>
    %24 = vector.shape_cast %23 : vector<16x16x8xbf16> to vector<256x8xbf16>
    %c3 = arith.constant 3 : index
    %c0_25 = arith.constant 0 : index
    %c0_26 = arith.constant 0 : index
    %25 = vector.load %arg3[%c3, %c0_25, %c0_26] : memref<9x8x128xbf16, #tpu.memory_space<vmem>>, vector<1x8x128xbf16>
    %26 = vector.shape_cast %25 : vector<1x8x128xbf16> to vector<8x128xbf16>
    %cst_27 = arith.constant dense<0.000000e+00> : vector<256x128xf32>
    %27 = tpu.matmul %24, %26, %cst_27 {dimension_numbers = #tpu.dot_dimension_numbers<[1], [0], [0], [1], [0, 0, 1, 1], [], []>} : vector<256x8xbf16>, vector<8x128xbf16>, vector<256x128xf32> -> vector<256x128xf32>
    %28 = arith.addf %21, %27 : vector<256x128xf32>
    %c0_28 = arith.constant 0 : index
    %c1_29 = arith.constant 1 : index
    %c1_30 = arith.constant 1 : index
    %c0_31 = arith.constant 0 : index
    %29 = vector.load %arg2[%c0_28, %c1_29, %c1_30, %c0_31] : memref<1x18x18x8xbf16, #tpu.memory_space<vmem>>, vector<1x16x16x8xbf16>
    %30 = vector.shape_cast %29 : vector<1x16x16x8xbf16> to vector<16x16x8xbf16>
    %31 = vector.shape_cast %30 : vector<16x16x8xbf16> to vector<256x8xbf16>
    %c4 = arith.constant 4 : index
    %c0_32 = arith.constant 0 : index
    %c0_33 = arith.constant 0 : index
    %32 = vector.load %arg3[%c4, %c0_32, %c0_33] : memref<9x8x128xbf16, #tpu.memory_space<vmem>>, vector<1x8x128xbf16>
    %33 = vector.shape_cast %32 : vector<1x8x128xbf16> to vector<8x128xbf16>
    %cst_34 = arith.constant dense<0.000000e+00> : vector<256x128xf32>
    %34 = tpu.matmul %31, %33, %cst_34 {dimension_numbers = #tpu.dot_dimension_numbers<[1], [0], [0], [1], [0, 0, 1, 1], [], []>} : vector<256x8xbf16>, vector<8x128xbf16>, vector<256x128xf32> -> vector<256x128xf32>
    %35 = arith.addf %28, %34 : vector<256x128xf32>
    %c0_35 = arith.constant 0 : index
    %c1_36 = arith.constant 1 : index
    %c2_37 = arith.constant 2 : index
    %c0_38 = arith.constant 0 : index
    %36 = vector.load %arg2[%c0_35, %c1_36, %c2_37, %c0_38] : memref<1x18x18x8xbf16, #tpu.memory_space<vmem>>, vector<1x16x16x8xbf16>
    %37 = vector.shape_cast %36 : vector<1x16x16x8xbf16> to vector<16x16x8xbf16>
    %38 = vector.shape_cast %37 : vector<16x16x8xbf16> to vector<256x8xbf16>
    %c5 = arith.constant 5 : index
    %c0_39 = arith.constant 0 : index
    %c0_40 = arith.constant 0 : index
    %39 = vector.load %arg3[%c5, %c0_39, %c0_40] : memref<9x8x128xbf16, #tpu.memory_space<vmem>>, vector<1x8x128xbf16>
    %40 = vector.shape_cast %39 : vector<1x8x128xbf16> to vector<8x128xbf16>
    %cst_41 = arith.constant dense<0.000000e+00> : vector<256x128xf32>
    %41 = tpu.matmul %38, %40, %cst_41 {dimension_numbers = #tpu.dot_dimension_numbers<[1], [0], [0], [1], [0, 0, 1, 1], [], []>} : vector<256x8xbf16>, vector<8x128xbf16>, vector<256x128xf32> -> vector<256x128xf32>
    %42 = arith.addf %35, %41 : vector<256x128xf32>
    %c0_42 = arith.constant 0 : index
    %c2_43 = arith.constant 2 : index
    %c0_44 = arith.constant 0 : index
    %c0_45 = arith.constant 0 : index
    %43 = vector.load %arg2[%c0_42, %c2_43, %c0_44, %c0_45] : memref<1x18x18x8xbf16, #tpu.memory_space<vmem>>, vector<1x16x16x8xbf16>
    %44 = vector.shape_cast %43 : vector<1x16x16x8xbf16> to vector<16x16x8xbf16>
    %45 = vector.shape_cast %44 : vector<16x16x8xbf16> to vector<256x8xbf16>
    %c6 = arith.constant 6 : index
    %c0_46 = arith.constant 0 : index
    %c0_47 = arith.constant 0 : index
    %46 = vector.load %arg3[%c6, %c0_46, %c0_47] : memref<9x8x128xbf16, #tpu.memory_space<vmem>>, vector<1x8x128xbf16>
    %47 = vector.shape_cast %46 : vector<1x8x128xbf16> to vector<8x128xbf16>
    %cst_48 = arith.constant dense<0.000000e+00> : vector<256x128xf32>
    %48 = tpu.matmul %45, %47, %cst_48 {dimension_numbers = #tpu.dot_dimension_numbers<[1], [0], [0], [1], [0, 0, 1, 1], [], []>} : vector<256x8xbf16>, vector<8x128xbf16>, vector<256x128xf32> -> vector<256x128xf32>
    %49 = arith.addf %42, %48 : vector<256x128xf32>
    %c0_49 = arith.constant 0 : index
    %c2_50 = arith.constant 2 : index
    %c1_51 = arith.constant 1 : index
    %c0_52 = arith.constant 0 : index
    %50 = vector.load %arg2[%c0_49, %c2_50, %c1_51, %c0_52] : memref<1x18x18x8xbf16, #tpu.memory_space<vmem>>, vector<1x16x16x8xbf16>
    %51 = vector.shape_cast %50 : vector<1x16x16x8xbf16> to vector<16x16x8xbf16>
    %52 = vector.shape_cast %51 : vector<16x16x8xbf16> to vector<256x8xbf16>
    %c7 = arith.constant 7 : index
    %c0_53 = arith.constant 0 : index
    %c0_54 = arith.constant 0 : index
    %53 = vector.load %arg3[%c7, %c0_53, %c0_54] : memref<9x8x128xbf16, #tpu.memory_space<vmem>>, vector<1x8x128xbf16>
    %54 = vector.shape_cast %53 : vector<1x8x128xbf16> to vector<8x128xbf16>
    %cst_55 = arith.constant dense<0.000000e+00> : vector<256x128xf32>
    %55 = tpu.matmul %52, %54, %cst_55 {dimension_numbers = #tpu.dot_dimension_numbers<[1], [0], [0], [1], [0, 0, 1, 1], [], []>} : vector<256x8xbf16>, vector<8x128xbf16>, vector<256x128xf32> -> vector<256x128xf32>
    %56 = arith.addf %49, %55 : vector<256x128xf32>
    %c0_56 = arith.constant 0 : index
    %c2_57 = arith.constant 2 : index
    %c2_58 = arith.constant 2 : index
    %c0_59 = arith.constant 0 : index
    %57 = vector.load %arg2[%c0_56, %c2_57, %c2_58, %c0_59] : memref<1x18x18x8xbf16, #tpu.memory_space<vmem>>, vector<1x16x16x8xbf16>
    %58 = vector.shape_cast %57 : vector<1x16x16x8xbf16> to vector<16x16x8xbf16>
    %59 = vector.shape_cast %58 : vector<16x16x8xbf16> to vector<256x8xbf16>
    %c8 = arith.constant 8 : index
    %c0_60 = arith.constant 0 : index
    %c0_61 = arith.constant 0 : index
    %60 = vector.load %arg3[%c8, %c0_60, %c0_61] : memref<9x8x128xbf16, #tpu.memory_space<vmem>>, vector<1x8x128xbf16>
    %61 = vector.shape_cast %60 : vector<1x8x128xbf16> to vector<8x128xbf16>
    %cst_62 = arith.constant dense<0.000000e+00> : vector<256x128xf32>
    %62 = tpu.matmul %59, %61, %cst_62 {dimension_numbers = #tpu.dot_dimension_numbers<[1], [0], [0], [1], [0, 0, 1, 1], [], []>} : vector<256x8xbf16>, vector<8x128xbf16>, vector<256x128xf32> -> vector<256x128xf32>
    %63 = arith.addf %56, %62 : vector<256x128xf32>
    %64 = arith.truncf %63 : vector<256x128xf32> to vector<256x128xbf16>
    %c0_63 = arith.constant 0 : index
    %c0_64 = arith.constant 0 : index
    %65 = vector.load %arg4[%c0_63, %c0_64] : memref<256x128xbf16, #tpu.memory_space<vmem>>, vector<256x128xbf16>
    tpu.vector_store %arg4[%c0_63, %c0_64], %64 {strides = array<i32>} : memref<256x128xbf16, #tpu.memory_space<vmem>>, vector<256x128xbf16>,
    %66 = vector.shape_cast %63 : vector<256x128xf32> to vector<32x8x128xf32>
    %cst_65 = arith.constant dense<0.000000e+00> : vector<8x128xf32>
    %67 = vector.multi_reduction <add>, %66, %cst_65 [0] : vector<32x8x128xf32> to vector<8x128xf32>
    %c0_66 = arith.constant 0 : index
    %c0_67 = arith.constant 0 : index
    %68 = vector.load %arg5[%c0_66, %c0_67] : memref<8x128xf32, #tpu.memory_space<vmem>>, vector<8x128xf32>
    tpu.vector_store %arg5[%c0_66, %c0_67], %67 {strides = array<i32>} : memref<8x128xf32, #tpu.memory_space<vmem>>, vector<8x128xf32>,
    %69 = arith.mulf %66, %66 : vector<32x8x128xf32>
    %cst_68 = arith.constant dense<0.000000e+00> : vector<8x128xf32>
    %70 = vector.multi_reduction <add>, %69, %cst_68 [0] : vector<32x8x128xf32> to vector<8x128xf32>
    %c0_69 = arith.constant 0 : index
    %c0_70 = arith.constant 0 : index
    %71 = vector.load %arg6[%c0_69, %c0_70] : memref<8x128xf32, #tpu.memory_space<vmem>>, vector<8x128xf32>
    tpu.vector_store %arg6[%c0_69, %c0_70], %70 {strides = array<i32>} : memref<8x128xf32, #tpu.memory_space<vmem>>, vector<8x128xf32>,
    return
  }
  func.func @transform_0(%arg0: i32, %arg1: i32) -> (i32, i32, i32, i32) {
    %c0_i32 = arith.constant 0 : i32
    %c0_i32_0 = arith.constant 0 : i32
    %c0_i32_1 = arith.constant 0 : i32
    %c0_i32_2 = arith.constant 0 : i32
    return %arg0, %c0_i32, %c0_i32_0, %c0_i32_1 : i32, i32, i32, i32
  }
  func.func @transform_1(%arg0: i32, %arg1: i32) -> (i32, i32, i32) {
    %c0_i32 = arith.constant 0 : i32
    %c0_i32_0 = arith.constant 0 : i32
    %c0_i32_1 = arith.constant 0 : i32
    %c0_i32_2 = arith.constant 0 : i32
    return %c0_i32, %c0_i32_0, %c0_i32_1 : i32, i32, i32
  }
  func.func @transform_2(%arg0: i32, %arg1: i32) -> (i32, i32) {
    %c1_i32 = arith.constant 1 : i32
    %0 = arith.muli %arg0, %c1_i32 : i32
    %1 = arith.addi %0, %arg1 : i32
    %c0_i32 = arith.constant 0 : i32
    %c0_i32_0 = arith.constant 0 : i32
    return %1, %c0_i32 : i32, i32
  }
  func.func @transform_3(%arg0: i32, %arg1: i32) -> (i32, i32) {
    %c1_i32 = arith.constant 1 : i32
    %0 = arith.muli %arg0, %c1_i32 : i32
    %1 = arith.addi %0, %arg1 : i32
    %c0_i32 = arith.constant 0 : i32
    %c0_i32_0 = arith.constant 0 : i32
    return %1, %c0_i32 : i32, i32
  }
  func.func @transform_4(%arg0: i32, %arg1: i32) -> (i32, i32) {
    %c1_i32 = arith.constant 1 : i32
    %0 = arith.muli %arg0, %c1_i32 : i32
    %1 = arith.addi %0, %arg1 : i32
    %c0_i32 = arith.constant 0 : i32
    %c0_i32_0 = arith.constant 0 : i32
    return %1, %c0_i32 : i32, i32
  }
}

</mosaic_0001>

<bundles_post_ra>
// kernel: tpu_custom_call.1
= control target key start
LH: loop header
LB: loop body
LE: loop exit
PB: predicated region body
PF: predicated region fallthrough
CT: control target
= control target key end

     0   :  { %10 = vsyncpa [#allocation3], 0  ;;  %s8965_s0 = inlined_call_operand.vmem [shape: bf16[2,18,18,8], index: 0, kind: input, shape index: {}]   ;;  %s8966_s1 = inlined_call_operand.vmem [shape: bf16[9,8,128], index: 1, kind: input, shape index: {}]   ;;  %s8967_s2 = inlined_call_operand.hbm [shape: bf16[512,128], index: 2, kind: output, shape index: {0}]   ;;  %s8968_s3 = inlined_call_operand.hbm [shape: f32[16,128], index: 3, kind: output, shape index: {1}]   ;;  %s8969_s4 = inlined_call_operand.hbm [shape: f32[16,128], index: 4, kind: output, shape index: {2}]  }
   0x1   :  { %12 = vsyncpa [#allocation3 + $0x1], 0 }
   0x2   :  { %13 = vsyncpa [#allocation5], 0 }
   0x3   :  { %15 = vsyncpa [#allocation5 + $0x1], 0  ;;  %s7023_s15 = smov 0   ;;  %s7025_s16 = smov 0  }
   0x4   :  { %s7027_s17 = smov 0   ;;  %s7029_s18 = smov 0  }
   0x5   :  { %s7031_s19 = smov 0   ;;  %s7033_s20 = smov 0  }
   0x6 LB: > { %s5239_s21 = sadd.s32 4294967295, %s6991_s20   ;;  %s8983_s22 = sadd.s32 4294967294, %s6991_s20   ;;  %s6991_s20 = sphi %s7033_s20, %s21_s20   ;;  %s6987_s19 = sphi %s7031_s19, %s9047_s19   ;;  %s6983_s18 = sphi %s7029_s18, %s9046_s18   ;;  %s6979_s17 = sphi %s7027_s17, %s9045_s17   ;;  %s6975_s16 = sphi %s7025_s16, %s9044_s16   ;;  %s6971_s15 = sphi %s7023_s15, %s9043_s15  }
   0x7   : > { %s33_s23 = sadd.s32 1, %s6987_s19  ;;  %s89_s24 = sadd.s32 1, %s6979_s17 }
   0x8   : > { %p35_p0 = scmp.ge.s32.totalorder %s33_s23, 2  ;;  %p99_p1 = scmp.ne.s32.totalorder %s6979_s17, %s6975_s16 }
   0x9   : > { %p100_p2 = scmp.eq.s32.totalorder %s5239_s21, 1  ;;  %p105_p3 = scmp.ne.s32.totalorder %s6975_s16, %s6971_s15 }
   0xa   : > { %s9049_s23 = smov (%p35_p0, %s33_s23), 0  ;;  %p106_p5 = scmp.eq.s32.totalorder %s8983_s22, 1 }
   0xb   : > { %p7065_p4 = por %p100_p2, %p99_p1  ;;  %s86_s26 = ssub.s32 %s6987_s19, %s9049_s23 }
   0xc   : > { %p5243_p6 = scmp.ge.s32.totalorder %s6991_s20, 1  ;;  %p87_p7 = scmp.eq.s32.totalorder %s86_s26, 0 }
   0xd   : > { %p7074_p8 = por %p106_p5, %p105_p3  ;;  %p191_p9 = scmp.lt.s32.totalorder %s6991_s20, 3 }
   0xe   : > { %s7080_s28 = scalar_select %p87_p7, %s6979_s17, %s89_s24  }
   0xf   : > { %p192_p10 = pnand %p5243_p6, %p191_p9 }
  0x11   : > { %195 = sbr.rel (%p192_p10) target bundleno = 658 (0x292), region = 28 }
  0x18   : > { %v5248_v0 = vld [vmem:[%s8966_s1 + $0x4] sm:$0xf]  ;;  %vm772_vm0 = vcmask 1043456   ;;  %v5475_v1 = vld [vmem:[%s8966_s1 + $0x10] sm:$0xf]  ;;  %p227_p11 = scmp.lt.s32.totalorder %s6983_s18, 1 }
  0x19   : > { %6670 = vmatprep.subr.msk.bf16.mxu1 %vm772_vm0, %v5248_v0  ;;  %6674 = vmatprep.subr.msk.bf16.mxu0 %vm772_vm0, %v5475_v1  ;;  %v774_v2 = vsel %vm772_vm0, %v5248_v0, 0  ;;  %v7093_v3 = vsel %vm772_vm0, %v5475_v1, 0  ;;  %v269_v4 = vld [vmem:[%s8966_s1] sm:$0xf]  ;;  %v5540_v5 = vld [vmem:[%s8966_s1 + $0x14] sm:$0xf] }
  0x1a   : > { %8986 = vst [vmem:[#allocation9_spill] sm:$0xff] %v7093_v3  ;;  %6107 = vmatpush3.bf16.msra.mxu1 %v774_v2  ;;  %6243 = vmatpush3.bf16.msra.mxu0 %v7093_v3  ;;  %s228_s7 = scalar_select %p227_p11, %s6983_s18, 1  ;;  %vm286_vm1 = vsmask.f32 3328  ;;  %vm287_vm2 = vsmask.f32 7440 }
  0x1b   : > { %6671 = vmatprep.subr.msk.bf16.mxu1 %vm772_vm0, %v269_v4  ;;  %6676 = vmatprep.subr.msk.bf16.mxu0 %vm772_vm0, %v5540_v5  ;;  %vm723_vm3 = vcmask 64512   ;;  %v7121_v17 = vsel %vm772_vm0, %v269_v4, 0  ;;  %v7127_v26 = vld [vmem:[%s8966_s1 + $0x18] sm:$0xf]  ;;  %vm7134_vm4 = vmor %vm286_vm1, %vm287_vm2  ;;  %v7140_v37 = vsel %vm772_vm0, %v5540_v5, 0  ;;  %vm1277_vm5 = vcmask 1042432  }
  0x1c   : > { %s6680_s12 = smul.u32 216, %s228_s7  ;;  %v7144_v41 = vsel %vm772_vm0, %v7127_v26, 0  ;;  %vm1278_vm6 = vcmask 1046532   ;;  %s5857_s6 = sshll.u32 %s6983_s18, 11 }
  0x1d   : > { %vm7360_vm7 = vmor %vm1277_vm5, %vm1278_vm6  ;;  %s8824_s8 = sand.u32 1, %s5239_s21   ;;  %s8829_s11 = scalar_lea.hbm %s8967_s2, %s5857_s6 }
  0x1e   : > { %s7108_s24 = scalar_lea.vmem %s8965_s0, %s6680_s12  ;;  %s5821_s21 = sshll.u32 %s6983_s18, 7 }
  0x1f   : > { %v237_v6 = vld [vmem:[%s7108_s24] sm:$0xf]  ;;  %v238_v7 = vld [vmem:[%s7108_s24 + $0x4] sm:$0xf]  ;;  %v270_v8 = vld [vmem:[%s7108_s24 + $0x8] sm:$0x1] }
  0x20   : > { %v290_v9 = vshrl.u32 %v237_v6, 16  ;;  %v293_v10 = vshll.u32 %v237_v6, 16  ;;  %v299_v11 = vshll.u32 %v238_v7, 16  ;;  %v303_v12 = vshrl.u32 %v238_v7, 16  ;;  %v5427_v13 = vld [vmem:[%s7108_s24 + $0xc] sm:$0xf] }
  0x21   : > { %v309_v14 = vshll.u32 %v270_v8, 16  ;;  %v7115_v15 = vld [vmem:[%s7108_s24 + $0x10] sm:$0xf]  ;;  %v7118_v16 = vld [vmem:[%s7108_s24 + $0x14] sm:$0x1]  ;;  %v2094_v23 = vshrl.u32 %v5427_v13, 16 }
  0x22   : > { %v292_v18 = vrot.slane %v290_v9, 4  ;;  %v295_v19 = vrot.slane %v293_v10, 5  ;;  %v301_v20 = vrot.slane %v299_v11, 5  ;;  %v305_v21 = vrot.slane %v303_v12, 4  ;;  %v239_v31 = vld [vmem:[%s7108_s24 + $0xc] sm:$0xf] }
  0x23   : > { %v311_v22 = vrot.slane %v309_v14, 5  ;;  %v2097_v24 = vshll.u32 %v5427_v13, 16  ;;  %v2103_v25 = vshll.u32 %v7115_v15, 16  ;;  %v2107_v29 = vshrl.u32 %v7115_v15, 16  ;;  %v240_v36 = vld [vmem:[%s7108_s24 + $0x10] sm:$0xf] }
  0x24   : > { %v296_v27 = vor.u32 %v295_v19, %v292_v18  ;;  %v306_v28 = vor.u32 %v305_v21, %v301_v20  ;;  %v2113_v30 = vshll.u32 %v7118_v16, 16  ;;  %v2096_v33 = vrot.slane %v2094_v23, 4  ;;  %v271_v44 = vld [vmem:[%s7108_s24 + $0x14] sm:$0x1]  ;;  %v5430_v55 = vld [vmem:[%s7108_s24 + $0x18] sm:$0xf] }
  0x25   : > { %v2099_v34 = vrot.slane %v2097_v24, 5  ;;  %v2105_v35 = vrot.slane %v2103_v25, 5  ;;  %v2109_v40 = vrot.slane %v2107_v29, 4  ;;  %v314_v45 = vshrl.u32 %v239_v31, 16  ;;  %v7153_v60 = vld [vmem:[%s7108_s24 + $0x1c] sm:$0xf] }
  0x26   : > { %v297_v38 = vrot.slane %v296_v27, 4  ;;  %v307_v39 = vrot.slane %v306_v28, 4  ;;  %v2115_v43 = vrot.slane %v2113_v30, 5  ;;  %v317_v46 = vshll.u32 %v239_v31, 16  ;;  %v7161_v1 = vld [vmem:[%s7108_s24 + $0x20] sm:$0x1] }
  0x27   : > { %v2100_v42 = vor.u32 %v2099_v34, %v2096_v33  ;;  %v2110_v49 = vor.u32 %v2109_v40, %v2105_v35  ;;  %v323_v50 = vshll.u32 %v240_v36, 16  ;;  %v316_v53 = vrot.slane %v314_v45, 4  ;;  %v241_v18 = vld [vmem:[%s7108_s24 + $0x18] sm:$0xf]  ;;  %v242_v23 = vld [vmem:[%s7108_s24 + $0x1c] sm:$0xf] }
  0x28   : > { %v302_v47 = vsel %vm7134_vm4, %v297_v38, %v301_v20  ;;  %v312_v48 = vsel %vm7134_vm4, %v307_v39, %v311_v22  ;;  %v319_v54 = vrot.slane %v317_v46, 5  ;;  %v327_v58 = vshrl.u32 %v240_v36, 16  ;;  %v272_v31 = vld [vmem:[%s7108_s24 + $0x20] sm:$0x1]  ;;  %v5433_v40 = vld [vmem:[%s7108_s24 + $0x24] sm:$0xf] }
  0x29   : > { %v5249_v51 = vcombine.low %v302_v47, %v312_v48  ;;  %v2101_v52 = vrot.slane %v2100_v42, 4  ;;  %v2111_v56 = vrot.slane %v2110_v49, 4  ;;  %v325_v57 = vrot.slane %v323_v50, 5  ;;  %v7184_v46 = vld [vmem:[%s7108_s24 + $0x28] sm:$0xf]  ;;  %s6993_s9 = smov [#allocation2]  }
  0x2a   : > { %v333_v59 = vshll.u32 %v271_v44, 16  ;;  %v2837_v62 = vrot.slane %v7115_v15, 5  ;;  %v2840_v63 = vrot.slane %v7118_v16, 5  ;;  %v320_v0 = vor.u32 %v319_v54, %v316_v53  ;;  %v7193_v54 = vld [vmem:[%s7108_s24 + $0x2c] sm:$0x1]  ;;  %s6857_s10 = sshll.u32 %s6993_s9, 4  ;;  %s6858_s10 = int_to_ptr.vmem [resolvable:$false] %s6857_s10 }
  0x2b   : > { %6108 = vmatprep.mubr.msk.bf16.mxu1 %vm723_vm3, %v5249_v51  ;;  %v2106_v61 = vsel %vm7134_vm4, %v2101_v52, %v2105_v35  ;;  %v2116_v2 = vsel %vm7134_vm4, %v2111_v56, %v2115_v43  ;;  %v329_v4 = vrot.slane %v327_v58, 4  ;;  %v2118_v6 = vshrl.u32 %v5430_v55, 16  ;;  %v5329_v51 = vld [vmem:[%s8966_s1 + $0x8] sm:$0xf]  ;;  %v7393_v16 = vld [vmem:[%s7108_s24 + $0x7c] sm:$0xf] }
  0x2c   : > { %v335_v5 = vrot.slane %v333_v59, 5  ;;  %v5476_v7 = vcombine.low %v2106_v61, %v2116_v2  ;;  %v321_v8 = vrot.slane %v320_v0, 4  ;;  %v2121_v9 = vshll.u32 %v5430_v55, 16  ;;  %v243_v0 = vld [vmem:[%s7108_s24 + $0x24] sm:$0xf]  ;;  %s6859_s22 = scalar_lea.vmem %s6858_s10, 4096 }
  0x2d   : > { %v2127_v10 = vshll.u32 %v7153_v60, 16  ;;  %v330_v11 = vor.u32 %v329_v4, %v325_v57  ;;  %v2120_v12 = vrot.slane %v2118_v6, 4  ;;  %v2131_v13 = vshrl.u32 %v7153_v60, 16 }
  0x2e   : > { %v2137_v14 = vshll.u32 %v7161_v1, 16  ;;  %6244 = vmatprep.mubr.msk.bf16.mxu0 %vm723_vm3, %v5476_v7  ;;  %v326_v19 = vsel %vm7134_vm4, %v321_v8, %v325_v57  ;;  %v2123_v20 = vrot.slane %v2121_v9, 5  ;;  %v2844_v22 = vrot.slane %v7153_v60, 5  ;;  %v244_v7 = vld [vmem:[%s7108_s24 + $0x28] sm:$0xf] }
  0x2f   : > { %v2129_v21 = vrot.slane %v2127_v10, 5  ;;  %v331_v24 = vrot.slane %v330_v11, 4  ;;  %v2133_v25 = vrot.slane %v2131_v13, 4  ;;  %v2847_v28 = vrot.slane %v7161_v1, 5  ;;  %v273_v13 = vld [vmem:[%s7108_s24 + $0x2c] sm:$0x1] }
  0x30   : > { %v2139_v27 = vrot.slane %v2137_v14, 5  ;;  %v2124_v29 = vor.u32 %v2123_v20, %v2120_v12  ;;  %v7177_v30 = vrot.slane %v2844_v22, 4  ;;  %v338_v33 = vshrl.u32 %v241_v18, 16 }
  0x31   : > { %v341_v34 = vshll.u32 %v241_v18, 16  ;;  %v336_v35 = vsel %vm7134_vm4, %v331_v24, %v335_v5  ;;  %v2134_v36 = vor.u32 %v2133_v25, %v2129_v21  ;;  %v347_v38 = vshll.u32 %v242_v23, 16  ;;  %v5436_v24 = vld [vmem:[%s7108_s24 + $0x30] sm:$0xf] }
  0x32   : > { %v351_v39 = vshrl.u32 %v242_v23, 16  ;;  %v5250_v42 = vcombine.low %v326_v19, %v336_v35  ;;  %v2125_v43 = vrot.slane %v2124_v29, 4  ;;  %v340_v44 = vrot.slane %v338_v33, 4  ;;  %v7213_v33 = vld [vmem:[%s7108_s24 + $0x34] sm:$0xf] }
  0x33   : > { %v343_v45 = vrot.slane %v341_v34, 5  ;;  %v2135_v47 = vrot.slane %v2134_v36, 4  ;;  %v349_v48 = vrot.slane %v347_v38, 5  ;;  %v357_v50 = vshll.u32 %v272_v31, 16 }
  0x34   : > { %v353_v49 = vrot.slane %v351_v39, 4  ;;  %6109 = vmatmul.mubr.msk.bf16.vlgmr.msra.gmra.mrb[0].mxu1 %vm723_vm3, %v5250_v42  ;;  %v2130_v52 = vsel %vm7134_vm4, %v2125_v43, %v2129_v21  ;;  %v2142_v55 = vshrl.u32 %v5433_v40, 16  ;;  %v2145_v56 = vshll.u32 %v5433_v40, 16  ;;  %v7221_v40 = vld [vmem:[%s7108_s24 + $0x38] sm:$0x1] }
  0x35   : > { %v344_v53 = vor.u32 %v343_v45, %v340_v44  ;;  %6141 = vmatpush3.bf16.msra.mxu1 %v7121_v17  ;;  %v2140_v57 = vsel %vm7134_vm4, %v2135_v47, %v2139_v27  ;;  %v359_v59 = vrot.slane %v357_v50, 5  ;;  %v2151_v61 = vshll.u32 %v7184_v46, 16 }
  0x36   : > { %v354_v58 = vor.u32 %v353_v49, %v349_v48  ;;  %v5477_v2 = vcombine.low %v2130_v52, %v2140_v57  ;;  %v2144_v5 = vrot.slane %v2142_v55, 4  ;;  %v2147_v6 = vrot.slane %v2145_v56, 5  ;;  %6672 = vmatprep.subr.msk.bf16.mxu1 %vm772_vm0, %v5329_v51  ;;  %v245_v52 = vld [vmem:[%s7108_s24 + $0x30] sm:$0xf] }
  0x37   : > { %v345_v4 = vrot.slane %v344_v53, 4  ;;  %v2153_v9 = vrot.slane %v2151_v61, 5  ;;  %v2155_v17 = vshrl.u32 %v7184_v46, 16  ;;  %v2161_v10 = vshll.u32 %v7193_v54, 16 }
  0x38   : > { %v355_v8 = vrot.slane %v354_v58, 4  ;;  %6245 = vmatmul.mubr.msk.bf16.vlgmr.msra.gmra.mrb[0].mxu0 %vm723_vm3, %v5477_v2  ;;  %v2148_v12 = vor.u32 %v2147_v6, %v2144_v5  ;;  %v362_v14 = vshrl.u32 %v243_v0, 16  ;;  %v365_v18 = vshll.u32 %v243_v0, 16  ;;  %v246_v58 = vld [vmem:[%s7108_s24 + $0x34] sm:$0xf] }
  0x39   : > { %v350_v11 = vsel %vm7134_vm4, %v345_v4, %v349_v48  ;;  %6277 = vmatpush3.bf16.msra.mxu0 %v7140_v37  ;;  %v2157_v20 = vrot.slane %v2155_v17, 4  ;;  %v2163_v21 = vrot.slane %v2161_v10, 5  ;;  %v371_v23 = vshll.u32 %v244_v7, 16  ;;  %v274_v4 = vld [vmem:[%s7108_s24 + $0x38] sm:$0x1] }
  0x3a   : > { %v360_v19 = vsel %vm7134_vm4, %v355_v8, %v359_v59  ;;  %v2149_v27 = vrot.slane %v2148_v12, 4  ;;  %v364_v29 = vrot.slane %v362_v14, 4  ;;  %v367_v31 = vrot.slane %v365_v18, 5  ;;  %6677 = vmatprep.subr.msk.bf16.mxu0 %vm772_vm0, %v7127_v26  ;;  %v5439_v12 = vld [vmem:[%s7108_s24 + $0x3c] sm:$0xf] }
  0x3b   : > { %v5251_v25 = vcombine.low %v350_v11, %v360_v19  ;;  %v2158_v34 = vor.u32 %v2157_v20, %v2153_v9  ;;  %v373_v35 = vrot.slane %v371_v23, 5  ;;  %v375_v37 = vshrl.u32 %v244_v7, 16  ;;  %v7238_v20 = vld [vmem:[%s7108_s24 + $0x40] sm:$0xf] }
  0x3c   : > { %v381_v36 = vshll.u32 %v273_v13, 16  ;;  %v2154_v38 = vsel %vm7134_vm4, %v2149_v27, %v2153_v9  ;;  %v368_v39 = vor.u32 %v367_v31, %v364_v29  ;;  %v2166_v42 = vshrl.u32 %v5436_v24, 16 }
  0x3d   : > { %6112 = vmatprep.mubr.msk.bf16.mxu1 %vm723_vm3, %v5251_v25  ;;  %v2169_v43 = vshll.u32 %v5436_v24, 16  ;;  %v2159_v44 = vrot.slane %v2158_v34, 4  ;;  %v377_v45 = vrot.slane %v375_v37, 4  ;;  %v2175_v26 = vshll.u32 %v7213_v33, 16  ;;  %v7243_v34 = vld [vmem:[%s7108_s24 + $0x44] sm:$0x1] }
  0x3e   : > { %v383_v47 = vrot.slane %v381_v36, 5  ;;  %v369_v48 = vrot.slane %v368_v39, 4  ;;  %v2168_v49 = vrot.slane %v2166_v42, 4  ;;  %v2179_v51 = vshrl.u32 %v7213_v33, 16  ;;  %v247_v42 = vld [vmem:[%s7108_s24 + $0x3c] sm:$0xf] }
  0x3f   : > { %v2171_v50 = vrot.slane %v2169_v43, 5  ;;  %v2164_v53 = vsel %vm7134_vm4, %v2159_v44, %v2163_v21  ;;  %v378_v55 = vor.u32 %v377_v45, %v373_v35  ;;  %v2177_v56 = vrot.slane %v2175_v26, 5  ;;  %v248_v26 = vld [vmem:[%s7108_s24 + $0x40] sm:$0xf] }
  0x40   : > { %v2185_v57 = vshll.u32 %v7221_v40, 16  ;;  %v5478_v59 = vcombine.low %v2154_v38, %v2164_v53  ;;  %v374_v61 = vsel %vm7134_vm4, %v369_v48, %v373_v35  ;;  %v2181_v2 = vrot.slane %v2179_v51, 4 }
  0x41   : > { %v2172_v0 = vor.u32 %v2171_v50, %v2168_v49  ;;  %v379_v5 = vrot.slane %v378_v55, 4  ;;  %v386_v7 = vshrl.u32 %v245_v52, 16  ;;  %v389_v8 = vshll.u32 %v245_v52, 16 }
  0x42   : > { %v2187_v6 = vrot.slane %v2185_v57, 5  ;;  %6248 = vmatprep.mubr.msk.bf16.mxu0 %vm723_vm3, %v5478_v59  ;;  %v2182_v17 = vor.u32 %v2181_v2, %v2177_v56  ;;  %v395_v10 = vshll.u32 %v246_v58, 16  ;;  %v399_v11 = vshrl.u32 %v246_v58, 16  ;;  %v5442_v2 = vld [vmem:[%s7108_s24 + $0x48] sm:$0xf] }
  0x43   : > { %v2173_v9 = vrot.slane %v2172_v0, 4  ;;  %v384_v13 = vsel %vm7134_vm4, %v379_v5, %v383_v47  ;;  %v388_v14 = vrot.slane %v386_v7, 4  ;;  %v391_v18 = vrot.slane %v389_v8, 5  ;;  %v7261_v8 = vld [vmem:[%s7108_s24 + $0x4c] sm:$0xf] }
  0x44   : > { %v405_v19 = vshll.u32 %v274_v4, 16  ;;  %v5252_v21 = vcombine.low %v374_v61, %v384_v13  ;;  %v2183_v24 = vrot.slane %v2182_v17, 4  ;;  %v397_v25 = vrot.slane %v395_v10, 5  ;;  %v275_v61 = vld [vmem:[%s7108_s24 + $0x44] sm:$0x1] }
  0x45   : > { %v2178_v23 = vsel %vm7134_vm4, %v2173_v9, %v2177_v56  ;;  %v392_v27 = vor.u32 %v391_v18, %v388_v14  ;;  %v401_v29 = vrot.slane %v399_v11, 4  ;;  %v2190_v35 = vshrl.u32 %v5439_v12, 16 }
  0x46   : > { %v407_v31 = vrot.slane %v405_v19, 5  ;;  %6113 = vmatmul.mubr.msk.bf16.gmra.mrb[4].mxu1 %vm723_vm3, %v5252_v21  ;;  %v2188_v37 = vsel %vm7134_vm4, %v2183_v24, %v2187_v6  ;;  %v2193_v36 = vshll.u32 %v5439_v12, 16  ;;  %v2199_v38 = vshll.u32 %v7238_v20, 16 }
  0x47   : > { %v2203_v39 = vshrl.u32 %v7238_v20, 16  ;;  %v5479_v43 = vcombine.low %v2178_v23, %v2188_v37  ;;  %v393_v44 = vrot.slane %v392_v27, 4  ;;  %v402_v45 = vor.u32 %v401_v29, %v397_v25  ;;  %v7269_v23 = vld [vmem:[%s7108_s24 + $0x50] sm:$0x1]  ;;  %v7273_v27 = vld [vmem:[%s7108_s24 + $0x48] sm:$0xf] }
  0x48   : > { %v2192_v47 = vrot.slane %v2190_v35, 4  ;;  %v2195_v48 = vrot.slane %v2193_v36, 5  ;;  %v2201_v49 = vrot.slane %v2199_v38, 5  ;;  %v2209_v51 = vshll.u32 %v7243_v34, 16  ;;  %v7276_v36 = vld [vmem:[%s7108_s24 + $0x4c] sm:$0xf] }
  0x49   : > { %v2205_v50 = vrot.slane %v2203_v39, 4  ;;  %6249 = vmatmul.mubr.msk.bf16.gmra.mrb[4].mxu0 %vm723_vm3, %v5479_v43  ;;  %v398_v52 = vsel %vm7134_vm4, %v393_v44, %v397_v25  ;;  %v403_v53 = vrot.slane %v402_v45, 4  ;;  %v410_v55 = vshrl.u32 %v247_v42, 16 }
  0x4a   : > { %v413_v56 = vshll.u32 %v247_v42, 16  ;;  %v2196_v57 = vor.u32 %v2195_v48, %v2192_v47  ;;  %v2211_v59 = vrot.slane %v2209_v51, 5  ;;  %v419_v0 = vshll.u32 %v248_v26, 16 }
  0x4b   : > { %v2206_v58 = vor.u32 %v2205_v50, %v2201_v49  ;;  %v408_v4 = vsel %vm7134_vm4, %v403_v53, %v407_v31  ;;  %v412_v5 = vrot.slane %v410_v55, 4  ;;  %v423_v7 = vshrl.u32 %v248_v26, 16  ;;  %v276_v26 = vld [vmem:[%s7108_s24 + $0x50] sm:$0x1]  ;;  %v5445_v53 = vld [vmem:[%s7108_s24 + $0x54] sm:$0xf] }
  0x4c   : > { %v415_v6 = vrot.slane %v413_v56, 5  ;;  %v5253_v9 = vcombine.low %v398_v52, %v408_v4  ;;  %v2197_v17 = vrot.slane %v2196_v57, 4  ;;  %v421_v11 = vrot.slane %v419_v0, 5  ;;  %v7292_v4 = vld [vmem:[%s7108_s24 + $0x58] sm:$0xf] }
  0x4d   : > { %v2207_v10 = vrot.slane %v2206_v58, 4  ;;  %v425_v13 = vrot.slane %v423_v7, 4  ;;  %v429_v14 = vshll.u32 %v275_v61, 16  ;;  %v2214_v18 = vshrl.u32 %v5442_v2, 16 }
  0x4e   : > { %v416_v12 = vor.u32 %v415_v6, %v412_v5  ;;  %6116 = vmatprep.mubr.msk.bf16.mxu1 %vm723_vm3, %v5253_v9  ;;  %v2202_v19 = vsel %vm7134_vm4, %v2197_v17, %v2201_v49  ;;  %v2217_v24 = vshll.u32 %v5442_v2, 16  ;;  %v2223_v25 = vshll.u32 %v7261_v8, 16 }
  0x4f   : > { %v2212_v21 = vsel %vm7134_vm4, %v2207_v10, %v2211_v59  ;;  %v426_v35 = vor.u32 %v425_v13, %v421_v11  ;;  %v431_v37 = vrot.slane %v429_v14, 5  ;;  %v2216_v38 = vrot.slane %v2214_v18, 4 }
  0x50   : > { %v5480_v29 = vcombine.low %v2202_v19, %v2212_v21  ;;  %v417_v31 = vrot.slane %v416_v12, 4  ;;  %v2219_v39 = vrot.slane %v2217_v24, 5  ;;  %v2225_v42 = vrot.slane %v2223_v25, 5  ;;  %v7298_v12 = vld [vmem:[%s7108_s24 + $0x5c] sm:$0x1] }
  0x51   : > { %v2227_v43 = vshrl.u32 %v7261_v8, 16  ;;  %v427_v45 = vrot.slane %v426_v35, 4  ;;  %v2233_v47 = vshll.u32 %v7269_v23, 16  ;;  %v434_v48 = vshrl.u32 %v7273_v27, 16  ;;  %v7302_v24 = vld [vmem:[%s7108_s24 + $0x54] sm:$0xf] }
  0x52   : > { %6252 = vmatprep.mubr.msk.bf16.mxu0 %vm723_vm3, %v5480_v29  ;;  %v422_v44 = vsel %vm7134_vm4, %v417_v31, %v421_v11  ;;  %v2220_v49 = vor.u32 %v2219_v39, %v2216_v38  ;;  %v437_v51 = vshll.u32 %v7273_v27, 16  ;;  %v443_v52 = vshll.u32 %v7276_v36, 16 }
  0x53   : > { %v2229_v50 = vrot.slane %v2227_v43, 4  ;;  %v432_v55 = vsel %vm7134_vm4, %v427_v45, %v431_v37  ;;  %v2235_v56 = vrot.slane %v2233_v47, 5  ;;  %v436_v57 = vrot.slane %v434_v48, 4  ;;  %v7308_v37 = vld [vmem:[%s7108_s24 + $0x58] sm:$0xf] }
  0x54   : > { %v447_v58 = vshrl.u32 %v7276_v36, 16  ;;  %v5254_v59 = vcombine.low %v422_v44, %v432_v55  ;;  %v2221_v61 = vrot.slane %v2220_v49, 4  ;;  %v439_v2 = vrot.slane %v437_v51, 5 }
  0x55   : > { %v2230_v0 = vor.u32 %v2229_v50, %v2225_v42  ;;  %v445_v5 = vrot.slane %v443_v52, 5  ;;  %v453_v7 = vshll.u32 %v276_v26, 16  ;;  %v2238_v9 = vshrl.u32 %v5445_v53, 16  ;;  %v277_v26 = vld [vmem:[%s7108_s24 + $0x5c] sm:$0x1] }
  0x56   : > { %v449_v6 = vrot.slane %v447_v58, 4  ;;  %6117 = vmatmul.mubr.msk.bf16.gmra.mrb[8].mxu1 %vm723_vm3, %v5254_v59  ;;  %v2226_v17 = vsel %vm7134_vm4, %v2221_v61, %v2225_v42  ;;  %v440_v11 = vor.u32 %v439_v2, %v436_v57  ;;  %v2241_v13 = vshll.u32 %v5445_v53, 16  ;;  %v5448_v53 = vld [vmem:[%s7108_s24 + $0x60] sm:$0xf]  ;;  %v7322_v59 = vld [vmem:[%s7108_s24 + $0x64] sm:$0xf] }
  0x57   : > { %v2231_v10 = vrot.slane %v2230_v0, 4  ;;  %v455_v18 = vrot.slane %v453_v7, 5  ;;  %v2240_v19 = vrot.slane %v2238_v9, 4  ;;  %v2247_v21 = vshll.u32 %v7292_v4, 16  ;;  %v7329_v9 = vld [vmem:[%s7108_s24 + $0x68] sm:$0x1] }
  0x58   : > { %v450_v14 = vor.u32 %v449_v6, %v445_v5  ;;  %v441_v29 = vrot.slane %v440_v11, 4  ;;  %v2243_v31 = vrot.slane %v2241_v13, 5  ;;  %v2251_v35 = vshrl.u32 %v7292_v4, 16 }
  0x59   : > { %v2236_v25 = vsel %vm7134_vm4, %v2231_v10, %v2235_v56  ;;  %v2249_v42 = vrot.slane %v2247_v21, 5  ;;  %v2257_v43 = vshll.u32 %v7298_v12, 16  ;;  %v458_v48 = vshrl.u32 %v7302_v24, 16 }
  0x5a   : > { %v5481_v38 = vcombine.low %v2226_v17, %v2236_v25  ;;  %v451_v39 = vrot.slane %v450_v14, 4  ;;  %v446_v44 = vsel %vm7134_vm4, %v441_v29, %v445_v5  ;;  %v2244_v45 = vor.u32 %v2243_v31, %v2240_v19  ;;  %v7333_v19 = vld [vmem:[%s7108_s24 + $0x60] sm:$0xf] }
  0x5b   : > { %v2253_v47 = vrot.slane %v2251_v35, 4  ;;  %v2259_v50 = vrot.slane %v2257_v43, 5  ;;  %v461_v51 = vshll.u32 %v7302_v24, 16  ;;  %v467_v52 = vshll.u32 %v7308_v37, 16  ;;  %v7339_v35 = vld [vmem:[%s7108_s24 + $0x64] sm:$0xf] }
  0x5c   : > { %6253 = vmatmul.mubr.msk.bf16.gmra.mrb[8].mxu0 %vm723_vm3, %v5481_v38  ;;  %v456_v49 = vsel %vm7134_vm4, %v451_v39, %v455_v18  ;;  %v2245_v56 = vrot.slane %v2244_v45, 4  ;;  %v460_v58 = vrot.slane %v458_v48, 4  ;;  %v471_v2 = vshrl.u32 %v7308_v37, 16 }
  0x5d   : > { %v5255_v55 = vcombine.low %v446_v44, %v456_v49  ;;  %v2254_v57 = vor.u32 %v2253_v47, %v2249_v42  ;;  %v463_v61 = vrot.slane %v461_v51, 5  ;;  %v469_v0 = vrot.slane %v467_v52, 5 }
  0x5e   : > { %v477_v5 = vshll.u32 %v277_v26, 16  ;;  %v2250_v6 = vsel %vm7134_vm4, %v2245_v56, %v2249_v42  ;;  %v2262_v17 = vshrl.u32 %v5448_v53, 16  ;;  %v2265_v10 = vshll.u32 %v5448_v53, 16 }
  0x5f   : > { %6120 = vmatprep.mubr.msk.bf16.mxu1 %vm723_vm3, %v5255_v55  ;;  %v2255_v7 = vrot.slane %v2254_v57, 4  ;;  %v464_v11 = vor.u32 %v463_v61, %v460_v58  ;;  %v473_v13 = vrot.slane %v471_v2, 4  ;;  %v2271_v18 = vshll.u32 %v7322_v59, 16  ;;  %v5508_v58 = vld [vmem:[%s7108_s24 + $0xc] sm:$0xe] }
  0x60   : > { %v479_v14 = vrot.slane %v477_v5, 5  ;;  %v2264_v25 = vrot.slane %v2262_v17, 4  ;;  %v2267_v29 = vrot.slane %v2265_v10, 5  ;;  %v2275_v31 = vshrl.u32 %v7322_v59, 16 }
  0x61   : > { %v2260_v21 = vsel %vm7134_vm4, %v2255_v7, %v2259_v50  ;;  %v465_v39 = vrot.slane %v464_v11, 4  ;;  %v474_v42 = vor.u32 %v473_v13, %v469_v0  ;;  %v2273_v43 = vrot.slane %v2271_v18, 5  ;;  %v278_v50 = vld [vmem:[%s7108_s24 + $0x68] sm:$0x1] }
  0x62   : > { %v5482_v38 = vcombine.low %v2250_v6, %v2260_v21  ;;  %v2268_v44 = vor.u32 %v2267_v29, %v2264_v25  ;;  %v2277_v45 = vrot.slane %v2275_v31, 4  ;;  %v2281_v47 = vshll.u32 %v7329_v9, 16  ;;  %v7367_v29 = vld [vmem:[%s7108_s24 + $0x70] sm:$0xf] }
  0x63   : > { %v482_v26 = vshrl.u32 %v7333_v19, 16  ;;  %v470_v48 = vsel %vm7134_vm4, %v465_v39, %v469_v0  ;;  %v475_v49 = vrot.slane %v474_v42, 4  ;;  %v485_v51 = vshll.u32 %v7333_v19, 16  ;;  %v7354_v0 = vld [vmem:[%s7108_s24 + $0x6c] sm:$0xf] }
  0x64   : > { %6256 = vmatprep.mubr.msk.bf16.mxu0 %vm723_vm3, %v5482_v38  ;;  %v491_v52 = vshll.u32 %v7339_v35, 16  ;;  %v2269_v53 = vrot.slane %v2268_v44, 4  ;;  %v2278_v55 = vor.u32 %v2277_v45, %v2273_v43  ;;  %v2283_v56 = vrot.slane %v2281_v47, 5 }
  0x65   : > { %v484_v57 = vrot.slane %v482_v26, 4  ;;  %v480_v61 = vsel %vm7134_vm4, %v475_v49, %v479_v14  ;;  %v487_v2 = vrot.slane %v485_v51, 5  ;;  %v495_v6 = vshrl.u32 %v7339_v35, 16  ;;  %v279_v26 = vld [vmem:[%s7108_s24 + $0x74] sm:$0x1] }
  0x66   : > { %v493_v5 = vrot.slane %v491_v52, 5  ;;  %v5256_v7 = vcombine.low %v470_v48, %v480_v61  ;;  %v2274_v17 = vsel %vm7134_vm4, %v2269_v53, %v2273_v43  ;;  %v2279_v10 = vrot.slane %v2278_v55, 4  ;;  %v5509_v48 = vld [vmem:[%s7108_s24 + $0x18] sm:$0xe] }
  0x67   : > { %v501_v11 = vshll.u32 %v278_v50, 16  ;;  %v488_v14 = vor.u32 %v487_v2, %v484_v57  ;;  %v497_v18 = vrot.slane %v495_v6, 4  ;;  %v5524_v21 = vrot.slane %v5508_v58, 9  ;;  %v7386_v53 = vld [vmem:[%s7108_s24 + $0x78] sm:$0xf] }
  0x68   : > { %v2839_v25 = vrot.slane %v2837_v62, 4  ;;  %6121 = vmatmul.mubr.msk.bf16.gmra.mrb[12].mxu1 %vm723_vm3, %v5256_v7  ;;  %v2284_v31 = vsel %vm7134_vm4, %v2279_v10, %v2283_v56  ;;  %v506_v39 = vshrl.u32 %v7354_v0, 16  ;;  %v509_v42 = vshll.u32 %v7354_v0, 16  ;;  %v280_v57 = vld [vmem:[%s7108_s24 + $0x80] sm:$0x1] }
  0x69   : > { %v503_v38 = vrot.slane %v501_v11, 5  ;;  %v5483_v43 = vcombine.low %v2274_v17, %v2284_v31  ;;  %v489_v44 = vrot.slane %v488_v14, 4  ;;  %v498_v45 = vor.u32 %v497_v18, %v493_v5  ;;  %v5510_v10 = vld [vmem:[%s7108_s24 + $0x24] sm:$0xe] }
  0x6a   : > { %v2838_v47 = vsel %vm7360_vm7, %v5524_v21, %v2837_v62  ;;  %v2841_v49 = vsel %vm7360_vm7, %v2839_v25, %v2840_v63  ;;  %v508_v50 = vrot.slane %v506_v39, 4  ;;  %v511_v51 = vrot.slane %v509_v42, 5  ;;  %v7412_v39 = vld [vmem:[%s7108_s24 + $0x84] sm:$0xf] }
  0x6b   : > { %v515_v52 = vshll.u32 %v7367_v29, 16  ;;  %6257 = vmatmul.mubr.msk.bf16.gmra.mrb[12].mxu0 %vm723_vm3, %v5483_v43  ;;  %v494_v15 = vsel %vm7134_vm4, %v489_v44, %v493_v5  ;;  %v499_v62 = vrot.slane %v498_v45, 4  ;;  %v5541_v55 = vcombine.low %v2838_v47, %v2841_v49  ;;  %v7420_v43 = vld [vmem:[%s7108_s24 + $0x88] sm:$0xf] }
  0x6c   : > { %v519_v56 = vshrl.u32 %v7367_v29, 16  ;;  %v512_v63 = vor.u32 %v511_v51, %v508_v50  ;;  %v525_v61 = vshll.u32 %v279_v26, 16  ;;  %v5525_v2 = vrot.slane %v5509_v48, 9 }
  0x6d   : > { %v517_v58 = vrot.slane %v515_v52, 5  ;;  %v504_v6 = vsel %vm7134_vm4, %v499_v62, %v503_v38  ;;  %6278 = vmatprep.mubr.msk.bf16.mxu0 %vm723_vm3, %v5541_v55  ;;  %v2848_v5 = vsel %vm7360_vm7, %v7177_v30, %v2847_v28  ;;  %v530_v17 = vshrl.u32 %v7386_v53, 16  ;;  %v281_v52 = vld [vmem:[%s7108_s24 + $0x8c] sm:$0x1] }
  0x6e   : > { %v521_v7 = vrot.slane %v519_v56, 4  ;;  %v5257_v11 = vcombine.low %v494_v15, %v504_v6  ;;  %v513_v14 = vrot.slane %v512_v63, 4  ;;  %v527_v18 = vrot.slane %v525_v61, 5 }
  0x6f   : > { %v2845_v21 = vsel %vm7360_vm7, %v5525_v2, %v2844_v22  ;;  %v532_v38 = vrot.slane %v530_v17, 4  ;;  %v533_v1 = vshll.u32 %v7386_v53, 16  ;;  %v539_v30 = vshll.u32 %v7393_v16, 16  ;;  %v7425_v22 = vld [vmem:[%s8966_s1 + $0x1c] sm:$0xf] }
  0x70   : > { %v522_v25 = vor.u32 %v521_v7, %v517_v58  ;;  %v5542_v31 = vcombine.low %v2845_v21, %v2848_v5  ;;  %6124 = vmatprep.mubr.msk.bf16.mxu1 %vm723_vm3, %v5257_v11  ;;  %v518_v28 = vsel %vm7134_vm4, %v513_v14, %v517_v58  ;;  %v543_v60 = vshrl.u32 %v7393_v16, 16  ;;  %v7444_v5 = vld [vmem:[%s7108_s24 + $0x90] sm:$0xf] }
  0x71   : > { %v549_v42 = vshll.u32 %v280_v57, 16  ;;  %v535_v45 = vrot.slane %v533_v1, 5  ;;  %v5526_v47 = vrot.slane %v5510_v10, 9  ;;  %v2851_v26 = vrot.slane %v7184_v46, 5  ;;  %v5511_v57 = vld [vmem:[%s7108_s24 + $0x30] sm:$0xe] }
  0x72   : > { %v523_v44 = vrot.slane %v522_v25, 4  ;;  %v541_v48 = vrot.slane %v539_v30, 5  ;;  %v545_v49 = vrot.slane %v543_v60, 4  ;;  %v2854_v51 = vrot.slane %v7193_v54, 5  ;;  %v7456_v30 = vld [vmem:[%s7108_s24 + $0x94] sm:$0xf] }
  0x73   : > { %v551_v50 = vrot.slane %v549_v42, 5  ;;  %6279 = vmatmul.mubr.msk.bf16.vlgmr.msra.gmra.mrb[0].mxu0 %vm723_vm3, %v5542_v31  ;;  %v536_v62 = vor.u32 %v535_v45, %v532_v38  ;;  %v2852_v55 = vsel %vm7360_vm7, %v5526_v47, %v2851_v26  ;;  %v2853_v56 = vrot.slane %v2851_v26, 4  ;;  %v282_v60 = vld [vmem:[%s7108_s24 + $0x98] sm:$0x1]  ;;  %v5512_v26 = vld [vmem:[%s7108_s24 + $0x3c] sm:$0xe] }
  0x74   : > { %v528_v15 = vsel %vm7134_vm4, %v523_v44, %v527_v18  ;;  %6311 = vmatpush3.bf16.msra.mxu0 %v7144_v41  ;;  %v546_v46 = vor.u32 %v545_v49, %v541_v48  ;;  %v554_v58 = vshrl.u32 %v7412_v39, 16  ;;  %v557_v54 = vshll.u32 %v7412_v39, 16 }
  0x75   : > { %v5258_v63 = vcombine.low %v518_v28, %v528_v15  ;;  %v537_v61 = vrot.slane %v536_v62, 4  ;;  %v2855_v2 = vsel %vm7360_vm7, %v2853_v56, %v2854_v51  ;;  %v563_v6 = vshll.u32 %v7420_v43, 16  ;;  %6678 = vmatprep.subr.msk.bf16.mxu0 %vm772_vm0, %v7425_v22 }
  0x76   : > { %v567_v7 = vshrl.u32 %v7420_v43, 16  ;;  %v547_v41 = vrot.slane %v546_v46, 4  ;;  %v5543_v17 = vcombine.low %v2852_v55, %v2855_v2  ;;  %v556_v10 = vrot.slane %v554_v58, 4  ;;  %v7476_v46 = vld [vmem:[%s7108_s24 + $0xa0] sm:$0xf] }
  0x77   : > { %6125 = vmatmul.mubr.msk.bf16.gmra.mrb[16].mxu1 %vm723_vm3, %v5258_v63  ;;  %v559_v11 = vrot.slane %v557_v54, 5  ;;  %v542_v14 = vsel %vm7134_vm4, %v537_v61, %v541_v48  ;;  %v565_v18 = vrot.slane %v563_v6, 5  ;;  %v573_v25 = vshll.u32 %v281_v52, 16  ;;  %v7465_v52 = vld [vmem:[%s7108_s24 + $0x9c] sm:$0xf] }
  0x78   : > { %v569_v21 = vrot.slane %v567_v7, 4  ;;  %v552_v31 = vsel %vm7134_vm4, %v547_v41, %v551_v50  ;;  %6282 = vmatprep.mubr.msk.bf16.mxu0 %vm723_vm3, %v5543_v17  ;;  %v5527_v1 = vrot.slane %v5511_v57, 9  ;;  %v2858_v28 = vrot.slane %v7213_v33, 5 }
  0x79   : > { %v560_v38 = vor.u32 %v559_v11, %v556_v10  ;;  %v5259_v42 = vcombine.low %v542_v14, %v552_v31  ;;  %v575_v45 = vrot.slane %v573_v25, 5  ;;  %v2861_v47 = vrot.slane %v7221_v40, 5  ;;  %v283_v10 = vld [vmem:[%s7108_s24 + $0xa4] sm:$0x1]  ;;  %v5513_v11 = vld [vmem:[%s7108_s24 + $0x48] sm:$0xe] }
  0x7a   : > { %v570_v44 = vor.u32 %v569_v21, %v565_v18  ;;  %v2859_v49 = vsel %vm7360_vm7, %v5527_v1, %v2858_v28  ;;  %v2860_v50 = vrot.slane %v2858_v28, 4  ;;  %v578_v51 = vshrl.u32 %v7444_v5, 16 }
  0x7b   : > { %v561_v48 = vrot.slane %v560_v38, 4  ;;  %6128 = vmatprep.mubr.msk.bf16.mxu1 %vm723_vm3, %v5259_v42  ;;  %v581_v15 = vshll.u32 %v7444_v5, 16  ;;  %v587_v62 = vshll.u32 %v7456_v30, 16  ;;  %v591_v40 = vshrl.u32 %v7456_v30, 16 }
  0x7c   : > { %v571_v33 = vrot.slane %v570_v44, 4  ;;  %v2862_v56 = vsel %vm7360_vm7, %v2860_v50, %v2861_v47  ;;  %v580_v57 = vrot.slane %v578_v51, 4  ;;  %v597_v63 = vshll.u32 %v282_v60, 16 }
  0x7d   : > { %v566_v55 = vsel %vm7134_vm4, %v561_v48, %v565_v18  ;;  %v5544_v54 = vcombine.low %v2859_v49, %v2862_v56  ;;  %v583_v61 = vrot.slane %v581_v15, 5  ;;  %v589_v2 = vrot.slane %v587_v62, 5  ;;  %v7502_v56 = vld [vmem:[%s7108_s24 + $0xac] sm:$0xf] }
  0x7e   : > { %v576_v58 = vsel %vm7134_vm4, %v571_v33, %v575_v45  ;;  %v593_v7 = vrot.slane %v591_v40, 4  ;;  %v599_v41 = vrot.slane %v597_v63, 5  ;;  %v5528_v17 = vrot.slane %v5512_v26, 9  ;;  %v7497_v33 = vld [vmem:[%s7108_s24 + $0xa8] sm:$0xf] }
  0x7f   : > { %v5260_v6 = vcombine.low %v566_v55, %v576_v58  ;;  %6283 = vmatmul.mubr.msk.bf16.gmra.mrb[4].mxu0 %vm723_vm3, %v5544_v54  ;;  %v584_v14 = vor.u32 %v583_v61, %v580_v57  ;;  %v2865_v18 = vrot.slane %v7238_v20, 5  ;;  %v2868_v21 = vrot.slane %v7243_v34, 5  ;;  %v284_v61 = vld [vmem:[%s7108_s24 + $0xb0] sm:$0x1] }
  0x80   : > { %v602_v25 = vshrl.u32 %v7465_v52, 16  ;;  %v594_v31 = vor.u32 %v593_v7, %v589_v2  ;;  %v605_v38 = vshll.u32 %v7465_v52, 16  ;;  %v611_v1 = vshll.u32 %v7476_v46, 16 }
  0x81   : > { %6129 = vmatmul.mubr.msk.bf16.gmra.mrb[20].mxu1 %vm723_vm3, %v5260_v6  ;;  %v615_v28 = vshrl.u32 %v7476_v46, 16  ;;  %v585_v60 = vrot.slane %v584_v14, 4  ;;  %v2866_v42 = vsel %vm7360_vm7, %v5528_v17, %v2865_v18  ;;  %v2867_v20 = vrot.slane %v2865_v18, 4  ;;  %v7517_v14 = vld [vmem:[%s7108_s24 + $0xb4] sm:$0xf] }
  0x82   : > { %v604_v44 = vrot.slane %v602_v25, 4  ;;  %v595_v34 = vrot.slane %v594_v31, 4  ;;  %v607_v45 = vrot.slane %v605_v38, 5  ;;  %v613_v47 = vrot.slane %v611_v1, 5 }
  0x83   : > { %v617_v26 = vrot.slane %v615_v28, 4  ;;  %v590_v48 = vsel %vm7134_vm4, %v585_v60, %v589_v2  ;;  %v2869_v49 = vsel %vm7360_vm7, %v2867_v20, %v2868_v21  ;;  %v621_v50 = vshll.u32 %v283_v10, 16  ;;  %v5514_v2 = vld [vmem:[%s7108_s24 + $0x54] sm:$0xe] }
  0x84   : > { %v5529_v51 = vrot.slane %v5513_v11, 9  ;;  %v600_v15 = vsel %vm7134_vm4, %v595_v34, %v599_v41  ;;  %v5545_v62 = vcombine.low %v2866_v42, %v2869_v49  ;;  %v608_v40 = vor.u32 %v607_v45, %v604_v44  ;;  %v7526_v42 = vld [vmem:[%s7108_s24 + $0xb8] sm:$0xf]  ;;  %v285_v49 = vld [vmem:[%s7108_s24 + $0xbc] sm:$0x1] }
  0x85   : > { %v618_v55 = vor.u32 %v617_v26, %v613_v47  ;;  %v5261_v57 = vcombine.low %v590_v48, %v600_v15  ;;  %v623_v63 = vrot.slane %v621_v50, 5  ;;  %v2872_v58 = vrot.slane %v7261_v8, 5 }
  0x86   : > { %v2875_v54 = vrot.slane %v7269_v23, 5  ;;  %6286 = vmatprep.mubr.msk.bf16.mxu0 %vm723_vm3, %v5545_v62  ;;  %v609_v6 = vrot.slane %v608_v40, 4  ;;  %v626_v41 = vshrl.u32 %v7497_v33, 16  ;;  %v629_v17 = vshll.u32 %v7497_v33, 16 }
  0x87   : > { %v619_v7 = vrot.slane %v618_v55, 4  ;;  %6132 = vmatprep.mubr.msk.bf16.mxu1 %vm723_vm3, %v5261_v57  ;;  %v2873_v10 = vsel %vm7360_vm7, %v5529_v51, %v2872_v58  ;;  %v2874_v11 = vrot.slane %v2872_v58, 4  ;;  %v635_v8 = vshll.u32 %v7502_v56, 16  ;;  %v5515_v55 = vld [vmem:[%s7108_s24 + $0x60] sm:$0xe] }
  0x88   : > { %v639_v23 = vshrl.u32 %v7502_v56, 16  ;;  %v614_v18 = vsel %vm7134_vm4, %v609_v6, %v613_v47  ;;  %v628_v25 = vrot.slane %v626_v41, 4  ;;  %v631_v31 = vrot.slane %v629_v17, 5  ;;  %v5516_v6 = vld [vmem:[%s7108_s24 + $0x6c] sm:$0xe] }
  0x89   : > { %v624_v21 = vsel %vm7134_vm4, %v619_v7, %v623_v63  ;;  %v2876_v1 = vsel %vm7360_vm7, %v2874_v11, %v2875_v54  ;;  %v637_v28 = vrot.slane %v635_v8, 5  ;;  %v645_v34 = vshll.u32 %v284_v61, 16  ;;  %v5452_v11 = vld [vmem:[%s7108_s24 + $0x70] sm:$0xf]  ;;  %v5453_v8 = vld [vmem:[%s7108_s24 + $0x74] sm:$0x1] }
  0x8a   : > { %v5262_v38 = vcombine.low %v614_v18, %v624_v21  ;;  %v641_v60 = vrot.slane %v639_v23, 4  ;;  %v5546_v20 = vcombine.low %v2873_v10, %v2876_v1  ;;  %v632_v44 = vor.u32 %v631_v31, %v628_v25 }
  0x8b   : > { %v5530_v45 = vrot.slane %v5514_v2, 9  ;;  %v2879_v26 = vrot.slane %v7292_v4, 5  ;;  %v2882_v48 = vrot.slane %v7298_v12, 5  ;;  %v650_v50 = vshrl.u32 %v7517_v14, 16 }
  0x8c   : > { %6133 = vmatmul.mubr.msk.bf16.gmra.mrb[24].mxu1 %vm723_vm3, %v5262_v38  ;;  %v642_v47 = vor.u32 %v641_v60, %v637_v28  ;;  %6287 = vmatmul.mubr.msk.bf16.gmra.mrb[8].mxu0 %vm723_vm3, %v5546_v20  ;;  %v633_v51 = vrot.slane %v632_v44, 4  ;;  %v647_v15 = vrot.slane %v645_v34, 5  ;;  %v653_v62 = vshll.u32 %v7517_v14, 16 }
  0x8d   : > { %v659_v40 = vshll.u32 %v7526_v42, 16  ;;  %v2880_v4 = vsel %vm7360_vm7, %v5530_v45, %v2879_v26  ;;  %v2881_v12 = vrot.slane %v2879_v26, 4  ;;  %v652_v63 = vrot.slane %v650_v50, 4 }
  0x8e   : > { %v643_v57 = vrot.slane %v642_v47, 4  ;;  %v638_v58 = vsel %vm7134_vm4, %v633_v51, %v637_v28  ;;  %v655_v54 = vrot.slane %v653_v62, 5  ;;  %v663_v2 = vshrl.u32 %v7526_v42, 16  ;;  %v5517_v47 = vld [vmem:[%s7108_s24 + $0x78] sm:$0xe] }
  0x8f   : > { %v661_v61 = vrot.slane %v659_v40, 5  ;;  %v2883_v41 = vsel %vm7360_vm7, %v2881_v12, %v2882_v48  ;;  %v669_v17 = vshll.u32 %v285_v49, 16  ;;  %v5531_v10 = vrot.slane %v5515_v55, 9  ;;  %v6796_v51 = vld [vmem:[%s7108_s24] sm:$0xf] }
  0x90   : > { %v648_v7 = vsel %vm7134_vm4, %v643_v57, %v647_v15  ;;  %v5547_v18 = vcombine.low %v2880_v4, %v2883_v41  ;;  %v656_v21 = vor.u32 %v655_v54, %v652_v63  ;;  %v665_v25 = vrot.slane %v663_v2, 4  ;;  %v7564_v15 = vld [vmem:[%s7108_s24 + $0x4] sm:$0xf]  ;;  %v7568_v40 = vld [vmem:[%s7108_s24 + $0x7c] sm:$0xf] }
  0x91   : > { %v5263_v23 = vcombine.low %v638_v58, %v648_v7  ;;  %v671_v31 = vrot.slane %v669_v17, 5  ;;  %v2886_v38 = vrot.slane %v7322_v59, 5  ;;  %v2889_v1 = vrot.slane %v7329_v9, 5  ;;  %v7571_v55 = vld [vmem:[%s7108_s24 + $0x80] sm:$0x1] }
  0x92   : > { %v5532_v28 = vrot.slane %v5516_v6, 9  ;;  %6290 = vmatprep.mubr.msk.bf16.mxu0 %vm723_vm3, %v5547_v18  ;;  %v657_v60 = vrot.slane %v656_v21, 4  ;;  %v666_v20 = vor.u32 %v665_v25, %v661_v61  ;;  %v2893_v44 = vrot.slane %v5452_v11, 5  ;;  %v5458_v57 = vld [vmem:[%s7108_s24 + $0x88] sm:$0xf] }
  0x93   : > { %6136 = vmatprep.mubr.msk.bf16.mxu1 %vm723_vm3, %v5263_v23  ;;  %v2896_v34 = vrot.slane %v5453_v8, 5  ;;  %v2887_v45 = vsel %vm7360_vm7, %v5531_v10, %v2886_v38  ;;  %v2888_v59 = vrot.slane %v2886_v38, 4  ;;  %v5281_v62 = vcombine.low %v6796_v51, %v7564_v15  ;;  %v5459_v54 = vld [vmem:[%s7108_s24 + $0x8c] sm:$0x1]  ;;  %v5461_v17 = vld [vmem:[%s7108_s24 + $0x94] sm:$0xf] }
  0x94   : > { %v662_v9 = vsel %vm7134_vm4, %v657_v60, %v661_v61  ;;  %v667_v26 = vrot.slane %v666_v20, 4  ;;  %v2894_v48 = vsel %vm7360_vm7, %v5532_v28, %v2893_v44  ;;  %v2895_v49 = vrot.slane %v2893_v44, 4  ;;  %v5518_v61 = vld [vmem:[%s7108_s24 + $0x84] sm:$0xe]  ;;  %v5519_v23 = vld [vmem:[%s7108_s24 + $0x90] sm:$0xe] }
  0x95   : > { %v2890_v50 = vsel %vm7360_vm7, %v2888_v59, %v2889_v1  ;;  %v5533_v58 = vrot.slane %v5517_v47, 9  ;;  %v2900_v7 = vrot.slane %v7568_v40, 5  ;;  %v2903_v41 = vrot.slane %v7571_v55, 5  ;;  %v5462_v25 = vld [vmem:[%s7108_s24 + $0x98] sm:$0x1] }
  0x96   : > { %v672_v4 = vsel %vm7134_vm4, %v667_v26, %v671_v31  ;;  %v5548_v12 = vcombine.low %v2887_v45, %v2890_v50  ;;  %v2897_v63 = vsel %vm7360_vm7, %v2895_v49, %v2896_v34  ;;  %v5534_v10 = vrot.slane %v5518_v61, 9  ;;  %v5464_v31 = vld [vmem:[%s7108_s24 + $0xa0] sm:$0xf]  ;;  %v5465_v60 = vld [vmem:[%s7108_s24 + $0xa4] sm:$0x1] }
  0x97   : > { %v5264_v2 = vcombine.low %v662_v9, %v672_v4  ;;  %v5549_v6 = vcombine.low %v2894_v48, %v2897_v63  ;;  %v2907_v11 = vrot.slane %v5458_v57, 5  ;;  %v2910_v8 = vrot.slane %v5459_v54, 5  ;;  %v5520_v20 = vld [vmem:[%s7108_s24 + $0x9c] sm:$0xe]  ;;  %v6798_v44 = vld [vmem:[%s7108_s24 + $0xc] sm:$0xf] }
  0x98   : > { %6291 = vmatmul.mubr.msk.bf16.gmra.mrb[12].mxu0 %vm723_vm3, %v5548_v12  ;;  %v2901_v18 = vsel %vm7360_vm7, %v5533_v58, %v2900_v7  ;;  %v2902_v21 = vrot.slane %v2900_v7, 4  ;;  %v2914_v28 = vrot.slane %v5461_v17, 5  ;;  %v7598_v34 = vld [vmem:[%s7108_s24 + $0x10] sm:$0xf]  ;;  %v6800_v47 = vld [vmem:[%s7108_s24 + $0x18] sm:$0xf] }
  0x99   : > { %6137 = vmatmul.mubr.msk.bf16.gmra.mrb[28].mxu1 %vm723_vm3, %v5264_v2  ;;  %6294 = vmatprep.mubr.msk.bf16.mxu0 %vm723_vm3, %v5549_v6  ;;  %v2908_v38 = vsel %vm7360_vm7, %v5534_v10, %v2907_v11  ;;  %v2909_v1 = vrot.slane %v2907_v11, 4  ;;  %v5282_v45 = vcombine.low %v6798_v44, %v7598_v34  ;;  %v7605_v9 = vld [vmem:[%s7108_s24 + $0x1c] sm:$0xf]  ;;  %v5535_v48 = vrot.slane %v5519_v23, 9  ;;  %v5467_v57 = vld [vmem:[%s7108_s24 + $0xac] sm:$0xf] }
  0x9a   : > { %6142 = vmatprep.mubr.msk.bf16.mxu1 %vm723_vm3, %v5281_v62  ;;  %v2904_v59 = vsel %vm7360_vm7, %v2902_v21, %v2903_v41  ;;  %v5283_v26 = vcombine.low %v6800_v47, %v7605_v9  ;;  %v2916_v51 = vrot.slane %v2914_v28, 4  ;;  %v2917_v62 = vrot.slane %v5462_v25, 5  ;;  %v6802_v54 = vld [vmem:[%s8966_s1 + $0x8] sm:$0xf]  ;;  %v5470_v2 = vld [vmem:[%s7108_s24 + $0xb8] sm:$0xf] }
  0x9b   : > { %v5550_v49 = vcombine.low %v2901_v18, %v2904_v59  ;;  %v2911_v50 = vsel %vm7360_vm7, %v2909_v1, %v2910_v8  ;;  %v5536_v12 = vrot.slane %v5520_v20, 9  ;;  %v2921_v63 = vrot.slane %v5464_v31, 5  ;;  %v7620_v7 = vld [vmem:[%s8966_s1 + $0xc] sm:$0xf]  ;;  %v5468_v10 = vld [vmem:[%s7108_s24 + $0xb0] sm:$0x1] }
  0x9c   : > { %v5551_v4 = vcombine.low %v2908_v38, %v2911_v50  ;;  %v2924_v58 = vrot.slane %v5465_v60, 5  ;;  %v1491_v61 = vsel %vm772_vm0, %v6802_v54, 0  ;;  %v2915_v41 = vsel %vm7360_vm7, %v5535_v48, %v2914_v28  ;;  %v5521_v11 = vld [vmem:[%s7108_s24 + $0xa8] sm:$0xe]  ;;  %v5471_v25 = vld [vmem:[%s7108_s24 + $0xbc] sm:$0x1] }
  0x9d   : > { %v2923_v6 = vrot.slane %v2921_v63, 4  ;;  %v2918_v17 = vsel %vm7360_vm7, %v2916_v51, %v2917_v62  ;;  %v2928_v8 = vrot.slane %v5467_v57, 5  ;;  %v2922_v23 = vsel %vm7360_vm7, %v5536_v12, %v2921_v63  ;;  %v5522_v31 = vld [vmem:[%s7108_s24 + $0xb4] sm:$0xe]  ;;  %v6803_v38 = vld [vmem:[%s7108_s24 + $0x24] sm:$0xf] }
  0x9e   : > { %v2935_v21 = vrot.slane %v5470_v2, 5  ;;  %v7641_v1 = vld [vmem:[%s7108_s24 + $0x28] sm:$0xf]  ;;  %v5552_v60 = vcombine.low %v2915_v41, %v2918_v17  ;;  %v5537_v44 = vrot.slane %v5521_v11, 9  ;;  %v2931_v59 = vrot.slane %v5468_v10, 5 }
  0x9f   : > { %v2925_v18 = vsel %vm7360_vm7, %v2923_v6, %v2924_v58  ;;  %v5284_v28 = vcombine.low %v6803_v38, %v7641_v1  ;;  %v6805_v47 = vld [vmem:[%s7108_s24 + $0x30] sm:$0xf]  ;;  %v2938_v51 = vrot.slane %v5471_v25, 5  ;;  %v5473_v62 = vld [vmem:[%s7108_s24 + $0xc4] sm:$0xf]  ;;  %v2323_v25 = vshrl.u32 %v7568_v40, 16 }
  0xa0   : > { %6295 = vmatmul.mubr.msk.bf16.gmra.mrb[16].mxu0 %vm723_vm3, %v5550_v49  ;;  %v5553_v20 = vcombine.low %v2922_v23, %v2925_v18  ;;  %v5538_v49 = vrot.slane %v5522_v31, 9  ;;  %v2937_v50 = vrot.slane %v2935_v21, 4  ;;  %v2929_v57 = vsel %vm7360_vm7, %v5537_v44, %v2928_v8  ;;  %v5523_v12 = vld [vmem:[%s7108_s24 + $0xc0] sm:$0xe]  ;;  %v6807_v41 = vld [vmem:[%s7108_s24 + $0x3c] sm:$0xf] }
  0xa1   : > { %6143 = vmatmul.mubr.msk.bf16.vlgmr.msra.gmra.mrb[0].mxu1 %vm723_vm3, %v5282_v45  ;;  %6298 = vmatprep.mubr.msk.bf16.mxu0 %vm723_vm3, %v5551_v4  ;;  %v2930_v45 = vrot.slane %v2928_v8, 4  ;;  %v2942_v63 = vrot.slane %v5473_v62, 5  ;;  %v5539_v6 = vrot.slane %v5523_v12, 9  ;;  %v7666_v17 = vld [vmem:[%s7108_s24 + $0x40] sm:$0xf]  ;;  %v5287_v18 = vcombine.low %v7273_v27, %v7276_v36  ;;  %v6759_v62 = vld [vmem:[%s7108_s24 + $0x24] sm:$0xff]  }
  0xa2   : > { %6175 = vmatpush3.bf16.msra.mxu1 %v1491_v61  ;;  %6146 = vmatprep.mubr.msk.bf16.mxu1 %vm723_vm3, %v5283_v26  ;;  %v7646_v26 = vld [vmem:[%s7108_s24 + $0x34] sm:$0xf]  ;;  %v2936_v58 = vsel %vm7360_vm7, %v5538_v49, %v2935_v21  ;;  %v2939_v54 = vsel %vm7360_vm7, %v2937_v50, %v2938_v51  ;;  %v5474_v61 = vld [vmem:[%s7108_s24 + $0xc8] sm:$0x1]  ;;  %v5286_v10 = vcombine.low %v6807_v41, %v7666_v17  ;;  %v2319_v21 = vshll.u32 %v7568_v40, 16 }
  0xa3   : > { %6673 = vmatprep.subr.msk.bf16.mxu1 %vm772_vm0, %v7620_v7  ;;  %v5285_v48 = vcombine.low %v6805_v47, %v7646_v26  ;;  %v2932_v4 = vsel %vm7360_vm7, %v2930_v45, %v2931_v59  ;;  %v5555_v11 = vcombine.low %v2936_v58, %v2939_v54  ;;  %v2944_v8 = vrot.slane %v2942_v63, 4  ;;  %v1229_v45 = vld [vmem:[%s7108_s24] sm:$0xe]  ;;  %v1230_v59 = vld [vmem:[%s7108_s24 + $0xc] sm:$0xe] }
  0xa4   : > { %v5554_v2 = vcombine.low %v2929_v57, %v2932_v4  ;;  %v2945_v23 = vrot.slane %v5474_v61, 5  ;;  %v2943_v31 = vsel %vm7360_vm7, %v5539_v6, %v2942_v63  ;;  %v7681_v27 = vrot.slane %v2319_v21, 5  ;;  %v1233_v41 = vld [vmem:[%s7108_s24 + $0x30] sm:$0xe] }
  0xa5   : > { %v2325_v36 = vrot.slane %v2323_v25, 4  ;;  %v5289_v44 = vcombine.low %v7333_v19, %v7339_v35  ;;  %v2329_v47 = vshll.u32 %v7571_v55, 16  ;;  %v5313_v19 = vrot.slane %v1229_v45, 9 }
  0xa6   : > { %v2946_v38 = vsel %vm7360_vm7, %v2944_v8, %v2945_v23  ;;  %8991 = vst [vmem:[#allocation10_spill] sm:$0xff] %v7681_v27  ;;  %v5314_v35 = vrot.slane %v1230_v59, 9  ;;  %v1296_v4 = vrot.slane %v7605_v9, 5  ;;  %v1303_v12 = vrot.slane %v7641_v1, 5  ;;  %v1234_v8 = vld [vmem:[%s7108_s24 + $0x3c] sm:$0xe] }
  0xa7   : > { %v5556_v40 = vcombine.low %v2943_v31, %v2946_v38  ;;  %v2326_v49 = vor.u32 %v2325_v36, %v7681_v27  ;;  %v7701_v51 = vrot.slane %v2329_v47, 5  ;;  %v5290_v58 = vcombine.low %v7354_v0, %v7367_v29  ;;  %v1235_v31 = vld [vmem:[%s7108_s24 + $0x48] sm:$0xe]  ;;  %v6813_v59 = vld [vmem:[%s7108_s24 + $0x38] sm:$0x1] }
  0xa8   : > { %6299 = vmatmul.mubr.msk.bf16.gmra.mrb[20].mxu0 %vm723_vm3, %v5552_v60  ;;  %v5288_v60 = vcombine.low %v7302_v24, %v7308_v37  ;;  %v6810_v24 = vld [vmem:[%s7108_s24 + $0x14] sm:$0x1]  ;;  %v4131_v54 = vsel %vm772_vm0, %v7425_v22, 0  ;;  %v5291_v61 = vcombine.low %v7386_v53, %v7393_v16  ;;  %v5292_v6 = vcombine.low %v7412_v39, %v7420_v43  ;;  %v6811_v16 = vld [vmem:[%s7108_s24 + $0x20] sm:$0x1] }
  0xa9   : > { %6147 = vmatmul.mubr.msk.bf16.gmra.mrb[4].mxu1 %vm723_vm3, %v5284_v28  ;;  %6302 = vmatprep.mubr.msk.bf16.mxu0 %vm723_vm3, %v5553_v20  ;;  %v1289_v28 = vrot.slane %v7598_v34, 5  ;;  %v6757_v20 = vld [vmem:[%s7108_s24 + $0x18] sm:$0xff]   ;;  %v6809_v34 = vld [vmem:[%s7108_s24 + $0x8] sm:$0x1]  ;;  %v1292_v37 = vrot.slane %v6810_v24, 5  ;;  %8992 = vst [vmem:[#allocation11_spill] sm:$0xff] %v7701_v51  ;;  %v5293_v9 = vcombine.low %v7444_v5, %v7456_v30 }
  0xaa   : > { %6150 = vmatprep.mubr.msk.bf16.mxu1 %vm723_vm3, %v5285_v48  ;;  %v1282_v48 = vrot.slane %v7564_v15, 5  ;;  %v1285_v50 = vrot.slane %v6809_v34, 5  ;;  %v1231_v15 = vld [vmem:[%s7108_s24 + $0x18] sm:$0xe]  ;;  %v7706_v63 = vrot.slane %v2326_v49, 4  ;;  %v1299_v22 = vrot.slane %v6811_v16, 5 }
  0xab   : > { %v1291_v55 = vrot.slane %v1289_v28, 4  ;;  %v5315_v1 = vrot.slane %v1231_v15, 9  ;;  %v7728_v29 = vsel %vm7360_vm7, %v5314_v35, %v1289_v28  ;;  %v1305_v25 = vrot.slane %v1303_v12, 4  ;;  %v5638_v24 = vld [vmem:[%s7108_s24 + $0x18] sm:$0xf] }
  0xac   : > { %v1284_v57 = vrot.slane %v1282_v48, 4  ;;  %8993 = vst [vmem:[#allocation12_spill] sm:$0xff] %v7706_v63  ;;  %v7724_v0 = vsel %vm7360_vm7, %v5313_v19, %v1282_v48  ;;  %v1313_v47 = vrot.slane %v6813_v59, 5  ;;  %v7765_v49 = vsel %vm772_vm0, %v7620_v7, 0  ;;  %v5639_v7 = vld [vmem:[%s7108_s24 + $0x1c] sm:$0xf] }
  0xad   : > { %v7732_v53 = vsel %vm7360_vm7, %v1291_v55, %v1292_v37  ;;  %v7769_v34 = vsel %vm7360_vm7, %v5315_v1, %v1296_v4  ;;  %v6763_v37 = vld [vmem:[%s7108_s24 + $0x3c] sm:$0xff]   ;;  %v5318_v35 = vrot.slane %v1234_v8, 9  ;;  %v6814_v55 = vld [vmem:[%s7108_s24 + $0x44] sm:$0x1]  ;;  %v3652_v8 = vshll.u32 %v5638_v24, 16 }
  0xae   : > { %v7743_v23 = vsel %vm7360_vm7, %v1284_v57, %v1285_v50  ;;  %v1236_v50 = vld [vmem:[%s7108_s24 + $0x54] sm:$0xe]  ;;  %v1320_v15 = vrot.slane %v6814_v55, 5  ;;  %v5642_v39 = vld [vmem:[%s7108_s24 + $0x28] sm:$0xf] }
  0xaf   : > { %v6821_v5 = vld [vmem:[%s7108_s24 + $0x70] sm:$0xf] }
  0xb0   : > { %6303 = vmatmul.mubr.msk.bf16.gmra.mrb[24].mxu0 %vm723_vm3, %v5554_v2  ;;  %v1232_v2 = vld [vmem:[%s7108_s24 + $0x24] sm:$0xe]  ;;  %v1345_v30 = vrot.slane %v6821_v5, 5 }
  0xb1   : > { %6151 = vmatmul.mubr.msk.bf16.gmra.mrb[8].mxu1 %vm723_vm3, %v5286_v10  ;;  %6306 = vmatprep.mubr.msk.bf16.mxu0 %vm723_vm3, %v5555_v11  ;;  %v1310_v10 = vrot.slane %v7646_v26, 5  ;;  %v6761_v11 = vld [vmem:[%s7108_s24 + $0x30] sm:$0xff]   ;;  %v7739_v26 = vld [vmem:[%s8966_s1 + $0x20] sm:$0xf]  ;;  %v5316_v21 = vrot.slane %v1232_v2, 9 }
  0xb2   : > { %6154 = vmatprep.mubr.msk.bf16.mxu1 %vm723_vm3, %v5287_v18  ;;  %v1298_v18 = vrot.slane %v1296_v4, 4  ;;  %v1347_v48 = vrot.slane %v1345_v30, 4 }
  0xb3   : > { %v1312_v45 = vrot.slane %v1310_v10, 4  ;;  %v7776_v19 = vsel %vm7360_vm7, %v5316_v21, %v1303_v12  ;;  %v3662_v21 = vshrl.u32 %v5639_v7, 16 }
  0xb4   : > { %v7785_v4 = vsel %vm7360_vm7, %v1298_v18, %v1299_v22  ;;  %v3649_v22 = vshrl.u32 %v5638_v24, 16  ;;  %v3658_v18 = vshll.u32 %v5639_v7, 16  ;;  %v5641_v24 = vld [vmem:[%s7108_s24 + $0x24] sm:$0xf] }
  0xb5   : > { %v7798_v1 = vsel %vm7360_vm7, %v1312_v45, %v1313_v47 }
  0xb6   : > { %v3651_v43 = vrot.slane %v3649_v22, 4  ;;  %v7840_v7 = vrot.slane %v3658_v18, 5  ;;  %v3676_v22 = vshll.u32 %v5641_v24, 16  ;;  %v3686_v18 = vshrl.u32 %v5642_v39, 16 }
  0xb8   : > { %6307 = vmatmul.mubr.msk.bf16.gmra.mrb[28].mxu0 %vm723_vm3, %v5556_v40  ;;  %v6812_v40 = vld [vmem:[%s7108_s24 + $0x2c] sm:$0x1]  ;;  %v3678_v27 = vrot.slane %v3676_v22, 5 }
  0xb9   : > { %6155 = vmatmul.mubr.msk.bf16.gmra.mrb[12].mxu1 %vm723_vm3, %v5288_v60  ;;  %6312 = vmatprep.mubr.msk.bf16.mxu0 %vm723_vm3, %v6757_v20  ;;  %v1306_v28 = vrot.slane %v6812_v40, 5  ;;  %v1317_v60 = vrot.slane %v7666_v17, 5  ;;  %v6817_v40 = vld [vmem:[%s7108_s24 + $0x50] sm:$0x1]  ;;  %v6822_v17 = vld [vmem:[%s7108_s24 + $0x74] sm:$0x1] }
  0xba   : > { %6158 = vmatprep.mubr.msk.bf16.mxu1 %vm723_vm3, %v5289_v44  ;;  %v5317_v44 = vrot.slane %v1233_v41, 9  ;;  %v5320_v41 = vrot.slane %v1236_v50, 9  ;;  %v1237_v50 = vld [vmem:[%s7108_s24 + $0x60] sm:$0xe]  ;;  %v5643_v20 = vld [vmem:[%s7108_s24 + $0x2c] sm:$0x1] }
  0xbb   : > { %v1319_v12 = vrot.slane %v1317_v60, 4  ;;  %v7811_v45 = vsel %vm7360_vm7, %v5318_v35, %v1317_v60  ;;  %v6818_v35 = vld [vmem:[%s7108_s24 + $0x5c] sm:$0x1] }
  0xbc   : > { %v7794_v2 = vsel %vm7360_vm7, %v5317_v44, %v1310_v10  ;;  %v1334_v55 = vrot.slane %v6818_v35, 5  ;;  %v1238_v35 = vld [vmem:[%s7108_s24 + $0x6c] sm:$0xe] }
  0xbd   : > { %v7815_v59 = vsel %vm7360_vm7, %v1319_v12, %v1320_v15  ;;  %v6819_v15 = vld [vmem:[%s7108_s24 + $0x64] sm:$0xf]  ;;  %v3664_v12 = vrot.slane %v3662_v21, 4  ;;  %v5322_v5 = vrot.slane %v1238_v35, 9 }
  0xbe   : > { %v6769_v21 = vld [vmem:[%s7108_s24 + $0x60] sm:$0xff]  }
  0xc0   : > { %6313 = vmatmul.mubr.msk.bf16.vlgmr.msra.gmra.mrb[0].mxu0 %vm723_vm3, %v6759_v62  ;;  %v6815_v62 = vld [vmem:[%s7108_s24 + $0x4c] sm:$0xf] }
  0xc1   : > { %6159 = vmatmul.mubr.msk.bf16.gmra.mrb[16].mxu1 %vm723_vm3, %v5290_v58  ;;  %6345 = vmatpush3.bf16.msra.mxu0 %v4131_v54  ;;  %v1324_v57 = vrot.slane %v6815_v62, 5  ;;  %v7789_v58 = vsel %vm7360_vm7, %v1305_v25, %v1306_v28  ;;  %v5319_v54 = vrot.slane %v1235_v31, 9  ;;  %v1327_v28 = vrot.slane %v6817_v40, 5 }
  0xc2   : > { %6162 = vmatprep.mubr.msk.bf16.mxu1 %vm723_vm3, %v5291_v61  ;;  %6316 = vmatprep.mubr.msk.bf16.mxu0 %vm723_vm3, %v6761_v11  ;;  %v6765_v61 = vld [vmem:[%s7108_s24 + $0x48] sm:$0xff]   ;;  %v6816_v11 = vld [vmem:[%s7108_s24 + $0x58] sm:$0xf]  ;;  %v1338_v62 = vrot.slane %v6819_v15, 5  ;;  %v5645_v15 = vld [vmem:[%s7108_s24 + $0x34] sm:$0xf] }
  0xc3   : > { %6679 = vmatprep.subr.msk.bf16.mxu0 %vm772_vm0, %v7739_v26  ;;  %v1331_v16 = vrot.slane %v6816_v11, 5  ;;  %v1326_v31 = vrot.slane %v1324_v57, 4  ;;  %v7819_v47 = vsel %vm7360_vm7, %v5319_v54, %v1324_v57  ;;  %v5640_v57 = vld [vmem:[%s7108_s24 + $0x20] sm:$0x1]  ;;  %v5644_v54 = vld [vmem:[%s7108_s24 + $0x30] sm:$0xf] }
  0xc4   : > { %v5321_v11 = vrot.slane %v1237_v50, 9  ;;  %v3700_v50 = vshll.u32 %v5644_v54, 16  ;;  %v3668_v25 = vshll.u32 %v5640_v57, 16  ;;  %v3706_v36 = vshll.u32 %v5645_v15, 16 }
  0xc5   : > { %v7830_v60 = vsel %vm7360_vm7, %v5320_v41, %v1331_v16  ;;  %v7846_v41 = vsel %vm7360_vm7, %v1326_v31, %v1327_v28  ;;  %v1340_v31 = vrot.slane %v1338_v62, 4  ;;  %v3697_v28 = vshrl.u32 %v5644_v54, 16 }
  0xc6   : > { %v7888_v35 = vrot.slane %v3706_v36, 5 }
  0xc8   : > { %6317 = vmatmul.mubr.msk.bf16.gmra.mrb[4].mxu0 %vm723_vm3, %v6763_v37  ;;  %v1333_v37 = vrot.slane %v1331_v16, 4  ;;  %v6820_v16 = vld [vmem:[%s7108_s24 + $0x68] sm:$0x1] }
  0xc9   : > { %6163 = vmatmul.mubr.msk.bf16.gmra.mrb[20].mxu1 %vm723_vm3, %v5292_v6  ;;  %6320 = vmatprep.mubr.msk.bf16.mxu0 %vm723_vm3, %v6765_v61  ;;  %v3654_v6 = vrot.slane %v3652_v8, 5  ;;  %v6767_v61 = vld [vmem:[%s7108_s24 + $0x54] sm:$0xff]   ;;  %v1341_v40 = vrot.slane %v6820_v16, 5  ;;  %v3682_v8 = vshll.u32 %v5642_v39, 16  ;;  %v3665_v16 = vor.u32 %v3664_v12, %v7840_v7 }
  0xca   : > { %6166 = vmatprep.mubr.msk.bf16.mxu1 %vm723_vm3, %v5293_v9  ;;  %v3673_v9 = vshrl.u32 %v5641_v24, 16  ;;  %v7855_v44 = vsel %vm7360_vm7, %v1333_v37, %v1334_v55  ;;  %v1348_v24 = vrot.slane %v6822_v17, 5  ;;  %v3710_v39 = vshrl.u32 %v5645_v15, 16 }
  0xcb   : > { %v3655_v10 = vor.u32 %v3654_v6, %v3651_v43  ;;  %v7861_v37 = vrot.slane %v3682_v8, 5  ;;  %v3688_v55 = vrot.slane %v3686_v18, 4  ;;  %v8994_v43 = vcombine.low %v7465_v52, %v7476_v46  ;;  %v6823_v8 = vld [vmem:[%s7108_s24 + $0x7c] sm:$0xf]  ;;  %v7897_v18 = vld [vmem:[%s7108_s24 + $0x38] sm:$0x1] }
  0xcc   : > { %v3675_v38 = vrot.slane %v3673_v9, 4  ;;  %v7870_v17 = vsel %vm7360_vm7, %v5321_v11, %v1338_v62  ;;  %v7874_v57 = vsel %vm7360_vm7, %v1340_v31, %v1341_v40  ;;  %v3699_v6 = vrot.slane %v3697_v28, 4  ;;  %8996 = vst [vmem:[#allocation13_spill] sm:$0xff] %v7897_v18 }
  0xcd   : > { %v3702_v12 = vrot.slane %v3700_v50, 5  ;;  %v8995_v52 = vcombine.low %v7497_v33, %v7502_v56  ;;  %v3656_v46 = vrot.slane %v3655_v10, 4  ;;  %v3666_v54 = vrot.slane %v3665_v16, 4  ;;  %v6771_v33 = vld [vmem:[%s7108_s24 + $0x6c] sm:$0xff]   ;;  %v1240_v16 = vld [vmem:[%s7108_s24 + $0x84] sm:$0xe] }
  0xce   : > { %v3692_v62 = vshll.u32 %v5643_v20, 16  ;;  %v7882_v11 = vsel %vm7360_vm7, %v5322_v5, %v1345_v30  ;;  %v7886_v40 = vsel %vm7360_vm7, %v1347_v48, %v1348_v24  ;;  %v3712_v9 = vrot.slane %v3710_v39, 4  ;;  %v6772_v48 = vld [vmem:[%s7108_s24 + $0x78] sm:$0xff]  }
  0xcf   : > { %v3679_v10 = vor.u32 %v3678_v27, %v3675_v38  ;;  %v3689_v20 = vor.u32 %v3688_v55, %v7861_v37  ;;  %v1352_v30 = vrot.slane %v6823_v8, 5  ;;  %v3703_v38 = vor.u32 %v3702_v12, %v3699_v6  ;;  %v5647_v5 = vld [vmem:[%s7108_s24 + $0x3c] sm:$0xf] }
  0xd0   : > { %6321 = vmatmul.mubr.msk.bf16.gmra.mrb[8].mxu0 %vm723_vm3, %v6767_v61  ;;  %v3670_v61 = vrot.slane %v3668_v25, 5  ;;  %v1239_v25 = vld [vmem:[%s7108_s24 + $0x78] sm:$0xe]  ;;  %v7913_v50 = vrot.slane %v3692_v62, 5  ;;  %v3713_v39 = vor.u32 %v3712_v9, %v7888_v35  ;;  %v3716_v55 = vshll.u32 %v7897_v18, 16 }
  0xd1   : > { %6167 = vmatmul.mubr.msk.bf16.gmra.mrb[24].mxu1 %vm723_vm3, %v8994_v43  ;;  %6324 = vmatprep.mubr.msk.bf16.mxu0 %vm723_vm3, %v6769_v21  ;;  %v3661_v21 = vsel %vm7134_vm4, %v3656_v46, %v7840_v7  ;;  %v5323_v24 = vrot.slane %v1239_v25, 9  ;;  %v6824_v43 = vld [vmem:[%s7108_s24 + $0x88] sm:$0xf]  ;;  %v7921_v7 = vld [vmem:[%s7108_s24 + $0x40] sm:$0xf]  ;;  %v3680_v12 = vrot.slane %v3679_v10, 4  ;;  %v8998_v62 = vcombine.low %v7517_v14, %v7526_v42 }
  0xd2   : > { %6170 = vmatprep.mubr.msk.bf16.mxu1 %vm723_vm3, %v8995_v52  ;;  %v3671_v31 = vsel %vm7134_vm4, %v3666_v54, %v3670_v61  ;;  %v1359_v6 = vrot.slane %v6824_v43, 5  ;;  %8997 = vst [vmem:[#allocation14_spill] sm:$0xff] %v7921_v7  ;;  %v3690_v52 = vrot.slane %v3689_v20, 4  ;;  %v1354_v46 = vrot.slane %v1352_v30, 4  ;;  %v6825_v54 = vld [vmem:[%s7108_s24 + $0x80] sm:$0x1] }
  0xd3   : > { %v1355_v61 = vrot.slane %v6825_v54, 5  ;;  %v3704_v9 = vrot.slane %v3703_v38, 4  ;;  %v5324_v25 = vrot.slane %v1240_v16, 9  ;;  %v3721_v8 = vshrl.u32 %v5647_v5, 16  ;;  %v6773_v10 = vld [vmem:[%s7108_s24 + $0x84] sm:$0xff]  }
  0xd4   : > { %v3724_v43 = vshll.u32 %v5647_v5, 16  ;;  %v7935_v20 = vcombine.low %v3661_v21, %v3671_v31  ;;  %v7939_v14 = vsel %vm772_vm0, %v7739_v26, 0  ;;  %v3734_v38 = vshrl.u32 %v7921_v7, 16  ;;  %v6774_v21 = vld [vmem:[%s7108_s24 + $0x90] sm:$0xff]   ;;  %v6830_v18 = vld [vmem:[%s7108_s24 + $0xa0] sm:$0xf] }
  0xd5   : > { %v3714_v16 = vrot.slane %v3713_v39, 4  ;;  %v3718_v5 = vrot.slane %v3716_v55, 5  ;;  %v1361_v54 = vrot.slane %v1359_v6, 4  ;;  %v3685_v31 = vsel %vm7134_vm4, %v3680_v12, %v7861_v37 }
  0xd6   : > { %v3695_v26 = vsel %vm7134_vm4, %v3690_v52, %v7913_v50  ;;  %v7954_v39 = vsel %vm7360_vm7, %v5323_v24, %v1352_v30  ;;  %v7958_v55 = vsel %vm7360_vm7, %v1354_v46, %v1355_v61  ;;  %v3709_v37 = vsel %vm7134_vm4, %v3704_v9, %v7888_v35  ;;  %v5653_v30 = vld [vmem:[%s7108_s24 + $0x54] sm:$0xf]  ;;  %v7975_v24 = vld [vmem:[%s7108_s24 + $0x58] sm:$0xf]  ;;  %v7980_v61 = vld [vmem:[%s7108_s24 + $0x90] sm:$0xe] }
  0xd7   : > { %v7971_v12 = vsel %vm7360_vm7, %v5324_v25, %v1359_v6  ;;  %v3723_v50 = vrot.slane %v3721_v8, 4  ;;  %v3726_v52 = vrot.slane %v3724_v43, 5  ;;  %v3736_v46 = vrot.slane %v3734_v38, 4 }
  0xd8   : > { %6325 = vmatmul.mubr.msk.bf16.gmra.mrb[12].mxu0 %vm723_vm3, %v6771_v33  ;;  %v8999_v33 = vcombine.low %v7724_v0, %v7743_v23  ;;  %v6826_v0 = vld [vmem:[%s7108_s24 + $0x8c] sm:$0x1]  ;;  %v3719_v36 = vsel %vm7134_vm4, %v3714_v16, %v3718_v5  ;;  %v3769_v25 = vshrl.u32 %v5653_v30, 16  ;;  %v3772_v8 = vshll.u32 %v5653_v30, 16 }
  0xd9   : > { %6171 = vmatmul.mubr.msk.bf16.gmra.mrb[28].mxu1 %vm723_vm3, %v8998_v62  ;;  %6328 = vmatprep.mubr.msk.bf16.mxu0 %vm723_vm3, %v6772_v48  ;;  %v3730_v48 = vshll.u32 %v7921_v7, 16  ;;  %v1362_v23 = vrot.slane %v6826_v0, 5  ;;  %v5650_v62 = vld [vmem:[%s7108_s24 + $0x48] sm:$0xf]  ;;  %v7964_v0 = vld [vmem:[%s7108_s24 + $0x4c] sm:$0xf]  ;;  %v9001_v38 = vcombine.low %v7728_v29, %v7732_v53  ;;  %v7998_v16 = vcombine.low %v3685_v31, %v3695_v26 }
  0xda   : > { %6176 = vmatprep.mubr.msk.bf16.mxu1 %vm723_vm3, %v8999_v33  ;;  %v7961_v33 = vld [vmem:[%s7108_s24 + $0x44] sm:$0x1]  ;;  %v3745_v27 = vshrl.u32 %v5650_v62, 16  ;;  %v3748_v15 = vshll.u32 %v5650_v62, 16  ;;  %v3754_v6 = vshll.u32 %v7964_v0, 16  ;;  %v3758_v9 = vshrl.u32 %v7964_v0, 16 }
  0xdb   : > { %9000 = vst [vmem:[#allocation15_spill] sm:$0xff] %v7961_v33  ;;  %v7977_v28 = vrot.slane %v3730_v48, 5  ;;  %v7986_v35 = vsel %vm7360_vm7, %v1361_v54, %v1362_v23  ;;  %v3778_v43 = vshll.u32 %v7975_v24, 16  ;;  %v3782_v48 = vshrl.u32 %v7975_v24, 16  ;;  %v5656_v31 = vld [vmem:[%s7108_s24 + $0x60] sm:$0xf] }
  0xdc   : > { %v3740_v5 = vshll.u32 %v7961_v33, 16  ;;  %v5325_v54 = vrot.slane %v7980_v61, 9  ;;  %v9002_v23 = vcombine.low %v7769_v34, %v7785_v4  ;;  %v8009_v29 = vcombine.low %v3709_v37, %v3719_v36  ;;  %v6775_v26 = vld [vmem:[%s7108_s24 + $0x9c] sm:$0xff]   ;;  %v6776_v30 = vld [vmem:[%s7108_s24 + $0xa8] sm:$0xff]   ;;  %v6827_v36 = vld [vmem:[%s8966_s1 + $0x10] sm:$0xf] }
  0xdd   : > { %v3727_v53 = vor.u32 %v3726_v52, %v3723_v50  ;;  %v3747_v62 = vrot.slane %v3745_v27, 4  ;;  %v8020_v34 = vrot.slane %v3754_v6, 5  ;;  %v3760_v4 = vrot.slane %v3758_v9, 4  ;;  %v6828_v6 = vld [vmem:[%s7108_s24 + $0x94] sm:$0xf] }
  0xde   : > { %v3771_v27 = vrot.slane %v3769_v25, 4  ;;  %v3774_v37 = vrot.slane %v3772_v8, 5  ;;  %v8029_v50 = vrot.slane %v3778_v43, 5  ;;  %v3784_v52 = vrot.slane %v3782_v48, 4  ;;  %v8035_v9 = vld [vmem:[%s7108_s24 + $0x64] sm:$0xf] }
  0xdf   : > { %9003 = vst [vmem:[#allocation16_spill] sm:$0xff] %v8035_v9  ;;  %v3793_v61 = vshrl.u32 %v5656_v31, 16  ;;  %v8037_v22 = vrot.slane %v3727_v53, 4  ;;  %v1373_v25 = vrot.slane %v6830_v18, 5  ;;  %v3761_v43 = vor.u32 %v3760_v4, %v8020_v34 }
  0xe0   : > { %6329 = vmatmul.mubr.msk.bf16.gmra.mrb[16].mxu0 %vm723_vm3, %v6773_v10  ;;  %v3796_v10 = vshll.u32 %v5656_v31, 16  ;;  %v3775_v31 = vor.u32 %v3774_v37, %v3771_v27  ;;  %v3785_v53 = vor.u32 %v3784_v52, %v8029_v50  ;;  %v9004_v18 = vcombine.low %v7776_v19, %v7789_v58  ;;  %v6777_v37 = vld [vmem:[%s7108_s24 + $0xb4] sm:$0xff]  }
  0xe1   : > { %6177 = vmatmul.mubr.msk.bf16.vlgmr.msra.gmra.mrb[0].mxu1 %vm723_vm3, %v9001_v38  ;;  %6332 = vmatprep.mubr.msk.bf16.mxu0 %vm723_vm3, %v6774_v21  ;;  %v3750_v21 = vrot.slane %v3748_v15, 5  ;;  %v8018_v38 = vld [vmem:[%s7108_s24 + $0x50] sm:$0x1]  ;;  %v8027_v15 = vld [vmem:[%s7108_s24 + $0x5c] sm:$0x1]  ;;  %v9005_v27 = vcombine.low %v7794_v2, %v7798_v1  ;;  %v1375_v52 = vrot.slane %v1373_v25, 4 }
  0xe2   : > { %6209 = vmatpush3.bf16.msra.mxu1 %v7765_v49  ;;  %6180 = vmatprep.mubr.msk.bf16.mxu1 %vm723_vm3, %v9002_v23  ;;  %v3737_v49 = vor.u32 %v3736_v46, %v7977_v28  ;;  %v8031_v46 = vrot.slane %v3740_v5, 5  ;;  %v1366_v23 = vrot.slane %v6828_v6, 5  ;;  %v3764_v48 = vshll.u32 %v8018_v38, 16  ;;  %v1242_v5 = vld [vmem:[%s7108_s24 + $0x9c] sm:$0xe] }
  0xe3   : > { %6675 = vmatprep.subr.msk.bf16.mxu1 %vm772_vm0, %v6827_v36  ;;  %v6829_v36 = vld [vmem:[%s7108_s24 + $0x98] sm:$0x1]  ;;  %v3751_v7 = vor.u32 %v3750_v21, %v3747_v62  ;;  %v3788_v6 = vshll.u32 %v8027_v15, 16  ;;  %v3806_v62 = vshrl.u32 %v8035_v9, 16  ;;  %v3798_v4 = vrot.slane %v3796_v10, 5 }
  0xe4   : > { %v1369_v33 = vrot.slane %v6829_v36, 5  ;;  %v3738_v8 = vrot.slane %v3737_v49, 4  ;;  %v3802_v36 = vshll.u32 %v8035_v9, 16  ;;  %v8056_v21 = vsel %vm7360_vm7, %v5325_v54, %v1366_v23  ;;  %v8067_v2 = vld [vmem:[%s7108_s24 + $0x68] sm:$0x1] }
  0xe5   : > { %v3795_v49 = vrot.slane %v3793_v61, 4  ;;  %v3752_v19 = vrot.slane %v3751_v7, 4  ;;  %v5326_v58 = vrot.slane %v1242_v5, 9  ;;  %v3762_v3 = vrot.slane %v3761_v43, 4  ;;  %9006 = vst [vmem:[#allocation17_spill] sm:$0xff] %v8067_v2  ;;  %v6778_v5 = vld [vmem:[%s7108_s24 + $0xc0] sm:$0xff]  }
  0xe6   : > { %v3766_v54 = vrot.slane %v3764_v48, 5  ;;  %v3790_v63 = vrot.slane %v3788_v6, 5  ;;  %v1380_v61 = vrot.slane %v7502_v56, 5  ;;  %v3776_v10 = vrot.slane %v3775_v31, 4  ;;  %v1244_v31 = vld [vmem:[%s7108_s24 + $0xb4] sm:$0xe] }
  0xe7   : > { %v3786_v51 = vrot.slane %v3785_v53, 4  ;;  %v8069_v1 = vrot.slane %v3802_v36, 5  ;;  %v3808_v7 = vrot.slane %v3806_v62, 4  ;;  %v3733_v43 = vsel %vm7134_vm4, %v8037_v22, %v7977_v28  ;;  %v6832_v62 = vld [vmem:[%s7108_s24 + $0xb0] sm:$0x1] }
  0xe8   : > { %6333 = vmatmul.mubr.msk.bf16.gmra.mrb[20].mxu0 %vm723_vm3, %v6775_v26  ;;  %v1368_v26 = vrot.slane %v1366_v23, 4  ;;  %v1243_v23 = vld [vmem:[%s7108_s24 + $0xa8] sm:$0xe]  ;;  %v3743_v48 = vsel %vm7134_vm4, %v3738_v8, %v8031_v46  ;;  %v3799_v6 = vor.u32 %v3798_v4, %v3795_v49  ;;  %v3757_v53 = vsel %vm7134_vm4, %v3752_v19, %v8020_v34  ;;  %v5659_v46 = vld [vmem:[%s7108_s24 + $0x6c] sm:$0xf] }
  0xe9   : > { %6181 = vmatmul.mubr.msk.bf16.gmra.mrb[4].mxu1 %vm723_vm3, %v9004_v18  ;;  %6336 = vmatprep.mubr.msk.bf16.mxu0 %vm723_vm3, %v6776_v30  ;;  %v6831_v18 = vld [vmem:[%s7108_s24 + $0xa4] sm:$0x1]  ;;  %v8089_v36 = vsel %vm7360_vm7, %v5326_v58, %v1373_v25  ;;  %v5327_v28 = vrot.slane %v1243_v23, 9  ;;  %v1382_v8 = vrot.slane %v1380_v61, 4  ;;  %v3812_v49 = vshll.u32 %v8067_v2, 16 }
  0xea   : > { %6184 = vmatprep.mubr.msk.bf16.mxu1 %vm723_vm3, %v9005_v27  ;;  %v1376_v30 = vrot.slane %v6831_v18, 5  ;;  %v8081_v56 = vsel %vm7360_vm7, %v1368_v26, %v1369_v33  ;;  %v3767_v33 = vsel %vm7134_vm4, %v3762_v3, %v3766_v54  ;;  %v1383_v26 = vrot.slane %v6832_v62, 5  ;;  %v5662_v18 = vld [vmem:[%s7108_s24 + $0x78] sm:$0xf]  ;;  %v8144_v54 = vld [vmem:[%s7108_s24 + $0xbc] sm:$0x1] }
  0xeb   : > { %v3781_v34 = vsel %vm7134_vm4, %v3776_v10, %v8029_v50  ;;  %v3791_v25 = vsel %vm7134_vm4, %v3786_v51, %v3790_v63  ;;  %v3809_v4 = vor.u32 %v3808_v7, %v8069_v1  ;;  %v5328_v27 = vrot.slane %v1244_v31, 9  ;;  %v8118_v51 = vld [vmem:[%s7108_s24 + $0x70] sm:$0xf]  ;;  %v8148_v10 = vld [vmem:[%s7108_s24 + $0x7c] sm:$0xf] }
  0xec   : > { %v8093_v22 = vsel %vm7360_vm7, %v1375_v52, %v1376_v30  ;;  %v9008_v3 = vcombine.low %v7811_v45, %v7815_v59  ;;  %v8114_v19 = vrot.slane %v3799_v6, 4  ;;  %v1387_v50 = vrot.slane %v7526_v42, 5  ;;  %9009 = vst [vmem:[#allocation19_spill] sm:$0xff] %v8118_v51  ;;  %9011 = vst [vmem:[#allocation20_spill] sm:$0xff] %v8148_v10  ;;  %v5665_v7 = vld [vmem:[%s7108_s24 + $0x84] sm:$0xf] }
  0xed   : > { %9007 = vst [vmem:[#allocation18_spill] sm:$0xff] %v8093_v22  ;;  %v3817_v63 = vshrl.u32 %v5659_v46, 16  ;;  %v9010_v45 = vcombine.low %v7819_v47, %v7846_v41  ;;  %v8126_v58 = vcombine.low %v3757_v53, %v3767_v33  ;;  %v8132_v42 = vsel %vm7360_vm7, %v5327_v28, %v1380_v61  ;;  %v6779_v61 = vld [vmem:[%s7108_s24 + $0xcc] sm:$0xff]   ;;  %v8160_v31 = vld [vmem:[%s7108_s24 + $0x88] sm:$0xf] }
  0xee   : > { %v8135_v30 = vcombine.low %v3781_v34, %v3791_v25  ;;  %v8139_v47 = vsel %vm7360_vm7, %v1382_v8, %v1383_v26  ;;  %v8141_v41 = vrot.slane %v3812_v49, 5  ;;  %v3826_v6 = vshll.u32 %v8118_v51, 16  ;;  %9012 = vst [vmem:[#allocation21_spill] sm:$0xff] %v8160_v31  ;;  %v5668_v62 = vld [vmem:[%s7108_s24 + $0x90] sm:$0xf] }
  0xef   : > { %v8166_v28 = vrot.slane %v1387_v50, 4  ;;  %v8168_v33 = vrot.slane %v3817_v63, 4  ;;  %v3830_v8 = vshrl.u32 %v8118_v51, 16  ;;  %v3841_v26 = vshrl.u32 %v5662_v18, 16  ;;  %v8175_v25 = vld [vmem:[%s7108_s24 + $0x94] sm:$0xf] }
  0xf0   : > { %6337 = vmatmul.mubr.msk.bf16.gmra.mrb[24].mxu0 %vm723_vm3, %v6777_v37  ;;  %v8112_v37 = vcombine.low %v3733_v43, %v3743_v48  ;;  %v8156_v43 = vsel %vm7360_vm7, %v5328_v27, %v1387_v50  ;;  %v3820_v48 = vshll.u32 %v5659_v46, 16  ;;  %v3844_v49 = vshll.u32 %v5662_v18, 16  ;;  %9013 = vst [vmem:[#allocation22_spill] sm:$0xff] %v8175_v25  ;;  %v8213_v2 = vld [vmem:[%s7108_s24 + $0x8c] sm:$0x1] }
  0xf1   : > { %6185 = vmatmul.mubr.msk.bf16.gmra.mrb[8].mxu1 %vm723_vm3, %v9008_v3  ;;  %6340 = vmatprep.mubr.msk.bf16.mxu0 %vm723_vm3, %v6778_v5  ;;  %v8152_v5 = vrot.slane %v3809_v4, 4  ;;  %v3850_v46 = vshll.u32 %v8148_v10, 16  ;;  %v3854_v34 = vshrl.u32 %v8148_v10, 16  ;;  %v3865_v4 = vshrl.u32 %v5665_v7, 16 }
  0xf2   : > { %6188 = vmatprep.mubr.msk.bf16.mxu1 %vm723_vm3, %v9010_v45  ;;  %v3868_v27 = vshll.u32 %v5665_v7, 16  ;;  %v3874_v3 = vshll.u32 %v8160_v31, 16  ;;  %v3878_v50 = vshrl.u32 %v8160_v31, 16  ;;  %v8185_v45 = vld [vmem:[%s7108_s24 + $0x74] sm:$0x1]  ;;  %v3822_v18 = vrot.slane %v3820_v48, 5 }
  0xf3   : > { %v3889_v52 = vshrl.u32 %v5668_v62, 16  ;;  %v3892_v53 = vshll.u32 %v5668_v62, 16  ;;  %v9014_v7 = vcombine.low %v7830_v60, %v7855_v44  ;;  %v3832_v59 = vrot.slane %v3830_v8, 4  ;;  %v5671_v48 = vld [vmem:[%s7108_s24 + $0x9c] sm:$0xf] }
  0xf4   : > { %v3898_v63 = vshll.u32 %v8175_v25, 16  ;;  %v3902_v23 = vshrl.u32 %v8175_v25, 16  ;;  %v9015_v62 = vcombine.low %v7870_v17, %v7874_v57  ;;  %v8203_v44 = vld [vmem:[%s7108_s24 + $0x80] sm:$0x1]  ;;  %v3843_v60 = vrot.slane %v3841_v26, 4 }
  0xf5   : > { %9016 = vst [vmem:[#allocation23_spill] sm:$0xff] %v8203_v44  ;;  %v3867_v31 = vrot.slane %v3865_v4, 4  ;;  %v3870_v8 = vrot.slane %v3868_v27, 5  ;;  %v8207_v10 = vrot.slane %v3874_v3, 5  ;;  %v3880_v51 = vrot.slane %v3878_v50, 4 }
  0xf6   : > { %v8210_v25 = vld [vmem:[%s7108_s24 + $0xa0] sm:$0xf]  ;;  %v3891_v17 = vrot.slane %v3889_v52, 4  ;;  %v3894_v57 = vrot.slane %v3892_v53, 5  ;;  %v3916_v9 = vshll.u32 %v5671_v48, 16  ;;  %v3823_v26 = vor.u32 %v3822_v18, %v8168_v33 }
  0xf7   : > { %v3860_v27 = vshll.u32 %v8203_v44, 16  ;;  %v8222_v3 = vld [vmem:[%s7108_s24 + $0x98] sm:$0x1]  ;;  %v3922_v50 = vshll.u32 %v8210_v25, 16  ;;  %v3926_v52 = vshrl.u32 %v8210_v25, 16  ;;  %v3871_v22 = vor.u32 %v3870_v8, %v3867_v31 }
  0xf8   : > { %6341 = vmatmul.mubr.msk.bf16.gmra.mrb[28].mxu0 %vm723_vm3, %v6779_v61  ;;  %v8193_v61 = vrot.slane %v3826_v6, 5  ;;  %v3856_v6 = vrot.slane %v3854_v34, 4  ;;  %v3904_v34 = vrot.slane %v3902_v23, 4  ;;  %v3884_v33 = vshll.u32 %v8213_v2, 16 }
  0xf9   : > { %6189 = vmatmul.mubr.msk.bf16.gmra.mrb[12].mxu1 %vm723_vm3, %v9014_v7  ;;  %6346 = vmatprep.mubr.msk.bf16.mxu0 %vm723_vm3, %v7935_v20  ;;  %v3846_v7 = vrot.slane %v3844_v49, 5  ;;  %v8205_v20 = vrot.slane %v3850_v46, 5  ;;  %v3836_v49 = vshll.u32 %v8185_v45, 16  ;;  %v8217_v46 = vrot.slane %v3898_v63, 5 }
  0xfa   : > { %6192 = vmatprep.mubr.msk.bf16.mxu1 %vm723_vm3, %v9015_v62  ;;  %v3913_v62 = vshrl.u32 %v5671_v48, 16  ;;  %v3833_v4 = vor.u32 %v3832_v59, %v8193_v61  ;;  %v3881_v23 = vor.u32 %v3880_v51, %v8207_v10  ;;  %v3895_v59 = vor.u32 %v3894_v57, %v3891_v17  ;;  %v8255_v57 = vld [vmem:[%s7108_s24 + $0xa4] sm:$0x1] }
  0xfb   : > { %v3847_v53 = vor.u32 %v3846_v7, %v3843_v60  ;;  %v3857_v48 = vor.u32 %v3856_v6, %v8205_v20  ;;  %v3918_v18 = vrot.slane %v3916_v9, 5  ;;  %v9017_v44 = vcombine.low %v7882_v11, %v7886_v40 }
  0xfc   : > { %v3915_v63 = vrot.slane %v3913_v62, 4  ;;  %v9018_v31 = vrot.slane %v8144_v54, 5  ;;  %v3838_v51 = vrot.slane %v3836_v49, 5  ;;  %v3905_v60 = vor.u32 %v3904_v34, %v8217_v46  ;;  %v8258_v34 = vld [vmem:[%s7108_s24 + $0xac] sm:$0xf] }
  0xfd   : > { %v3908_v9 = vshll.u32 %v8222_v3, 16  ;;  %v9019_v11 = vcombine.low %v7954_v39, %v7958_v55  ;;  %v3824_v40 = vrot.slane %v3823_v26, 4  ;;  %v8251_v54 = vrot.slane %v3922_v50, 5 }
  0xfe   : > { %v3848_v7 = vrot.slane %v3847_v53, 4  ;;  %v3858_v6 = vrot.slane %v3857_v48, 4  ;;  %v3862_v8 = vrot.slane %v3860_v27, 5  ;;  %v3886_v17 = vrot.slane %v3884_v33, 5  ;;  %v8268_v48 = vld [vmem:[%s7108_s24 + $0xb0] sm:$0x1] }
  0xff   : > { %v3872_v39 = vrot.slane %v3871_v22, 4  ;;  %v3882_v55 = vrot.slane %v3881_v23, 4  ;;  %v3896_v62 = vrot.slane %v3895_v59, 4  ;;  %v3919_v49 = vor.u32 %v3918_v18, %v3915_v63 }
 0x100   : > { %6347 = vmatmul.mubr.msk.bf16.vlgmr.msra.gmra.mrb[0].mxu0 %vm723_vm3, %v7998_v16  ;;  %v8241_v16 = vsel %vm7360_vm7, %v8166_v28, %v9018_v31  ;;  %v3928_v28 = vrot.slane %v3926_v52, 4  ;;  %v3910_v26 = vrot.slane %v3908_v9, 5  ;;  %v3829_v52 = vsel %vm7134_vm4, %v3824_v40, %v8193_v61 }
 0x101   : > { %6193 = vmatmul.mubr.msk.bf16.gmra.mrb[16].mxu1 %vm723_vm3, %v9017_v44  ;;  %6379 = vmatpush3.bf16.msra.mxu0 %v7939_v14  ;;  %v3834_v14 = vrot.slane %v3833_v4, 4  ;;  %v5674_v44 = vld [vmem:[%s7108_s24 + $0xa8] sm:$0xf]  ;;  %v3932_v22 = vshll.u32 %v8255_v57, 16  ;;  %v3853_v33 = vsel %vm7134_vm4, %v3848_v7, %v8205_v20  ;;  %v3863_v23 = vsel %vm7134_vm4, %v3858_v6, %v3862_v8 }
 0x102   : > { %6196 = vmatprep.mubr.msk.bf16.mxu1 %vm723_vm3, %v9019_v11  ;;  %6350 = vmatprep.mubr.msk.bf16.mxu0 %vm723_vm3, %v8009_v29  ;;  %v3906_v29 = vrot.slane %v3905_v60, 4  ;;  %v3937_v4 = vshrl.u32 %v5674_v44, 16  ;;  %v3940_v50 = vshll.u32 %v5674_v44, 16  ;;  %v3929_v53 = vor.u32 %v3928_v28, %v8251_v54  ;;  %v5723_v11 = vld [vmem:[%s7108_s24 + $0x48] sm:$0xe] }
 0x103   : > { %v3839_v27 = vsel %vm7134_vm4, %v3834_v14, %v3838_v51  ;;  %v3946_v59 = vshll.u32 %v8258_v34, 16  ;;  %v3950_v61 = vshrl.u32 %v8258_v34, 16  ;;  %v3877_v63 = vsel %vm7134_vm4, %v3872_v39, %v8207_v10  ;;  %v8333_v39 = vld [vmem:[%s7108_s24 + $0xb8] sm:$0xf] }
 0x104   : > { %v3887_v18 = vsel %vm7134_vm4, %v3882_v55, %v3886_v17  ;;  %v3901_v20 = vsel %vm7134_vm4, %v3896_v62, %v8217_v46  ;;  %v3920_v31 = vrot.slane %v3919_v49, 4  ;;  %v9020_v51 = vcombine.low %v7971_v12, %v7986_v35 }
 0x105   : > { %v3939_v10 = vrot.slane %v3937_v4, 4  ;;  %v3942_v60 = vrot.slane %v3940_v50, 5  ;;  %v3956_v9 = vshll.u32 %v8268_v48, 16  ;;  %v9021_v46 = vcombine.low %v8056_v21, %v8081_v56  ;;  %v5677_v21 = vld [vmem:[%s7108_s24 + $0xb4] sm:$0xf] }
 0x106   : > { %v5344_v12 = vcombine.low %v8132_v42, %v8139_v47  ;;  %v9022_v35 = vsel %vm7134_vm4, %v8152_v5, %v8141_v41  ;;  %v3930_v14 = vrot.slane %v3929_v53, 4  ;;  %v3934_v28 = vrot.slane %v3932_v22, 5  ;;  %v5725_v4 = vld [vmem:[%s7108_s24 + $0x60] sm:$0xe]  ;;  %v5726_v53 = vld [vmem:[%s7108_s24 + $0x6c] sm:$0xe] }
 0x107   : > { %v5345_v56 = vcombine.low %v8156_v43, %v8241_v16  ;;  %v8316_v44 = vcombine.low %v3829_v52, %v3839_v27  ;;  %v8318_v42 = vrot.slane %v3946_v59, 5  ;;  %v3952_v47 = vrot.slane %v3950_v61, 4  ;;  %v9031_v16 = vld [vmem:[#allocation11_spill] sm:$0xff] }
 0x108   : > { %6351 = vmatmul.mubr.msk.bf16.gmra.mrb[4].mxu0 %vm723_vm3, %v8112_v37  ;;  %v3911_v37 = vsel %vm7134_vm4, %v3906_v29, %v3910_v26  ;;  %v8320_v41 = vcombine.low %v3853_v33, %v3863_v23  ;;  %v8322_v5 = vcombine.low %v3877_v63, %v3887_v18  ;;  %v3925_v6 = vsel %vm7134_vm4, %v3920_v31, %v8251_v54  ;;  %v9024_v23 = vld [vmem:[#allocation18_spill] sm:$0xff]  ;;  %v5680_v63 = vld [vmem:[%s7108_s24 + $0xc0] sm:$0xf]  ;;  %v9026_v18 = vld [vmem:[#allocation16_spill] sm:$0xff] }
 0x109   : > { %6197 = vmatmul.mubr.msk.bf16.gmra.mrb[20].mxu1 %vm723_vm3, %v9020_v51  ;;  %6354 = vmatprep.mubr.msk.bf16.mxu0 %vm723_vm3, %v8126_v58  ;;  %v9023_v58 = vsel %vm7134_vm4, %v8114_v19, %v8069_v1  ;;  %v8324_v7 = vcombine.low %v3901_v20, %v3911_v37  ;;  %v5739_v1 = vrot.slane %v5723_v11, 9  ;;  %v5724_v19 = vld [vmem:[%s7108_s24 + $0x54] sm:$0xe]  ;;  %v3943_v8 = vor.u32 %v3942_v60, %v3939_v10  ;;  %v9027_v31 = vld [vmem:[#allocation17_spill] sm:$0xff] }
 0x10a   : > { %6200 = vmatprep.mubr.msk.bf16.mxu1 %vm723_vm3, %v9021_v46  ;;  %v5693_v40 = vcombine.low %v9023_v58, %v9022_v35  ;;  %v8330_v17 = vrot.slane %v3956_v9, 5  ;;  %v3961_v55 = vshrl.u32 %v5677_v21, 16  ;;  %v3935_v62 = vsel %vm7134_vm4, %v3930_v14, %v3934_v28  ;;  %v9028_v9 = vld [vmem:[#allocation19_spill] sm:$0xff]  ;;  %v8382_v35 = vld [vmem:[%s7108_s24 + $0xbc] sm:$0x1] }
 0x10b   : > { %v3964_v49 = vshll.u32 %v5677_v21, 16  ;;  %v4420_v29 = vrot.slane %v7964_v0, 5  ;;  %v4423_v26 = vrot.slane %v8018_v38, 5  ;;  %v3953_v50 = vor.u32 %v3952_v47, %v8318_v42  ;;  %v8385_v58 = vld [vmem:[%s7108_s24 + $0xc4] sm:$0xf] }
 0x10c   : > { %v5740_v52 = vrot.slane %v5724_v19, 9  ;;  %v4427_v54 = vrot.slane %v7975_v24, 5  ;;  %v4430_v27 = vrot.slane %v8027_v15, 5  ;;  %v3970_v22 = vshll.u32 %v8333_v39, 16  ;;  %v5727_v19 = vld [vmem:[%s7108_s24 + $0x78] sm:$0xe] }
 0x10d   : > { %v3974_v33 = vshrl.u32 %v8333_v39, 16  ;;  %v8350_v0 = vsel %vm7360_vm7, %v5739_v1, %v4420_v29  ;;  %v4422_v38 = vrot.slane %v4420_v29, 4  ;;  %v9025_v59 = vcombine.low %v8089_v36, %v9024_v23  ;;  %v9029_v23 = vld [vmem:[#allocation20_spill] sm:$0xff] }
 0x10e   : > { %v8357_v24 = vcombine.low %v3925_v6, %v3935_v62  ;;  %v8361_v15 = vsel %vm7360_vm7, %v5740_v52, %v4427_v54  ;;  %v5741_v61 = vrot.slane %v5725_v4, 9  ;;  %v4434_v20 = vrot.slane %v9026_v18, 5  ;;  %v6780_v6 = vld [vmem:[%s7108_s24 + $0xc] sm:$0xff]  }
 0x10f   : > { %v8367_v36 = vsel %vm7360_vm7, %v4422_v38, %v4423_v26  ;;  %v4437_v51 = vrot.slane %v9027_v31, 5  ;;  %v5742_v37 = vrot.slane %v5726_v53, 9  ;;  %v4441_v11 = vrot.slane %v9028_v9, 5 }
 0x110   : > { %6355 = vmatmul.mubr.msk.bf16.gmra.mrb[8].mxu0 %vm723_vm3, %v8135_v30  ;;  %v4429_v30 = vrot.slane %v4427_v54, 4  ;;  %v5756_v10 = vcombine.low %v8350_v0, %v8367_v36  ;;  %v4444_v46 = vrot.slane %v8185_v45, 5  ;;  %v8391_v14 = vsel %vm7360_vm7, %v5741_v61, %v4434_v20 }
 0x111   : > { %6201 = vmatmul.mubr.msk.bf16.gmra.mrb[24].mxu1 %vm723_vm3, %v9025_v59  ;;  %6358 = vmatprep.mubr.msk.bf16.mxu0 %vm723_vm3, %v5693_v40  ;;  %v4436_v28 = vrot.slane %v4434_v20, 4  ;;  %v8393_v21 = vrot.slane %v3961_v55, 4  ;;  %v3985_v47 = vshrl.u32 %v5680_v63, 16  ;;  %v8397_v45 = vsel %vm7360_vm7, %v5742_v37, %v4441_v11  ;;  %v5454_v55 = vld [vmem:[%s7108_s24 + $0x78] sm:$0xf]  ;;  %v9030_v59 = vld [vmem:[#allocation23_spill] sm:$0xff] }
 0x112   : > { %6204 = vmatprep.mubr.msk.bf16.mxu1 %vm723_vm3, %v5344_v12  ;;  %v8375_v60 = vsel %vm7360_vm7, %v4429_v30, %v4430_v27  ;;  %v8379_v12 = vrot.slane %v3943_v8, 4  ;;  %v4443_v1 = vrot.slane %v4441_v11, 4  ;;  %v8401_v8 = vrot.slane %v3953_v50, 4 }
 0x113   : > { %v5757_v40 = vcombine.low %v8361_v15, %v8375_v60  ;;  %v8403_v62 = vrot.slane %v3964_v49, 5  ;;  %v3988_v29 = vshll.u32 %v5680_v63, 16  ;;  %v8407_v26 = vsel %vm7360_vm7, %v4436_v28, %v4437_v51  ;;  %v9033_v28 = vld [vmem:[#allocation21_spill] sm:$0xff] }
 0x114   : > { %v8410_v4 = vrot.slane %v3970_v22, 5  ;;  %v8412_v52 = vrot.slane %v3974_v33, 4  ;;  %v5758_v54 = vcombine.low %v8391_v14, %v8407_v26  ;;  %v8418_v27 = vsel %vm7360_vm7, %v4443_v1, %v4444_v46  ;;  %v5728_v33 = vld [vmem:[%s7108_s24 + $0x84] sm:$0xe]  ;;  %v6781_v1 = vld [vmem:[%s7108_s24 + $0x18] sm:$0xff]  }
 0x115   : > { %v3980_v49 = vshll.u32 %v8382_v35, 16  ;;  %v3994_v50 = vshll.u32 %v8385_v58, 16  ;;  %v5759_v53 = vcombine.low %v8397_v45, %v8418_v27  ;;  %v5743_v22 = vrot.slane %v5727_v19, 9  ;;  %v6843_v60 = vld [vmem:[%s7108_s24 + $0xa0] sm:$0xf] }
 0x116   : > { %v3987_v38 = vrot.slane %v3985_v47, 4  ;;  %v4451_v30 = vrot.slane %v9030_v59, 5  ;;  %v2310_v61 = vshrl.u32 %v5454_v55, 16  ;;  %v3990_v63 = vrot.slane %v3988_v29, 5  ;;  %v5683_v29 = vld [vmem:[%s7108_s24 + $0xcc] sm:$0xf] }
 0x117   : > { %v3998_v18 = vshrl.u32 %v8385_v58, 16  ;;  %v2313_v43 = vshll.u32 %v5454_v55, 16  ;;  %v5744_v37 = vrot.slane %v5728_v33, 9  ;;  %v3949_v9 = vsel %vm7134_vm4, %v8379_v12, %v8318_v42  ;;  %v8461_v55 = vld [vmem:[%s7108_s24 + $0xd0] sm:$0xf] }
 0x118   : > { %6359 = vmatmul.mubr.msk.bf16.gmra.mrb[12].mxu0 %vm723_vm3, %v8316_v44  ;;  %v4448_v44 = vrot.slane %v9029_v23, 5  ;;  %v2312_v51 = vrot.slane %v2310_v61, 4  ;;  %v3967_v11 = vor.u32 %v8403_v62, %v8393_v21  ;;  %v4455_v47 = vrot.slane %v9033_v28, 5  ;;  %v6782_v21 = vld [vmem:[%s7108_s24 + $0x24] sm:$0xff]   ;;  %v6847_v27 = vld [vmem:[%s7108_s24 + $0xac] sm:$0xf] }
 0x119   : > { %6205 = vmatmul.mubr.msk.bf16.gmra.mrb[28].mxu1 %vm723_vm3, %v5345_v56  ;;  %6362 = vmatprep.mubr.msk.bf16.mxu0 %vm723_vm3, %v8320_v41  ;;  %v9032_v56 = vld [vmem:[#allocation12_spill] sm:$0xff]  ;;  %v2315_v46 = vrot.slane %v2313_v43, 5  ;;  %v3959_v19 = vsel %vm7134_vm4, %v8401_v8, %v8330_v17  ;;  %v4458_v12 = vrot.slane %v8213_v2, 5  ;;  %v8469_v62 = vrot.slane %v3994_v50, 5  ;;  %v5729_v8 = vld [vmem:[%s7108_s24 + $0x90] sm:$0xe] }
 0x11a   : > { %6210 = vmatprep.mubr.msk.bf16.mxu1 %vm723_vm3, %v6780_v6  ;;  %v2332_v41 = vsel %vm7134_vm4, %v9032_v56, %v9031_v16  ;;  %v8443_v20 = vsel %vm7360_vm7, %v5743_v22, %v4448_v44  ;;  %v4450_v31 = vrot.slane %v4448_v44, 4  ;;  %v3977_v6 = vor.u32 %v8412_v52, %v8410_v4  ;;  %v8475_v52 = vld [vmem:[%s7108_s24 + $0xc8] sm:$0x1]  ;;  %v9035_v16 = vld [vmem:[#allocation9_spill] sm:$0xff] }
 0x11b   : > { %v4000_v22 = vrot.slane %v3998_v18, 4  ;;  %v2316_v17 = vor.u32 %v2315_v46, %v2312_v51  ;;  %v3982_v23 = vrot.slane %v3980_v49, 5  ;;  %v3991_v44 = vor.u32 %v3990_v63, %v3987_v38  ;;  %v9036_v51 = vld [vmem:[#allocation10_spill] sm:$0xff] }
 0x11c   : > { %v8465_v42 = vsel %vm7360_vm7, %v4450_v31, %v4451_v30  ;;  %v8479_v59 = vsel %vm7360_vm7, %v5744_v37, %v4455_v47  ;;  %v4457_v30 = vrot.slane %v4455_v47, 4  ;;  %v4009_v2 = vshrl.u32 %v5683_v29, 16 }
 0x11d   : > { %v5760_v33 = vcombine.low %v8443_v20, %v8465_v42  ;;  %v4012_v50 = vshll.u32 %v5683_v29, 16  ;;  %v4018_v61 = vshll.u32 %v8461_v55, 16  ;;  %v2317_v18 = vrot.slane %v2316_v17, 4  ;;  %v6783_v29 = vld [vmem:[%s7108_s24 + $0x30] sm:$0xff]  }
 0x11e   : > { %v4022_v49 = vshrl.u32 %v8461_v55, 16  ;;  %v8490_v38 = vsel %vm7360_vm7, %v4457_v30, %v4458_v12  ;;  %v5745_v63 = vrot.slane %v5729_v8, 9  ;;  %v4001_v56 = vor.u32 %v4000_v22, %v8469_v62 }
 0x11f   : > { %v4004_v31 = vshll.u32 %v8475_v52, 16  ;;  %v5761_v37 = vcombine.low %v8479_v59, %v8490_v38  ;;  %v5699_v46 = vcombine.low %v3949_v9, %v3959_v19  ;;  %v3968_v28 = vrot.slane %v3967_v11, 4  ;;  %v5730_v11 = vld [vmem:[%s7108_s24 + $0x9c] sm:$0xe] }
 0x120   : > { %6363 = vmatmul.mubr.msk.bf16.gmra.mrb[16].mxu0 %vm723_vm3, %v8322_v5  ;;  %v9034_v5 = vld [vmem:[#allocation22_spill] sm:$0xff]  ;;  %v3978_v47 = vrot.slane %v3977_v6, 4  ;;  %v3992_v12 = vrot.slane %v3991_v44, 4  ;;  %v4465_v8 = vrot.slane %v8222_v3, 5  ;;  %v4011_v30 = vrot.slane %v4009_v2, 4  ;;  %v6784_v19 = vld [vmem:[%s7108_s24 + $0x3c] sm:$0xff]  }
 0x121   : > { %6211 = vmatmul.mubr.msk.bf16.vlgmr.msra.gmra.mrb[0].mxu1 %vm723_vm3, %v6781_v1  ;;  %6366 = vmatprep.mubr.msk.bf16.mxu0 %vm723_vm3, %v8324_v7  ;;  %v4462_v43 = vrot.slane %v9034_v5, 5  ;;  %v2322_v7 = vsel %vm7134_vm4, %v2317_v18, %v9036_v51  ;;  %v4014_v18 = vrot.slane %v4012_v50, 5  ;;  %v8513_v5 = vrot.slane %v4018_v61, 5 }
 0x122   : > { %6413 = vmatpush3.bf16.msra.mxu1 %v9035_v16  ;;  %6214 = vmatprep.mubr.msk.bf16.mxu1 %vm723_vm3, %v6782_v21  ;;  %v8502_v1 = vcombine.low %v2322_v7, %v2332_v41  ;;  %v8506_v21 = vld [vmem:[%s7108_s24 + $0xd4] sm:$0x1]  ;;  %v4024_v9 = vrot.slane %v4022_v49, 4  ;;  %v4002_v41 = vrot.slane %v4001_v56, 4  ;;  %v4006_v6 = vrot.slane %v4004_v31, 5 }
 0x123   : > { %v8510_v22 = vsel %vm7360_vm7, %v5745_v63, %v4462_v43  ;;  %v4464_v17 = vrot.slane %v4462_v43, 4  ;;  %v3973_v63 = vsel %vm7134_vm4, %v3968_v28, %v8410_v4  ;;  %v3983_v2 = vsel %vm7134_vm4, %v3978_v47, %v3982_v23  ;;  %v6834_v16 = vld [vmem:[%s7108_s24 + $0x1c] sm:$0xf]  ;;  %v5731_v28 = vld [vmem:[%s7108_s24 + $0xa8] sm:$0xe] }
 0x124   : > { %v4028_v50 = vshll.u32 %v8506_v21, 16  ;;  %v5746_v61 = vrot.slane %v5730_v11, 9  ;;  %v4469_v49 = vrot.slane %v8210_v25, 5  ;;  %v3997_v4 = vsel %vm7134_vm4, %v3992_v12, %v8469_v62  ;;  %v5719_v62 = vld [vmem:[%s7108_s24 + $0x18] sm:$0xe]  ;;  %v6785_v47 = vld [vmem:[%s7108_s24 + $0x48] sm:$0xff]  }
 0x125   : > { %v8519_v44 = vsel %vm7360_vm7, %v4464_v17, %v4465_v8  ;;  %v4025_v43 = vor.u32 %v4024_v9, %v8513_v5  ;;  %v4472_v23 = vrot.slane %v8255_v57, 5  ;;  %v4007_v25 = vsel %vm7134_vm4, %v4002_v41, %v4006_v6  ;;  %v6835_v11 = vld [vmem:[%s7108_s24 + $0x20] sm:$0x1] }
 0x126   : > { %v5762_v3 = vcombine.low %v8510_v22, %v8519_v44  ;;  %v4392_v56 = vrot.slane %v6834_v16, 5  ;;  %v8545_v31 = vsel %vm7360_vm7, %v5746_v61, %v4469_v49  ;;  %v4471_v51 = vrot.slane %v4469_v49, 4  ;;  %v5732_v49 = vld [vmem:[%s7108_s24 + $0xb4] sm:$0xe] }
 0x127   : > { %v5700_v7 = vcombine.low %v3973_v63, %v3983_v2  ;;  %v4026_v17 = vrot.slane %v4025_v43, 4  ;;  %v5747_v41 = vrot.slane %v5731_v28, 9  ;;  %v4476_v6 = vrot.slane %v8258_v34, 5  ;;  %v5720_v2 = vld [vmem:[%s7108_s24 + $0x24] sm:$0xe] }
 0x128   : > { %6367 = vmatmul.mubr.msk.bf16.gmra.mrb[20].mxu0 %vm723_vm3, %v8357_v24  ;;  %v4015_v24 = vor.u32 %v4014_v18, %v4011_v30  ;;  %v8550_v57 = vsel %vm7360_vm7, %v4471_v51, %v4472_v23  ;;  %v6786_v30 = vld [vmem:[%s7108_s24 + $0x54] sm:$0xff]   ;;  %v5735_v18 = vrot.slane %v5719_v62, 9  ;;  %v4394_v9 = vrot.slane %v4392_v56, 4  ;;  %v6838_v28 = vld [vmem:[%s7108_s24 + $0x2c] sm:$0x1] }
 0x129   : > { %6215 = vmatmul.mubr.msk.bf16.gmra.mrb[4].mxu1 %vm723_vm3, %v6783_v29  ;;  %6370 = vmatprep.mubr.msk.bf16.mxu0 %vm723_vm3, %v5699_v46  ;;  %v4030_v46 = vrot.slane %v4028_v50, 5  ;;  %v5701_v29 = vcombine.low %v3997_v4, %v4007_v25  ;;  %v5763_v8 = vcombine.low %v8545_v31, %v8550_v57  ;;  %v4479_v63 = vrot.slane %v8268_v48, 5  ;;  %v6836_v50 = vld [vmem:[%s7108_s24 + $0x28] sm:$0xf]  ;;  %v5721_v25 = vld [vmem:[%s7108_s24 + $0x30] sm:$0xe] }
 0x12a   : > { %6218 = vmatprep.mubr.msk.bf16.mxu1 %vm723_vm3, %v6784_v19  ;;  %v4016_v12 = vrot.slane %v4015_v24, 4  ;;  %v4395_v19 = vrot.slane %v6835_v11, 5  ;;  %v4399_v61 = vrot.slane %v6836_v50, 5  ;;  %v8573_v48 = vsel %vm7360_vm7, %v5747_v41, %v4476_v6  ;;  %v6788_v11 = vld [vmem:[%s7108_s24 + $0x6c] sm:$0xff]   ;;  %v9037_v41 = vld [vmem:[#allocation13_spill] sm:$0xff] }
 0x12b   : > { %v4031_v34 = vsel %vm7134_vm4, %v4026_v17, %v4030_v46  ;;  %v4478_v24 = vrot.slane %v4476_v6, 4  ;;  %v4393_v43 = vsel %vm7360_vm7, %v5735_v18, %v4392_v56  ;;  %v5736_v51 = vrot.slane %v5720_v2, 9  ;;  %v5733_v50 = vld [vmem:[%s7108_s24 + $0xc0] sm:$0xe]  ;;  %v6852_v31 = vld [vmem:[%s7108_s24 + $0xc8] sm:$0x1] }
 0x12c   : > { %v4021_v4 = vsel %vm7134_vm4, %v4016_v12, %v8513_v5  ;;  %v4396_v23 = vsel %vm7360_vm7, %v4394_v9, %v4395_v19  ;;  %v6837_v5 = vld [vmem:[%s7108_s24 + $0x34] sm:$0xf]  ;;  %v6787_v12 = vld [vmem:[%s7108_s24 + $0x60] sm:$0xff]   ;;  %v5737_v18 = vrot.slane %v5721_v25, 9  ;;  %v4486_v9 = vrot.slane %v8382_v35, 5 }
 0x12d   : > { %v4406_v16 = vrot.slane %v6837_v5, 5  ;;  %v8584_v62 = vsel %vm7360_vm7, %v4478_v24, %v4479_v63  ;;  %v5702_v46 = vcombine.low %v4021_v4, %v4031_v34  ;;  %v5752_v17 = vcombine.low %v4393_v43, %v4396_v23  ;;  %v5722_v24 = vld [vmem:[%s7108_s24 + $0x3c] sm:$0xe] }
 0x12e   : > { %v5764_v56 = vcombine.low %v8573_v48, %v8584_v62  ;;  %v4409_v6 = vrot.slane %v9037_v41, 5  ;;  %v4400_v35 = vsel %vm7360_vm7, %v5736_v51, %v4399_v61  ;;  %v5749_v5 = vrot.slane %v5733_v50, 9 }
 0x12f   : > { %v4408_v19 = vrot.slane %v4406_v16, 4  ;;  %v4407_v23 = vsel %vm7360_vm7, %v5737_v18, %v4406_v16  ;;  %v4493_v51 = vrot.slane %v8475_v52, 5  ;;  %v2473_v57 = vshll.u32 %v6852_v31, 16 }
 0x130   : > { %6371 = vmatmul.mubr.msk.bf16.gmra.mrb[24].mxu0 %vm723_vm3, %v5700_v7  ;;  %v5748_v7 = vrot.slane %v5732_v49, 9 }
 0x131   : > { %6219 = vmatmul.mubr.msk.bf16.gmra.mrb[8].mxu1 %vm723_vm3, %v6785_v47  ;;  %6374 = vmatprep.mubr.msk.bf16.mxu0 %vm723_vm3, %v5701_v29  ;;  %v4402_v47 = vrot.slane %v6838_v28, 5  ;;  %v4483_v29 = vrot.slane %v8333_v39, 5  ;;  %v9038_v39 = vld [vmem:[#allocation14_spill] sm:$0xff]  ;;  %v4410_v25 = vsel %vm7360_vm7, %v4408_v19, %v4409_v6  ;;  %v5738_v28 = vrot.slane %v5722_v24, 9 }
 0x132   : > { %6222 = vmatprep.mubr.msk.bf16.mxu1 %vm723_vm3, %v6786_v30  ;;  %v4401_v30 = vrot.slane %v4399_v61, 4  ;;  %v4413_v49 = vrot.slane %v9038_v39, 5  ;;  %v4490_v61 = vrot.slane %v8385_v58, 5  ;;  %v6839_v39 = vld [vmem:[%s7108_s24 + $0x70] sm:$0xf]  ;;  %v4497_v24 = vrot.slane %v8461_v55, 5 }
 0x133   : > { %v8596_v63 = vsel %vm7360_vm7, %v5748_v7, %v4483_v29  ;;  %v4485_v2 = vrot.slane %v4483_v29, 4  ;;  %v5451_v7 = vld [vmem:[%s7108_s24 + $0x6c] sm:$0xf]  ;;  %v9039_v29 = vld [vmem:[#allocation15_spill] sm:$0xff] }
 0x134   : > { %v4403_v34 = vsel %vm7360_vm7, %v4401_v30, %v4402_v47  ;;  %v4415_v47 = vrot.slane %v4413_v49, 4  ;;  %v6789_v30 = vld [vmem:[%s7108_s24 + $0x78] sm:$0xff]   ;;  %v8627_v16 = vsel %vm7360_vm7, %v5749_v5, %v4490_v61  ;;  %v4492_v18 = vrot.slane %v4490_v61, 4 }
 0x135   : > { %v8603_v4 = vsel %vm7360_vm7, %v4485_v2, %v4486_v9  ;;  %v5754_v9 = vcombine.low %v4407_v23, %v4410_v25  ;;  %v2286_v19 = vshrl.u32 %v5451_v7, 16  ;;  %v2289_v41 = vshll.u32 %v5451_v7, 16 }
 0x136   : > { %v5765_v43 = vcombine.low %v8596_v63, %v8603_v4  ;;  %v8632_v58 = vsel %vm7360_vm7, %v4492_v18, %v4493_v51  ;;  %v4414_v6 = vsel %vm7360_vm7, %v5738_v28, %v4413_v49  ;;  %v4500_v49 = vrot.slane %v8506_v21, 5  ;;  %v6791_v51 = vld [vmem:[%s7108_s24 + $0x90] sm:$0xff]   ;;  %v6792_v21 = vld [vmem:[%s7108_s24 + $0x9c] sm:$0xff]  }
 0x137   : > { %v5766_v50 = vcombine.low %v8627_v16, %v8632_v58  ;;  %v2288_v23 = vrot.slane %v2286_v19, 4  ;;  %v2291_v25 = vrot.slane %v2289_v41, 5  ;;  %v4499_v7 = vrot.slane %v4497_v24, 4 }
 0x138   : > { %6375 = vmatmul.mubr.msk.bf16.gmra.mrb[28].mxu0 %vm723_vm3, %v5702_v46  ;;  %v5753_v46 = vcombine.low %v4400_v35, %v4403_v34  ;;  %v2295_v35 = vshll.u32 %v6839_v39, 16  ;;  %v2299_v34 = vshrl.u32 %v6839_v39, 16 }
 0x139   : > { %6223 = vmatmul.mubr.msk.bf16.gmra.mrb[12].mxu1 %vm723_vm3, %v6787_v12  ;;  %6380 = vmatprep.mubr.msk.bf16.mxu0 %vm723_vm3, %v5752_v17  ;;  %v4416_v12 = vrot.slane %v9039_v29, 5  ;;  %v5734_v17 = vld [vmem:[%s7108_s24 + $0xcc] sm:$0xe]  ;;  %v8654_v55 = vsel %vm7360_vm7, %v4499_v7, %v4500_v49 }
 0x13a   : > { %6226 = vmatprep.mubr.msk.bf16.mxu1 %vm723_vm3, %v6788_v11  ;;  %v6790_v11 = vld [vmem:[%s7108_s24 + $0x84] sm:$0xff]   ;;  %v5750_v52 = vrot.slane %v5734_v17, 9  ;;  %v2301_v28 = vrot.slane %v2299_v34, 4  ;;  %v6840_v17 = vld [vmem:[%s7108_s24 + $0x74] sm:$0x1] }
 0x13b   : > { %v4417_v2 = vsel %vm7360_vm7, %v4415_v47, %v4416_v12  ;;  %v5457_v47 = vld [vmem:[%s7108_s24 + $0x84] sm:$0xf]  ;;  %v2292_v12 = vor.u32 %v2291_v25, %v2288_v23  ;;  %v6794_v34 = vld [vmem:[%s7108_s24 + $0xb4] sm:$0xff]  }
 0x13c   : > { %v8649_v5 = vsel %vm7360_vm7, %v5750_v52, %v4497_v24  ;;  %v5755_v61 = vcombine.low %v4414_v6, %v4417_v2  ;;  %v2337_v18 = vshll.u32 %v5457_v47, 16  ;;  %v5460_v6 = vld [vmem:[%s7108_s24 + $0x90] sm:$0xf]  ;;  %v6793_v2 = vld [vmem:[%s7108_s24 + $0xa8] sm:$0xff]  }
 0x13d   : > { %v5767_v29 = vcombine.low %v8649_v5, %v8654_v55  ;;  %v2293_v52 = vrot.slane %v2292_v12, 4  ;;  %v2358_v23 = vshrl.u32 %v5460_v6, 16  ;;  %v2361_v25 = vshll.u32 %v5460_v6, 16 }
 0x13e   : > { %v2391_v12 = vshll.u32 %v6843_v60, 16 }
 0x13f   : > { %v2363_v14 = vrot.slane %v2361_v25, 5  ;;  %v6846_v25 = vld [vmem:[%s7108_s24 + $0xa4] sm:$0x1] }
 0x140   : > { %6381 = vmatmul.mubr.msk.bf16.vlgmr.msra.gmra.mrb[0].mxu0 %vm723_vm3, %v5753_v46  ;;  %v2297_v46 = vrot.slane %v2295_v35, 5  ;;  %v5463_v35 = vld [vmem:[%s7108_s24 + $0x9c] sm:$0xf]  ;;  %v8696_v6 = vrot.slane %v2391_v12, 5 }
 0x141   : > { %6227 = vmatmul.mubr.msk.bf16.gmra.mrb[16].mxu1 %vm723_vm3, %v6789_v30  ;;  %6384 = vmatprep.mubr.msk.bf16.mxu0 %vm723_vm3, %v5754_v9  ;;  %v2305_v30 = vshll.u32 %v6840_v17, 16  ;;  %v2334_v9 = vshrl.u32 %v5457_v47, 16  ;;  %v2385_v47 = vshll.u32 %v5463_v35, 16  ;;  %v6844_v17 = vld [vmem:[%s7108_s24 + $0x8c] sm:$0x1] }
 0x142   : > { %6230 = vmatprep.mubr.msk.bf16.mxu1 %vm723_vm3, %v6790_v11  ;;  %v2302_v13 = vor.u32 %v2301_v28, %v2297_v46  ;;  %v6841_v11 = vld [vmem:[%s7108_s24 + $0x88] sm:$0xf]  ;;  %v2298_v7 = vsel %vm7134_vm4, %v2293_v52, %v2297_v46 }
 0x143   : > { %v2343_v19 = vshll.u32 %v6841_v11, 16  ;;  %v2347_v41 = vshrl.u32 %v6841_v11, 16  ;;  %v2307_v0 = vrot.slane %v2305_v30, 5  ;;  %v2336_v36 = vrot.slane %v2334_v9, 4 }
 0x144   : > { %v2303_v39 = vrot.slane %v2302_v13, 4  ;;  %v2353_v30 = vshll.u32 %v6844_v17, 16  ;;  %v2360_v9 = vrot.slane %v2358_v23, 4  ;;  %v2387_v11 = vrot.slane %v2385_v47, 5 }
 0x145   : > { %v8673_v24 = vrot.slane %v2343_v19, 5  ;;  %v2349_v49 = vrot.slane %v2347_v41, 4  ;;  %v6795_v19 = vld [vmem:[%s7108_s24 + $0xc0] sm:$0xff]  }
 0x146   : > { %v2308_v46 = vsel %vm7134_vm4, %v2303_v39, %v2307_v0  ;;  %v5466_v39 = vld [vmem:[%s7108_s24 + $0xa8] sm:$0xf] }
 0x147   : > { %v2350_v13 = vor.u32 %v2349_v49, %v8673_v24  ;;  %v5484_v41 = vcombine.low %v2298_v7, %v2308_v46  ;;  %v2401_v7 = vshll.u32 %v6846_v25, 16  ;;  %v2409_v45 = vshll.u32 %v5466_v39, 16 }
 0x148   : > { %6385 = vmatmul.mubr.msk.bf16.gmra.mrb[4].mxu0 %vm723_vm3, %v5755_v61  ;;  %v6842_v61 = vld [vmem:[%s7108_s24 + $0x94] sm:$0xf] }
 0x149   : > { %6231 = vmatmul.mubr.msk.bf16.gmra.mrb[20].mxu1 %vm723_vm3, %v6791_v51  ;;  %6388 = vmatprep.mubr.msk.bf16.mxu0 %vm723_vm3, %v5756_v10  ;;  %v2339_v10 = vrot.slane %v2337_v18, 5  ;;  %v2367_v51 = vshll.u32 %v6842_v61, 16  ;;  %v2371_v28 = vshrl.u32 %v6842_v61, 16  ;;  %v2351_v0 = vrot.slane %v2350_v13, 4 }
 0x14a   : > { %6234 = vmatprep.mubr.msk.bf16.mxu1 %vm723_vm3, %v6792_v21  ;;  %v2382_v21 = vshrl.u32 %v5463_v35, 16  ;;  %v6845_v35 = vld [vmem:[%s7108_s24 + $0x98] sm:$0x1]  ;;  %v2406_v61 = vshrl.u32 %v5466_v39, 16  ;;  %v5472_v39 = vld [vmem:[%s7108_s24 + $0xc0] sm:$0xf] }
 0x14b   : > { %v2340_v15 = vor.u32 %v2339_v10, %v2336_v36  ;;  %v8693_v26 = vrot.slane %v2367_v51, 5  ;;  %v2355_v36 = vrot.slane %v2353_v30, 5  ;;  %v2364_v10 = vor.u32 %v2363_v14, %v2360_v9  ;;  %v5469_v51 = vld [vmem:[%s7108_s24 + $0xb4] sm:$0xf] }
 0x14c   : > { %v2384_v18 = vrot.slane %v2382_v21, 4  ;;  %v2419_v21 = vshrl.u32 %v6847_v27, 16  ;;  %v2430_v20 = vshrl.u32 %v5469_v51, 16  ;;  %v2433_v42 = vshll.u32 %v5469_v51, 16 }
 0x14d   : > { %v2341_v52 = vrot.slane %v2340_v15, 4  ;;  %v2356_v46 = vsel %vm7134_vm4, %v2351_v0, %v2355_v36  ;;  %v2365_v15 = vrot.slane %v2364_v10, 4  ;;  %v2403_v30 = vrot.slane %v2401_v7, 5 }
 0x14e   : > { %v2388_v23 = vor.u32 %v2387_v11, %v2384_v18  ;;  %v2408_v9 = vrot.slane %v2406_v61, 4  ;;  %v2421_v11 = vrot.slane %v2419_v21, 4  ;;  %v6851_v61 = vld [vmem:[%s7108_s24 + $0xbc] sm:$0x1] }
 0x14f   : > { %v2346_v47 = vsel %vm7134_vm4, %v2341_v52, %v8673_v24  ;;  %v2370_v0 = vsel %vm7134_vm4, %v2365_v15, %v8693_v26  ;;  %v2449_v22 = vshll.u32 %v6851_v61, 16 }
 0x150   : > { %6389 = vmatmul.mubr.msk.bf16.gmra.mrb[8].mxu0 %vm723_vm3, %v5757_v40  ;;  %v2395_v40 = vshrl.u32 %v6843_v60, 16  ;;  %v2389_v17 = vrot.slane %v2388_v23, 4  ;;  %v5486_v24 = vcombine.low %v2346_v47, %v2356_v46 }
 0x151   : > { %6235 = vmatmul.mubr.msk.bf16.gmra.mrb[24].mxu1 %vm723_vm3, %v6793_v2  ;;  %6392 = vmatprep.mubr.msk.bf16.mxu0 %vm723_vm3, %v5758_v54  ;;  %v2373_v54 = vrot.slane %v2371_v28, 4 }
 0x152   : > { %6238 = vmatprep.mubr.msk.bf16.mxu1 %vm723_vm3, %v6794_v34  ;;  %v2397_v2 = vrot.slane %v2395_v40, 4  ;;  %v2377_v34 = vshll.u32 %v6845_v35, 16  ;;  %v2394_v10 = vsel %vm7134_vm4, %v2389_v17, %v8696_v6  ;;  %v2475_v17 = vrot.slane %v2473_v57, 5 }
 0x153   : > { %v2374_v49 = vor.u32 %v2373_v54, %v8693_v26  ;;  %v2411_v54 = vrot.slane %v2409_v45, 5  ;;  %v6849_v26 = vld [vmem:[%s7108_s24 + $0xb0] sm:$0x1] }
 0x154   : > { %v2398_v28 = vor.u32 %v2397_v2, %v8696_v6  ;;  %v2379_v60 = vrot.slane %v2377_v34, 5  ;;  %v2425_v35 = vshll.u32 %v6849_v26, 16  ;;  %v2454_v34 = vshrl.u32 %v5472_v39, 16 }
 0x155   : > { %v2375_v13 = vrot.slane %v2374_v49, 4  ;;  %v2412_v38 = vor.u32 %v2411_v54, %v2408_v9  ;;  %v2457_v6 = vshll.u32 %v5472_v39, 16  ;;  %v6850_v49 = vld [vmem:[%s7108_s24 + $0xc4] sm:$0xf] }
 0x156   : > { %v2399_v14 = vrot.slane %v2398_v28, 4  ;;  %v2463_v23 = vshll.u32 %v6850_v49, 16  ;;  %v2467_v25 = vshrl.u32 %v6850_v49, 16  ;;  %v2427_v45 = vrot.slane %v2425_v35, 5 }
 0x157   : > { %v2380_v36 = vsel %vm7134_vm4, %v2375_v13, %v2379_v60  ;;  %v2413_v51 = vrot.slane %v2412_v38, 4  ;;  %v2451_v60 = vrot.slane %v2449_v22, 5 }
 0x158   : > { %6393 = vmatmul.mubr.msk.bf16.gmra.mrb[12].mxu0 %vm723_vm3, %v5759_v53  ;;  %v2415_v53 = vshll.u32 %v6847_v27, 16  ;;  %v2404_v59 = vsel %vm7134_vm4, %v2399_v14, %v2403_v30  ;;  %v5487_v44 = vcombine.low %v2370_v0, %v2380_v36  ;;  %v2456_v27 = vrot.slane %v2454_v34, 4 }
 0x159   : > { %6239 = vmatmul.mubr.msk.bf16.gmra.mrb[28].mxu1 %vm723_vm3, %v6795_v19  ;;  %6396 = vmatprep.mubr.msk.bf16.mxu0 %vm723_vm3, %v5760_v33  ;;  %v6848_v33 = vld [vmem:[%s7108_s24 + $0xb8] sm:$0xf]  ;;  %v2432_v19 = vrot.slane %v2430_v20, 4  ;;  %v2465_v21 = vrot.slane %v2463_v23, 5  ;;  %v2469_v47 = vrot.slane %v2467_v25, 4  ;;  %s8795_s24 = sand.u32 1, %s6975_s16  }
 0x15a   : > { %6260 = vmatprep.mubr.msk.bf16.mxu1 %vm723_vm3, %v5484_v41  ;;  %v2439_v12 = vshll.u32 %v6848_v33, 16  ;;  %v2443_v40 = vshrl.u32 %v6848_v33, 16  ;;  %v2417_v18 = vrot.slane %v2415_v53, 5  ;;  %v2435_v41 = vrot.slane %v2433_v42, 5  ;;  %s5244_s29 = sshll.u32 %s8795_s24, 7  ;;  %s5245_s5 = sshll.u32 %s8795_s24, 3 }
 0x15b   : > { %v2459_v53 = vrot.slane %v2457_v6, 5  ;;  %s8798_s30 = scalar_lea.vmem [#allocation2], %s5244_s29  ;;  %s8837_s12 = scalar_lea.vmem [#allocation4], %s5245_s5 }
 0x15c   : > { %v2441_v52 = vrot.slane %v2439_v12, 5  ;;  %v2445_v2 = vrot.slane %v2443_v40, 4  ;;  %v2418_v20 = vsel %vm7134_vm4, %v2413_v51, %v2417_v18  ;;  %v2470_v12 = vor.u32 %v2469_v47, %v2465_v21  ;;  %s5077_s7 = sshll.u32 %s8798_s30, 4  ;;  %s8843_s14 = scalar_lea.vmem [#allocation6], %s5245_s5  ;;  %s8831_s7 = int_to_ptr.vmem [resolvable:$true] %s5077_s7 }
 0x15d   : > { %v2460_v33 = vor.u32 %v2459_v53, %v2456_v27  ;;  %s5053_s29 = scalar_lea.sflag [#allocation3], %s8795_s24  ;;  %s6853_s6 = scalar_lea.vmem %s8831_s7, 2048 }
 0x15e   : > { %v2446_v7 = vor.u32 %v2445_v2, %v2441_v52  ;;  %v2471_v13 = vrot.slane %v2470_v12, 4  ;;  %p6854_p12 = scmp.ne.s32.totalorder %s8831_s7, %s6853_s6  ;;  %p6860_p1 = scmp.lt.s32.totalorder %s8831_s7, %s6858_s10 }
 0x15f   : > { %v2461_v40 = vrot.slane %v2460_v33, 4  ;;  %p6861_p2 = scmp.lt.s32.totalorder %s6859_s22, %s6853_s6 }
 0x160   : > { %6397 = vmatmul.mubr.msk.bf16.gmra.mrb[16].mxu0 %vm723_vm3, %v5761_v37  ;;  %v2422_v37 = vor.u32 %v2421_v11, %v2417_v18  ;;  %v2447_v15 = vrot.slane %v2446_v7, 4  ;;  %v2476_v9 = vsel %vm7134_vm4, %v2471_v13, %v2475_v17  ;;  %p6855_p13 = pnand %p6854_p12, %p7065_p4 }
 0x161   : > { %6261 = vmatmul.mubr.msk.bf16.vlgmr.msra.gmra.mrb[16].mxu1 %vm723_vm3, %v8502_v1  ;;  %6400 = vmatprep.mubr.msk.bf16.mxu0 %vm723_vm3, %v5762_v3  ;;  %v2436_v1 = vor.u32 %v2435_v41, %v2432_v19  ;;  %v5488_v3 = vcombine.low %v2394_v10, %v2404_v59  ;;  %v2466_v30 = vsel %vm7134_vm4, %v2461_v40, %v2465_v21  ;;  %p6862_p3 = por %p6861_p2, %p6860_p1 }
 0x162   : > { %6264 = vmatprep.mubr.msk.bf16.mxu1 %vm723_vm3, %v5486_v24  ;;  %v2423_v28 = vrot.slane %v2422_v37, 4  ;;  %v2452_v48 = vsel %vm7134_vm4, %v2447_v15, %v2451_v60  ;;  %v5491_v14 = vcombine.low %v2466_v30, %v2476_v9  ;;  %p6856_p0 = pneg %p6855_p13 }
 0x163   : > { %v2437_v46 = vrot.slane %v2436_v1, 4 }
 0x164   : > { %v2428_v42 = vsel %vm7134_vm4, %v2423_v28, %v2427_v45  ;;  %p6863_p5 = pnand %p6862_p3, %p6856_p0 }
 0x165   : > { %v5489_v62 = vcombine.low %v2418_v20, %v2428_v42 }
 0x168   : > { %6401 = vmatmul.mubr.msk.bf16.gmra.mrb[20].mxu0 %vm723_vm3, %v5763_v8  ;;  %v2442_v8 = vsel %vm7134_vm4, %v2437_v46, %v2441_v52 }
 0x169   : > { %6265 = vmatmul.mubr.msk.bf16.gmra.mrb[20].mxu1 %vm723_vm3, %v5487_v44  ;;  %6404 = vmatprep.mubr.msk.bf16.mxu0 %vm723_vm3, %v5764_v56  ;;  %v5490_v56 = vcombine.low %v2442_v8, %v2452_v48 }
 0x16a   : > { %6268 = vmatprep.mubr.msk.bf16.mxu1 %vm723_vm3, %v5488_v3 }
 0x170   : > { %6405 = vmatmul.mubr.msk.bf16.gmra.mrb[24].mxu0 %vm723_vm3, %v5765_v43 }
 0x171   : > { %6269 = vmatmul.mubr.msk.bf16.gmra.mrb[24].mxu1 %vm723_vm3, %v5489_v62  ;;  %6408 = vmatprep.mubr.msk.bf16.mxu0 %vm723_vm3, %v5766_v50 }
 0x172   : > { %6272 = vmatprep.mubr.msk.bf16.mxu1 %vm723_vm3, %v5490_v56 }
 0x178   : > { %6409 = vmatmul.mubr.msk.bf16.gmra.mrb[28].mxu0 %vm723_vm3, %v5767_v29 }
 0x179   : > { %6273 = vmatmul.mubr.msk.bf16.gmra.mrb[28].mxu1 %vm723_vm3, %v5491_v14 }
 0x1f4   : > { %v6212_v63 = vpop.f32.mrb[0].mxu1 }
 0x1f5   : > { %v1886_v4 = vpop.f32.mrb[1].mxu1 }
 0x1f6   : > { %v6213_v43 = vpop.f32.mrb[2].mxu1 }
 0x1f7   : > { %v1889_v16 = vpop.f32.mrb[3].mxu1 }
 0x1fc   : > { %v6216_v58 = vpop.f32.mrb[4].mxu1 }
 0x1fd   : > { %v1902_v50 = vpop.f32.mrb[5].mxu1 }
 0x1fe   : > { %v6217_v54 = vpop.f32.mrb[6].mxu1 }
 0x1ff   : > { %v1905_v18 = vpop.f32.mrb[7].mxu1 }
 0x204   : > { %v6220_v11 = vpop.f32.mrb[8].mxu1 }
 0x205   : > { %v1918_v32 = vpop.f32.mrb[9].mxu1 }
 0x206   : > { %v6221_v24 = vpop.f32.mrb[10].mxu1 }
 0x207   : > { %v8784_v19 = vpop.f32.mrb[11].mxu1 }
 0x20c   : > { %v8786_v41 = vpop.f32.mrb[12].mxu1 }
 0x20d   : > { %v8788_v5 = vpop.f32.mrb[13].mxu1 }
 0x20e   : > { %v8790_v55 = vpop.f32.mrb[14].mxu1 }
 0x20f   : > { %v8792_v29 = vpop.f32.mrb[15].mxu1 }
 0x213   : > { %v6382_v52 = vpop.f32.mrb[0].mxu0 }
 0x214   : > { %v6414_v2 = vadd.f32 %v6382_v52, %v6212_v63  ;;  %v4637_v39 = vpop.f32.mrb[1].mxu0 }
 0x215   : > { %v6415_v0 = vadd.f32 %v4637_v39, %v1886_v4  ;;  %v6383_v36 = vpop.f32.mrb[2].mxu0 }
 0x216   : > { %v6416_v10 = vadd.f32 %v6383_v36, %v6213_v43  ;;  %v4640_v59 = vpop.f32.mrb[3].mxu0  ;;  %v4990_v49 = vmul.f32 %v6414_v2, %v6414_v2 }
 0x217   : > { %v6417_v38 = vadd.f32 %v4640_v59, %v1889_v16  ;;  %v4988_v26 = vmul.f32 %v6415_v0, %v6415_v0 }
 0x218   : > { %v5866_v37 = vpack.c.bf16 %v6416_v10, %v6414_v2  ;;  %v4991_v22 = vmul.f32 %v6416_v10, %v6416_v10 }
 0x219   : > { %v5861_v35 = vpack.c.bf16 %v6417_v38, %v6415_v0  ;;  %v4956_v34 = vadd.f32 %v6417_v38, %v6415_v0  ;;  %v4989_v6 = vmul.f32 %v6417_v38, %v6417_v38 }
 0x21a   : > { %5938 = vst [vmem:[%s8798_s30 + $0x8] sm:$0xff] %v5866_v37  }
 0x21b   : > { %5862 = vst [vmem:[%s8798_s30] sm:$0xff] %v5861_v35   ;;  %v4957_v23 = vadd.f32 %v6414_v2, %v4956_v34  ;;  %v5020_v25 = vadd.f32 %v4989_v6, %v4988_v26  ;;  %v6386_v1 = vpop.f32.mrb[4].mxu0 }
 0x21c   : > { %v6418_v7 = vadd.f32 %v6386_v1, %v6216_v58  ;;  %v4653_v61 = vpop.f32.mrb[5].mxu0 }
 0x21d   : > { %v5021_v44 = vadd.f32 %v5020_v25, %v4990_v49  ;;  %v6419_v3 = vadd.f32 %v4653_v61, %v1902_v50  ;;  %v4958_v51 = vadd.f32 %v6416_v10, %v4957_v23  ;;  %v6387_v28 = vpop.f32.mrb[6].mxu0 }
 0x21e   : > { %v6420_v45 = vadd.f32 %v6387_v28, %v6217_v54  ;;  %v4656_v27 = vpop.f32.mrb[7].mxu0  ;;  %v4994_v12 = vmul.f32 %v6418_v7, %v6418_v7 }
 0x21f   : > { %v4959_v53 = vadd.f32 %v6419_v3, %v4958_v51  ;;  %v4992_v21 = vmul.f32 %v6419_v3, %v6419_v3  ;;  %v5022_v47 = vadd.f32 %v5021_v44, %v4991_v22  ;;  %v6421_v46 = vadd.f32 %v4656_v27, %v1905_v18 }
 0x220   : > { %v5876_v15 = vpack.c.bf16 %v6420_v45, %v6418_v7  ;;  %v4995_v56 = vmul.f32 %v6420_v45, %v6420_v45 }
 0x221   : > { %v5023_v60 = vadd.f32 %v5022_v47, %v4992_v21  ;;  %v5871_v20 = vpack.c.bf16 %v6421_v46, %v6419_v3  ;;  %v4960_v42 = vadd.f32 %v6421_v46, %v4959_v53  ;;  %v4993_v33 = vmul.f32 %v6421_v46, %v6421_v46 }
 0x222   : > { %5940 = vst [vmem:[%s8798_s30 + $0x18] sm:$0xff] %v5876_v15  }
 0x223   : > { %5939 = vst [vmem:[%s8798_s30 + $0x10] sm:$0xff] %v5871_v20   ;;  %v4961_v31 = vadd.f32 %v6418_v7, %v4960_v42  ;;  %v5024_v57 = vadd.f32 %v5023_v60, %v4993_v33  ;;  %v6390_v8 = vpop.f32.mrb[8].mxu0 }
 0x224   : > { %v6422_v48 = vadd.f32 %v6390_v8, %v6220_v11  ;;  %v4669_v62 = vpop.f32.mrb[9].mxu0 }
 0x225   : > { %v5025_v40 = vadd.f32 %v5024_v57, %v4994_v12  ;;  %v6423_v13 = vadd.f32 %v4669_v62, %v1918_v32  ;;  %v4962_v17 = vadd.f32 %v6420_v45, %v4961_v31  ;;  %v6391_v30 = vpop.f32.mrb[10].mxu0 }
 0x226   : > { %v6424_v9 = vadd.f32 %v6391_v30, %v6221_v24  ;;  %v4672_v14 = vpop.f32.mrb[11].mxu0  ;;  %v4998_v52 = vmul.f32 %v6422_v48, %v6422_v48 }
 0x227   : > { %v4963_v63 = vadd.f32 %v6423_v13, %v4962_v17  ;;  %v4996_v4 = vmul.f32 %v6423_v13, %v6423_v13  ;;  %v5026_v43 = vadd.f32 %v5025_v40, %v4995_v56  ;;  %v6425_v16 = vadd.f32 %v4672_v14, %v8784_v19 }
 0x228   : > { %v5886_v58 = vpack.c.bf16 %v6424_v9, %v6422_v48  ;;  %v4999_v36 = vmul.f32 %v6424_v9, %v6424_v9 }
 0x229   : > { %v5027_v50 = vadd.f32 %v5026_v43, %v4996_v4  ;;  %v5881_v54 = vpack.c.bf16 %v6425_v16, %v6423_v13  ;;  %v4964_v18 = vadd.f32 %v6425_v16, %v4963_v63  ;;  %v4997_v11 = vmul.f32 %v6425_v16, %v6425_v16 }
 0x22a   : > { %5942 = vst [vmem:[%s8798_s30 + $0x28] sm:$0xff] %v5886_v58  }
 0x22b   : > { %5941 = vst [vmem:[%s8798_s30 + $0x20] sm:$0xff] %v5881_v54   ;;  %v4965_v2 = vadd.f32 %v6422_v48, %v4964_v18  ;;  %v5028_v32 = vadd.f32 %v5027_v50, %v4997_v11  ;;  %v6394_v39 = vpop.f32.mrb[12].mxu0 }
 0x22c   : > { %v6426_v0 = vadd.f32 %v6394_v39, %v8786_v41  ;;  %v4685_v24 = vpop.f32.mrb[13].mxu0 }
 0x22d   : > { %v5029_v10 = vadd.f32 %v5028_v32, %v4998_v52  ;;  %v6427_v59 = vadd.f32 %v4685_v24, %v8788_v5  ;;  %v4966_v19 = vadd.f32 %v6424_v9, %v4965_v2  ;;  %v6395_v38 = vpop.f32.mrb[14].mxu0 }
 0x22e   : > { %v6428_v37 = vadd.f32 %v6395_v38, %v8790_v55  ;;  %v4688_v26 = vpop.f32.mrb[15].mxu0  ;;  %v5002_v61 = vmul.f32 %v6426_v0, %v6426_v0 }
 0x22f   : > { %v4967_v35 = vadd.f32 %v6427_v59, %v4966_v19  ;;  %v5000_v34 = vmul.f32 %v6427_v59, %v6427_v59  ;;  %v5030_v6 = vadd.f32 %v5029_v10, %v4999_v36  ;;  %v6429_v49 = vadd.f32 %v4688_v26, %v8792_v29 }
 0x230   : > { %v5896_v23 = vpack.c.bf16 %v6428_v37, %v6426_v0  ;;  %v5003_v55 = vmul.f32 %v6428_v37, %v6428_v37 }
 0x231   : > { %v5031_v25 = vadd.f32 %v5030_v6, %v5000_v34  ;;  %v5891_v41 = vpack.c.bf16 %v6429_v49, %v6427_v59  ;;  %v4968_v1 = vadd.f32 %v6429_v49, %v4967_v35  ;;  %v5001_v7 = vmul.f32 %v6429_v49, %v6429_v49 }
 0x232   : > { %5944 = vst [vmem:[%s8798_s30 + $0x38] sm:$0xff] %v5896_v23  }
 0x233   : > { %5943 = vst [vmem:[%s8798_s30 + $0x30] sm:$0xff] %v5891_v41   ;;  %v4969_v5 = vadd.f32 %v6426_v0, %v4968_v1  ;;  %v5032_v22 = vadd.f32 %v5031_v25, %v5001_v7  ;;  %v6398_v44 = vpop.f32.mrb[16].mxu0 }
 0x234   : > { %v6262_v3 = vpop.f32.mrb[16].mxu1  ;;  %v4701_v51 = vpop.f32.mrb[17].mxu0 }
 0x235   : > { %v5033_v28 = vadd.f32 %v5032_v22, %v5002_v61  ;;  %v6430_v45 = vadd.f32 %v6398_v44, %v6262_v3  ;;  %v2676_v27 = vpop.f32.mrb[17].mxu1  ;;  %v4970_v53 = vadd.f32 %v6428_v37, %v4969_v5  ;;  %v6399_v29 = vpop.f32.mrb[18].mxu0 }
 0x236   : > { %v6431_v21 = vadd.f32 %v4701_v51, %v2676_v27  ;;  %v6263_v47 = vpop.f32.mrb[18].mxu1  ;;  %v4704_v46 = vpop.f32.mrb[19].mxu0 }
 0x237   : > { %v5034_v15 = vadd.f32 %v5033_v28, %v5003_v55  ;;  %v6432_v60 = vadd.f32 %v6399_v29, %v6263_v47  ;;  %v2679_v20 = vpop.f32.mrb[19].mxu1  ;;  %v5006_v40 = vmul.f32 %v6430_v45, %v6430_v45 }
 0x238   : > { %v4971_v42 = vadd.f32 %v6431_v21, %v4970_v53  ;;  %v5004_v33 = vmul.f32 %v6431_v21, %v6431_v21  ;;  %v6433_v12 = vadd.f32 %v4704_v46, %v2679_v20 }
 0x239   : > { %v5906_v31 = vpack.c.bf16 %v6432_v60, %v6430_v45  ;;  %v5007_v43 = vmul.f32 %v6432_v60, %v6432_v60 }
 0x23a   : > { %v5035_v57 = vadd.f32 %v5034_v15, %v5004_v33  ;;  %v5901_v8 = vpack.c.bf16 %v6433_v12, %v6431_v21  ;;  %v4972_v48 = vadd.f32 %v6433_v12, %v4971_v42  ;;  %v5005_v62 = vmul.f32 %v6433_v12, %v6433_v12 }
 0x23b   : > { %5946 = vst [vmem:[%s8798_s30 + $0x48] sm:$0xff] %v5906_v31   ;;  %v6402_v56 = vpop.f32.mrb[20].mxu0 }
 0x23c   : > { %5945 = vst [vmem:[%s8798_s30 + $0x40] sm:$0xff] %v5901_v8   ;;  %v4973_v13 = vadd.f32 %v6430_v45, %v4972_v48  ;;  %v5036_v17 = vadd.f32 %v5035_v57, %v5005_v62  ;;  %v6266_v30 = vpop.f32.mrb[20].mxu1  ;;  %v4717_v9 = vpop.f32.mrb[21].mxu0 }
 0x23d   : > { %v6434_v14 = vadd.f32 %v6402_v56, %v6266_v30  ;;  %v2692_v63 = vpop.f32.mrb[21].mxu1  ;;  %v6403_v4 = vpop.f32.mrb[22].mxu0 }
 0x23e   : > { %v5037_v16 = vadd.f32 %v5036_v17, %v5006_v40  ;;  %v6435_v58 = vadd.f32 %v4717_v9, %v2692_v63  ;;  %v4974_v50 = vadd.f32 %v6432_v60, %v4973_v13  ;;  %v6267_v54 = vpop.f32.mrb[22].mxu1  ;;  %v4720_v18 = vpop.f32.mrb[23].mxu0 }
 0x23f   : > { %v6436_v11 = vadd.f32 %v6403_v4, %v6267_v54  ;;  %v2695_v52 = vpop.f32.mrb[23].mxu1  ;;  %v5010_v37 = vmul.f32 %v6434_v14, %v6434_v14 }
 0x240   : > { %v4975_v2 = vadd.f32 %v6435_v58, %v4974_v50  ;;  %v5008_v32 = vmul.f32 %v6435_v58, %v6435_v58  ;;  %v5038_v39 = vadd.f32 %v5037_v16, %v5007_v43  ;;  %v6437_v0 = vadd.f32 %v4720_v18, %v2695_v52 }
 0x241   : > { %v5916_v24 = vpack.c.bf16 %v6436_v11, %v6434_v14  ;;  %v5011_v41 = vmul.f32 %v6436_v11, %v6436_v11 }
 0x242   : > { %v5039_v36 = vadd.f32 %v5038_v39, %v5008_v32  ;;  %v5911_v10 = vpack.c.bf16 %v6437_v0, %v6435_v58  ;;  %v4976_v59 = vadd.f32 %v6437_v0, %v4975_v2  ;;  %v5009_v19 = vmul.f32 %v6437_v0, %v6437_v0 }
 0x243   : > { %5948 = vst [vmem:[%s8798_s30 + $0x58] sm:$0xff] %v5916_v24   ;;  %v6406_v38 = vpop.f32.mrb[24].mxu0 }
 0x244   : > { %5947 = vst [vmem:[%s8798_s30 + $0x50] sm:$0xff] %v5911_v10   ;;  %v4977_v26 = vadd.f32 %v6434_v14, %v4976_v59  ;;  %v5040_v35 = vadd.f32 %v5039_v36, %v5009_v19  ;;  %v6270_v34 = vpop.f32.mrb[24].mxu1  ;;  %v4733_v6 = vpop.f32.mrb[25].mxu0 }
 0x245   : > { %v6438_v49 = vadd.f32 %v6406_v38, %v6270_v34  ;;  %v2708_v23 = vpop.f32.mrb[25].mxu1  ;;  %v6407_v25 = vpop.f32.mrb[26].mxu0 }
 0x246   : > { %v5041_v1 = vadd.f32 %v5040_v35, %v5010_v37  ;;  %v6439_v7 = vadd.f32 %v4733_v6, %v2708_v23  ;;  %v4978_v61 = vadd.f32 %v6436_v11, %v4977_v26  ;;  %v6271_v5 = vpop.f32.mrb[26].mxu1  ;;  %v4736_v22 = vpop.f32.mrb[27].mxu0 }
 0x247   : > { %v6440_v44 = vadd.f32 %v6407_v25, %v6271_v5  ;;  %v2711_v3 = vpop.f32.mrb[27].mxu1  ;;  %v5014_v15 = vmul.f32 %v6438_v49, %v6438_v49 }
 0x248   : > { %v4979_v51 = vadd.f32 %v6439_v7, %v4978_v61  ;;  %v5012_v55 = vmul.f32 %v6439_v7, %v6439_v7  ;;  %v5042_v28 = vadd.f32 %v5041_v1, %v5011_v41  ;;  %v6441_v45 = vadd.f32 %v4736_v22, %v2711_v3 }
 0x249   : > { %v5926_v27 = vpack.c.bf16 %v6440_v44, %v6438_v49  ;;  %v5015_v8 = vmul.f32 %v6440_v44, %v6440_v44 }
 0x24a   : > { %v5043_v53 = vadd.f32 %v5042_v28, %v5012_v55  ;;  %v5921_v29 = vpack.c.bf16 %v6441_v45, %v6439_v7  ;;  %v4980_v21 = vadd.f32 %v6441_v45, %v4979_v51  ;;  %v5013_v47 = vmul.f32 %v6441_v45, %v6441_v45 }
 0x24b   : > { %5950 = vst [vmem:[%s8798_s30 + $0x68] sm:$0xff] %v5926_v27   ;;  %v6410_v46 = vpop.f32.mrb[28].mxu0 }
 0x24c   : > { %5949 = vst [vmem:[%s8798_s30 + $0x60] sm:$0xff] %v5921_v29   ;;  %v4981_v60 = vadd.f32 %v6438_v49, %v4980_v21  ;;  %v5044_v20 = vadd.f32 %v5043_v53, %v5013_v47  ;;  %v6274_v42 = vpop.f32.mrb[28].mxu1  ;;  %v4749_v33 = vpop.f32.mrb[29].mxu0 }
 0x24d   : > { %v6442_v12 = vadd.f32 %v6410_v46, %v6274_v42  ;;  %v2724_v31 = vpop.f32.mrb[29].mxu1  ;;  %v6411_v57 = vpop.f32.mrb[30].mxu0 }
 0x24e   : > { %v5045_v48 = vadd.f32 %v5044_v20, %v5014_v15  ;;  %v6443_v62 = vadd.f32 %v4749_v33, %v2724_v31  ;;  %v4982_v56 = vadd.f32 %v6440_v44, %v4981_v60  ;;  %v6275_v40 = vpop.f32.mrb[30].mxu1  ;;  %v4752_v13 = vpop.f32.mrb[31].mxu0 }
 0x24f   : > { %v6444_v17 = vadd.f32 %v6411_v57, %v6275_v40  ;;  %v2727_v30 = vpop.f32.mrb[31].mxu1  ;;  %v5018_v18 = vmul.f32 %v6442_v12, %v6442_v12 }
 0x250   : > { %v4983_v9 = vadd.f32 %v6443_v62, %v4982_v56  ;;  %v5016_v14 = vmul.f32 %v6443_v62, %v6443_v62  ;;  %v5046_v63 = vadd.f32 %v5045_v48, %v5015_v8  ;;  %v6445_v4 = vadd.f32 %v4752_v13, %v2727_v30 }
 0x251   : > { %v5936_v43 = vpack.c.bf16 %v6444_v17, %v6442_v12 }
 0x252   : > { %v5047_v16 = vadd.f32 %v5046_v63, %v5016_v14  ;;  %v5931_v58 = vpack.c.bf16 %v6445_v4, %v6443_v62  ;;  %v4984_v50 = vadd.f32 %v6445_v4, %v4983_v9  ;;  %v5017_v54 = vmul.f32 %v6445_v4, %v6445_v4 }
 0x253   : > { %5952 = vst [vmem:[%s8798_s30 + $0x78] sm:$0xff] %v5936_v43  }
 0x254   : > { %5951 = vst [vmem:[%s8798_s30 + $0x70] sm:$0xff] %v5931_v58   ;;  %v4985_v11 = vadd.f32 %v6442_v12, %v4984_v50  ;;  %v5048_v52 = vadd.f32 %v5047_v16, %v5017_v54 }
 0x255   : > { %6866 = shalt.err (!%p6863_p5)
}
 0x256   : > { %s6867_s30 = scalar_lea.hbm %s8829_s11, 2048  ;;  %s6871_s9 = scalar_lea.hbm %s8967_s2, 4096 }
 0x257   : > { %p6868_p6 = scmp.ne.s32.totalorder %s8829_s11, %s6867_s30  ;;  %p6872_p10 = scmp.lt.u32.totalorder %s8829_s11, %s8967_s2 }
 0x258   : > { %p6873_p11 = scmp.lt.u32.totalorder %s6871_s9, %s6867_s30  ;;  %p6875_p13 = scmp.lt.u32.totalorder %s6867_s30, %s8829_s11 }
 0x259   : > { %p6869_p7 = pnand %p6868_p6, %p7065_p4 }
 0x25a   : > { %p6874_p12 = por %p6873_p11, %p6872_p10 }
 0x25b   : > { %p6870_p9 = pneg %p6869_p7 }
 0x25c   : > { %p6876_p0 = por %p6875_p13, %p6874_p12 }
 0x25e   : > { %p6877_p1 = pnand %p6876_p0, %p6870_p9 }
 0x260   : > { %6880 = shalt.err (!%p6877_p1)
}
 0x261   : > { %s6994_s22 = smov 64   ;;  %s6995_s13 = smov 4   ;;  %v5019_v2 = vmul.f32 %v6444_v17, %v6444_v17  ;;  %v5049_v32 = vadd.f32 %v5048_v52, %v5018_v18  ;;  %v4986_v39 = vadd.f32 %v6444_v17, %v4985_v11 }
 0x262   : > { %6681 = dma.vmem_to_hbm [thread:$0]  (%p7065_p4), %s8831_s7, 2048, %s8829_s11, %s5053_s29, %s6994_s22, %s6994_s22, %s6995_s13  }
 0x263   : > { %s8875_s30 = scalar_lea.hbm %s8968_s3, %s5821_s21  ;;  %s9040_s5 = sshll.u32 %s8837_s12, 4  ;;  %4987 = vst [vmem:[%s8837_s12] sm:$0xff] %v4986_v39  ;;  %v5050_v0 = vadd.f32 %v5049_v32, %v5019_v2  ;;  %s8879_s5 = int_to_ptr.vmem [resolvable:$true] %s9040_s5 }
 0x264   : > { %s8887_s7 = scalar_lea.hbm %s8969_s4, %s5821_s21  ;;  %s9041_s11 = sshll.u32 %s8843_s14, 4  ;;  %s8891_s11 = int_to_ptr.vmem [resolvable:$true] %s9041_s11 }
 0x265   : > { %s5058_s29 = scalar_lea.sflag [#allocation5], %s8824_s8  ;;  %s6881_s10 = scalar_lea.vmem %s8879_s5, 128 }
 0x266   : > { %p6882_p2 = scmp.ne.s32.totalorder %s8879_s5, %s6881_s10  ;;  %s6996_s22 = smov [#allocation4]  }
 0x267   : > { %s6885_s13 = sshll.u32 %s6996_s22, 4  ;;  %s6886_s13 = int_to_ptr.vmem [resolvable:$false] %s6885_s13 }
 0x268   : > { %p6883_p3 = pnand %p6882_p2, %p7065_p4  ;;  %s6887_s12 = scalar_lea.vmem %s6886_s13, 256 }
 0x269   : > { %p6888_p6 = scmp.lt.s32.totalorder %s8879_s5, %s6886_s13  ;;  %p6889_p7 = scmp.lt.s32.totalorder %s6887_s12, %s6881_s10 }
 0x26a   : > { %p6884_p5 = pneg %p6883_p3 }
 0x26b   : > { %p6890_p9 = por %p6889_p7, %p6888_p6 }
 0x26d   : > { %p6891_p10 = pnand %p6890_p9, %p6884_p5 }
 0x26f   : > { %6894 = shalt.err (!%p6891_p10)
}
 0x270   : > { %s6895_s18 = scalar_lea.hbm %s8875_s30, 128  ;;  %s6899_s6 = scalar_lea.hbm %s8968_s3, 256 }
 0x271   : > { %p6896_p11 = scmp.ne.s32.totalorder %s8875_s30, %s6895_s18  ;;  %p6900_p0 = scmp.lt.u32.totalorder %s8875_s30, %s8968_s3 }
 0x272   : > { %p6901_p1 = scmp.lt.u32.totalorder %s6899_s6, %s6895_s18  ;;  %p6903_p3 = scmp.lt.u32.totalorder %s6895_s18, %s8875_s30 }
 0x273   : > { %p6897_p12 = pnand %p6896_p11, %p7065_p4 }
 0x274   : > { %p6902_p2 = por %p6901_p1, %p6900_p0 }
 0x275   : > { %p6898_p13 = pneg %p6897_p12 }
 0x276   : > { %p6904_p5 = por %p6903_p3, %p6902_p2 }
 0x278   : > { %p6905_p6 = pnand %p6904_p5, %p6898_p13 }
 0x27a   : > { %6908 = shalt.err (!%p6905_p6)
}
 0x27b   : > { %6682 = dma.vmem_to_hbm [thread:$0]  (%p7065_p4), %s8879_s5, 128, %s8875_s30, %s5058_s29   ;;  %5051 = vst [vmem:[%s8843_s14] sm:$0xff] %v5050_v0 }
 0x27c   : > { %s6909_s10 = scalar_lea.vmem %s8891_s11, 128  ;;  %s6997_s22 = smov [#allocation6]  }
 0x27d   : > { %p6910_p7 = scmp.ne.s32.totalorder %s8891_s11, %s6909_s10  ;;  %s6913_s13 = sshll.u32 %s6997_s22, 4  ;;  %s6914_s13 = int_to_ptr.vmem [resolvable:$false] %s6913_s13 }
 0x27e   : > { %s6915_s12 = scalar_lea.vmem %s6914_s13, 256  ;;  %p6916_p11 = scmp.lt.s32.totalorder %s8891_s11, %s6914_s13 }
 0x27f   : > { %p6911_p9 = pnand %p6910_p7, %p7065_p4  ;;  %p6917_p12 = scmp.lt.s32.totalorder %s6915_s12, %s6909_s10 }
 0x281   : > { %p6912_p10 = pneg %p6911_p9  ;;  %p6918_p13 = por %p6917_p12, %p6916_p11 }
 0x283   : > { %p6919_p0 = pnand %p6918_p13, %p6912_p10 }
 0x285   : > { %6922 = shalt.err (!%p6919_p0)
}
 0x286   : > { %s6923_s14 = scalar_lea.hbm %s8887_s7, 128  ;;  %s6927_s18 = scalar_lea.hbm %s8969_s4, 256 }
 0x287   : > { %p6924_p1 = scmp.ne.s32.totalorder %s8887_s7, %s6923_s14  ;;  %p6928_p5 = scmp.lt.u32.totalorder %s8887_s7, %s8969_s4 }
 0x288   : > { %p6929_p6 = scmp.lt.u32.totalorder %s6927_s18, %s6923_s14  ;;  %p6931_p9 = scmp.lt.u32.totalorder %s6923_s14, %s8887_s7 }
 0x289   : > { %p6925_p2 = pnand %p6924_p1, %p7065_p4 }
 0x28a   : > { %p6930_p7 = por %p6929_p6, %p6928_p5 }
 0x28b   : > { %p6926_p3 = pneg %p6925_p2 }
 0x28c   : > { %p6932_p10 = por %p6931_p9, %p6930_p7 }
 0x28e   : > { %p6933_p11 = pnand %p6932_p10, %p6926_p3 }
 0x290   : > { %6936 = shalt.err (!%p6933_p11)
}
 0x291   : > { %6683 = dma.vmem_to_hbm [thread:$0]  (%p7065_p4), %s8891_s11, 128, %s8887_s7, %s5058_s29  }
 0x292 PF: > { %p6697_p12 = scmp.ge.s32.totalorder %s6991_s20, 2  ;;  %s5120_s6 = sand.u32 1, %s6971_s15  }
 0x293   : > { %s5121_s9 = scalar_lea.sflag [#allocation3], %s5120_s6 }
 0x294   : > { %p6688_p13 = pnand %p6697_p12, %p7074_p8 }
 0x296   : > { %6962 = dma.done.wait (!%p6688_p13), %s5121_s9, 2048  }
 0x297   : > { %6964 = vsyncadd (!%p6688_p13), %s5121_s9, 4294965248  ;;  %s9042_s24 = sadd.s32 4294967294, %s6991_s20  }
 0x298   : > { %s5129_s10 = sand.u32 1, %s9042_s24  }
 0x299   : > { %s5130_s25 = scalar_lea.sflag [#allocation5], %s5129_s10 }
 0x29a   : > { %6966 = dma.done.wait (!%p6688_p13), %s5130_s25, 256  }
 0x29b   : > { %6968 = vsyncadd (!%p6688_p13), %s5130_s25, 4294967040  ;;  %s21_s20 = sadd.s32 1, %s6991_s20   ;;  %s9043_s15 = smov %s6975_s16 }
 0x29c   : > { %p18_p4 = scmp.ge.s32.totalorder %s21_s20, 4   ;;  %s9044_s16 = smov %s6979_s17 }
 0x29d   : > { %s9045_s17 = smov %s7080_s28  ;;  %s9046_s18 = smov %s6987_s19 }
 0x29e   : > { %s9047_s19 = smov %s9049_s23  ;;  %20 = sbr.rel (!%p18_p4) target bundleno = 6 (0x6), region = 105 }
 0x2a5   :  { %5144 = vsyncpa [#allocation3], 1 }
 0x2a6   :  { %5146 = vsyncpa [#allocation3 + $0x1], 1 }
 0x2a7   :  { %5147 = vsyncpa [#allocation5], 1 }
 0x2a8   :  { %5149 = vsyncpa [#allocation5 + $0x1], 1 }

</bundles_post_ra>
